<compile_context>
chip_gen: v5e
topology: v5e:2x2
jax: 0.10.0
libtpu: 0.0.40
codegen_flags: <defaults>
</compile_context>

<pallas_src>
import math
import numpy as np
import jax
import jax.numpy as jnp
from jax import lax
from jax.experimental import pallas as pl
from jax.experimental.pallas import tpu as pltpu


def _round_up(v, m):
    return (v + m - 1) // m * m


# ----------------------------------------------------------------------------
# Fused kernel: per-cluster neighbour gather -> shared MLP -> max reduction
# ----------------------------------------------------------------------------
def _fused_gather_mlp_max_kernel(nbr_ref, x_ref, w_ref, b_ref, out_ref):
    tm, k = nbr_ref.shape          # clusters in this tile, neighbours per cluster
    n, c_in = x_ref.shape          # all points (payload resident in VMEM)
    c_pad = out_ref.shape[-1]      # 128-padded output channels

    idx = nbr_ref[...]                                                      # [tm, k] int32
    # Exact one-hot row gather on the MXU; one-hot values are 0/1 so bf16 is exact,
    # f32 accumulation keeps the selected rows bit-identical to the bf16 payload.
    onehot = (idx[:, :, None] ==
              lax.broadcasted_iota(jnp.int32, (tm, k, n), 2)).astype(x_ref.dtype)
    gx = jnp.dot(onehot.reshape(tm * k, n), x_ref[...],
                 preferred_element_type=jnp.float32)                        # [tm*k, c_in]
    # Shared MLP on the gathered rows; bias add + relu in f32.
    h = jnp.dot(gx.astype(x_ref.dtype), w_ref[...],
                preferred_element_type=jnp.float32) + b_ref[...]            # [tm*k, c_pad]
    h = jnp.maximum(h, 0.0)
    # scatter_max with exactly k incoming edges per cluster == max over its k gathered rows.
    out_ref[...] = jnp.max(h.reshape(tm, k, c_pad), axis=1)


# ----------------------------------------------------------------------------
# Graph construction (plain JAX) -- data-dependent argmax / top-k selection.
# TODO(synk): fps / knn have no clean Pallas TPU equivalent; they stay outside the kernels.
# ----------------------------------------------------------------------------
def _farthest_point_sampling(pos, num_samples):
    # Deterministic FPS starting at index 0 (PyG's fps uses a random start point).
    d2 = jnp.sum((pos[:, None, :] - pos[None, :, :]) ** 2, axis=-1)   # [n, n]
    idx0 = jnp.zeros((num_samples,), jnp.int32)

    def body(i, carry):
        idx, min_d2 = carry
        nxt = jnp.argmax(min_d2).astype(jnp.int32)
        idx = idx.at[i].set(nxt)
        min_d2 = jnp.minimum(min_d2, d2[nxt])
        return idx, min_d2

    idx, _ = lax.fori_loop(1, num_samples, body, (idx0, d2[0]))
    return idx


def _build_graph(pos, ratio, k):
    n = pos.shape[0]
    m = int(math.ceil(ratio * n))
    id_clusters = _farthest_point_sampling(pos, m)                              # [m]
    d2 = jnp.sum((pos[id_clusters][:, None, :] - pos[None, :, :]) ** 2, axis=-1)  # [m, n]
    _, nbr = lax.top_k(-d2, k)                                                  # k nearest (self incl.)
    return id_clusters, nbr.astype(jnp.int32)


# ----------------------------------------------------------------------------
# Wrapper (mirrors TransitionDown.forward)
# ----------------------------------------------------------------------------
def transition_down(x, pos, batch, params, *, ratio=0.25, k=16, tile_m=128):
    # TODO(synk): only batch=None (single point cloud) is supported.
    assert batch is None
    n, c_in = x.shape
    c_out = params["w"].shape[1]

    id_clusters, nbr = _build_graph(pos, ratio, k)
    m = nbr.shape[0]

    # Lane-dense channel padding (multiple of 128) -> unmasked vector stores.
    c_pad = _round_up(c_out, 128)
    w_pad = (jnp.zeros((c_in, c_pad), jnp.bfloat16)
             .at[:, :c_out].set(params["w"].astype(jnp.bfloat16)))
    b_pad = jnp.zeros((1, c_pad), jnp.float32).at[:, :c_out].set(params["b"])
    x_bf16 = x.astype(jnp.bfloat16)            # halves payload HBM traffic; gather stays exact

    tile_m = min(tile_m, m)
    assert m % tile_m == 0

    tiled = lambda i: (i, 0)
    full = lambda i: (0, 0)

    out_pad = pl.pallas_call(
        _fused_gather_mlp_max_kernel,
        out_shape=jax.ShapeDtypeStruct((m, c_pad), jnp.float32),
        grid_spec=pltpu.PrefetchScalarGridSpec(
            num_scalar_prefetch=0,
            grid=(m // tile_m,),
            in_specs=[
                pl.BlockSpec((tile_m, k), tiled),      # neighbour indices (tile_m, k)
                pl.BlockSpec((n, c_in), full),         # raw features of all points (bf16)
                pl.BlockSpec((c_in, c_pad), full),     # W (bf16, zero-padded columns)
                pl.BlockSpec((1, c_pad), full),        # b (f32)
            ],
            out_specs=pl.BlockSpec((tile_m, c_pad), tiled),
        ),
        compiler_params=pltpu.CompilerParams(dimension_semantics=("parallel",)),
    )(nbr, x_bf16, w_pad, b_pad)

    out = out_pad[:, :c_out]
    sub_pos = pos[id_clusters]
    sub_batch = None
    return out, sub_pos, sub_batch


# ----------------------------------------------------------------------------
# Parameter init (MLP([in_channels, out_channels]))
# TODO(synk): PyG MLP's BatchNorm1d is omitted; at inference it folds into the linear scale/bias.
# ----------------------------------------------------------------------------
def init_params(key, c_in, c_out):
    kw, kb = jax.random.split(key)
    return dict(
        w=jax.random.normal(kw, (c_in, c_out), jnp.float32) / jnp.sqrt(float(c_in)),
        b=0.01 * jax.random.normal(kb, (1, c_out), jnp.float32),
    )


# ----------------------------------------------------------------------------
# Pure-JAX reference (same math, exact indexed gather) for a sanity check
# ----------------------------------------------------------------------------
def reference(x, pos, id_clusters, nbr, params):
    h = jnp.maximum(x @ params["w"] + params["b"], 0.0)    # [n, c_out]
    out = jnp.max(h[nbr], axis=1)                          # [m, c_out]  (scatter_max, fixed k)
    return out, pos[id_clusters]


if __name__ == "__main__":
    N, C_IN, C_OUT, RATIO, K = 256, 32, 64, 0.25, 16
    key = jax.random.PRNGKey(0)
    kx, kpos, kp = jax.random.split(key, 3)
    x = jax.random.normal(kx, (N, C_IN), jnp.float32)
    pos = jax.random.uniform(kpos, (N, 3), jnp.float32)
    params = init_params(kp, C_IN, C_OUT)

    out, sub_pos, sub_batch = transition_down(x, pos, None, params, ratio=RATIO, k=K)
    out = jax.block_until_ready(out)
    sub_pos = jax.block_until_ready(sub_pos)

    id_clusters, nbr = _build_graph(pos, RATIO, K)
    ref_out, ref_pos = reference(x, pos, id_clusters, nbr, params)
    # bf16 x / W inside the kernel -> allow small relative deviation vs f32 reference.
    np.testing.assert_allclose(np.asarray(out), np.asarray(ref_out), rtol=3e-2, atol=3e-2)
    np.testing.assert_allclose(np.asarray(sub_pos), np.asarray(ref_pos), rtol=1e-6, atol=1e-6)
    assert out.shape == (int(math.ceil(RATIO * N)), C_OUT) and sub_pos.shape[1] == 3

    print("KERNEL_OK")
</pallas_src>

<mosaic_0001>
module attributes {stable_mosaic.version = 11 : i64} {
  func.func @_fused_gather_mlp_max_kernel(%arg0: i32, %arg1: memref<64x16xi32, #tpu.memory_space<vmem>>, %arg2: memref<256x32xbf16, #tpu.memory_space<vmem>>, %arg3: memref<32x128xbf16, #tpu.memory_space<vmem>>, %arg4: memref<1x128xf32, #tpu.memory_space<vmem>>, %arg5: memref<64x128xf32, #tpu.memory_space<vmem>>) attributes {dimension_semantics = [#tpu.dimension_semantics<parallel>], iteration_bounds = array<i64: 1>, scalar_prefetch = 0 : i64, scratch_operands = 0 : i64, tpu.core_type = #tpu.core_type<tc>, window_params = [{transform_indices = @transform_0, window_bounds = array<i64: 64, 16>}, {pipeline_mode = #tpu.pipeline_mode<synchronous>, transform_indices = @transform_1, window_bounds = array<i64: 256, 32>}, {pipeline_mode = #tpu.pipeline_mode<synchronous>, transform_indices = @transform_2, window_bounds = array<i64: 32, 128>}, {pipeline_mode = #tpu.pipeline_mode<synchronous>, transform_indices = @transform_3, window_bounds = array<i64: 1, 128>}, {transform_indices = @transform_4, window_bounds = array<i64: 64, 128>}]} {
    %c0 = arith.constant 0 : index
    %c0_0 = arith.constant 0 : index
    %0 = vector.load %arg1[%c0, %c0_0] : memref<64x16xi32, #tpu.memory_space<vmem>>, vector<64x16xi32>
    %1 = vector.shape_cast %0 : vector<64x16xi32> to vector<64x16x1xi32>
    %2 = tpu.iota {dimensions = array<i32: 2>} : vector<64x16x256xi32>
    %3 = vector.broadcast %1 : vector<64x16x1xi32> to vector<64x16x256xi32>
    %4 = arith.cmpi eq, %3, %2 : vector<64x16x256xi32>
    %5 = arith.extui %4 : vector<64x16x256xi1> to vector<64x16x256xi32>
    %6 = arith.sitofp %5 : vector<64x16x256xi32> to vector<64x16x256xf32>
    %7 = arith.truncf %6 : vector<64x16x256xf32> to vector<64x16x256xbf16>
    %8 = vector.shape_cast %7 : vector<64x16x256xbf16> to vector<1024x256xbf16>
    %c0_1 = arith.constant 0 : index
    %c0_2 = arith.constant 0 : index
    %9 = vector.load %arg2[%c0_1, %c0_2] : memref<256x32xbf16, #tpu.memory_space<vmem>>, vector<256x32xbf16>
    %cst = arith.constant dense<0.000000e+00> : vector<1024x32xf32>
    %10 = tpu.matmul %8, %9, %cst {dimension_numbers = #tpu.dot_dimension_numbers<[1], [0], [0], [1], [0, 0, 1, 1], [], []>} : vector<1024x256xbf16>, vector<256x32xbf16>, vector<1024x32xf32> -> vector<1024x32xf32>
    %11 = arith.truncf %10 : vector<1024x32xf32> to vector<1024x32xbf16>
    %c0_3 = arith.constant 0 : index
    %c0_4 = arith.constant 0 : index
    %12 = vector.load %arg3[%c0_3, %c0_4] : memref<32x128xbf16, #tpu.memory_space<vmem>>, vector<32x128xbf16>
    %cst_5 = arith.constant dense<0.000000e+00> : vector<1024x128xf32>
    %13 = tpu.matmul %11, %12, %cst_5 {dimension_numbers = #tpu.dot_dimension_numbers<[1], [0], [0], [1], [0, 0, 1, 1], [], []>} : vector<1024x32xbf16>, vector<32x128xbf16>, vector<1024x128xf32> -> vector<1024x128xf32>
    %c0_6 = arith.constant 0 : index
    %c0_7 = arith.constant 0 : index
    %14 = vector.load %arg4[%c0_6, %c0_7] : memref<1x128xf32, #tpu.memory_space<vmem>>, vector<1x128xf32>
    %15 = vector.broadcast %14 : vector<1x128xf32> to vector<1024x128xf32>
    %16 = arith.addf %13, %15 : vector<1024x128xf32>
    %cst_8 = arith.constant 0.000000e+00 : f32
    %17 = vector.broadcast %cst_8 : f32 to vector<1024x128xf32>
    %18 = arith.maximumf %16, %17 : vector<1024x128xf32>
    %19 = vector.shape_cast %18 : vector<1024x128xf32> to vector<64x16x128xf32>
    %cst_9 = arith.constant dense<0xFF800000> : vector<64x128xf32>
    %20 = vector.multi_reduction <maximumf>, %19, %cst_9 [1] : vector<64x16x128xf32> to vector<64x128xf32>
    %c0_10 = arith.constant 0 : index
    %c0_11 = arith.constant 0 : index
    %21 = vector.load %arg5[%c0_10, %c0_11] : memref<64x128xf32, #tpu.memory_space<vmem>>, vector<64x128xf32>
    tpu.vector_store %arg5[%c0_10, %c0_11], %20 {strides = array<i32>} : memref<64x128xf32, #tpu.memory_space<vmem>>, vector<64x128xf32>,
    return
  }
  func.func @transform_0(%arg0: i32) -> (i32, i32) {
    %c0_i32 = arith.constant 0 : i32
    %c0_i32_0 = arith.constant 0 : i32
    return %arg0, %c0_i32 : i32, i32
  }
  func.func @transform_1(%arg0: i32) -> (i32, i32) {
    %c0_i32 = arith.constant 0 : i32
    %c0_i32_0 = arith.constant 0 : i32
    %c0_i32_1 = arith.constant 0 : i32
    return %c0_i32, %c0_i32_0 : i32, i32
  }
  func.func @transform_2(%arg0: i32) -> (i32, i32) {
    %c0_i32 = arith.constant 0 : i32
    %c0_i32_0 = arith.constant 0 : i32
    %c0_i32_1 = arith.constant 0 : i32
    return %c0_i32, %c0_i32_0 : i32, i32
  }
  func.func @transform_3(%arg0: i32) -> (i32, i32) {
    %c0_i32 = arith.constant 0 : i32
    %c0_i32_0 = arith.constant 0 : i32
    %c0_i32_1 = arith.constant 0 : i32
    return %c0_i32, %c0_i32_0 : i32, i32
  }
  func.func @transform_4(%arg0: i32) -> (i32, i32) {
    %c0_i32 = arith.constant 0 : i32
    %c0_i32_0 = arith.constant 0 : i32
    return %arg0, %c0_i32 : i32, i32
  }
}

</mosaic_0001>

<bundles_post_ra>
// kernel: tpu_custom_call.1
= control target key start
LH: loop header
LB: loop body
LE: loop exit
PB: predicated region body
PF: predicated region fallthrough
CT: control target
= control target key end

     0   :  { %v28_v0 = vlaneseq  ;;  %s6736_s0 = inlined_call_operand.vmem [shape: s32[64,16], index: 0, kind: input, shape index: {}]   ;;  %s6737_s1 = inlined_call_operand.vmem [shape: bf16[256,32], index: 1, kind: input, shape index: {}]   ;;  %s6738_s2 = inlined_call_operand.vmem [shape: bf16[32,128], index: 2, kind: input, shape index: {}]   ;;  %s6739_s3 = inlined_call_operand.vmem [shape: f32[1,128], index: 3, kind: input, shape index: {}]   ;;  %s6740_s4 = inlined_call_operand.hbm [shape: f32[64,128], index: 4, kind: output, shape index: {}]  }
   0x1   :  { %9 = vsyncpa [#allocation3], 0  ;;  %v19_v2 = vld [vmem:[%s6736_s0] sm:$0xff]  ;;  %v5122_v11 = vld [vmem:[%s6736_s0 + $0x8] sm:$0xff]  ;;  %v6741_v41 = vmov 0.0   ;;  %s4515_s23 = sshll.u32 %s6740_s4, 4  ;;  %s4516_s23 = int_to_ptr.hbm [resolvable:$true] %s4515_s23 }
   0x2   :  { %v5098_v1 = vshrl.u32 %v28_v0, 7  ;;  %v40_v3 = vperm.slane %v19_v2, 1  ;;  %v27_v4 = vperm.slane %v19_v2, 0  ;;  %v53_v5 = vperm.slane %v19_v2, 2  ;;  %v4926_v14 = vld [vmem:[%s6737_s1 + $0x38] sm:$0xff]  ;;  %v4925_v17 = vld [vmem:[%s6737_s1 + $0x30] sm:$0xff] }
   0x3   :  { %v66_v7 = vperm.slane %v19_v2, 3  ;;  %v79_v8 = vperm.slane %v19_v2, 4  ;;  %v92_v9 = vperm.slane %v19_v2, 5  ;;  %v105_v10 = vperm.slane %v19_v2, 6  ;;  %v4934_v15 = vld [vmem:[%s6737_s1 + $0x78] sm:$0xff]  ;;  %2526 = vmatpush.bf16.msra.mxu0 %v4926_v14  ;;  %v4933_v18 = vld [vmem:[%s6737_s1 + $0x70] sm:$0xff]  ;;  %4937 = vmatpush.bf16.msra.mxu3 %v4926_v14 }
   0x4   :  { %4961 = vset.pattern.permute.xlu1 %v5098_v1  ;;  %4959 = vset.pattern.permute.xlu0 %v5098_v1  ;;  %v5107_v6 = vadd.s32 8, %v5098_v1  ;;  %v118_v12 = vperm.slane %v19_v2, 7  ;;  %v144_v13 = vperm.slane %v5122_v11, 1  ;;  %v131_v16 = vperm.slane %v5122_v11, 0  ;;  %v4924_v19 = vld [vmem:[%s6737_s1 + $0x28] sm:$0xff]  ;;  %v4923_v21 = vld [vmem:[%s6737_s1 + $0x20] sm:$0xff] }
   0x5   :  { %4963 = vset.pattern.permute.xlu2 %v5098_v1  ;;  %2855 = vmatpush.bf16.msra.mxu1 %v4934_v15  ;;  %v4932_v20 = vld [vmem:[%s6737_s1 + $0x68] sm:$0xff]  ;;  %v4931_v22 = vld [vmem:[%s6737_s1 + $0x60] sm:$0xff]  ;;  %v4922_v23 = vld [vmem:[%s6737_s1 + $0x18] sm:$0xff]  ;;  %v157_v24 = vperm.slane %v5122_v11, 2  ;;  %v170_v32 = vperm.slane %v5122_v11, 3  ;;  %v183_v34 = vperm.slane %v5122_v11, 4 }
   0x6   :  { %v4930_v25 = vld [vmem:[%s6737_s1 + $0x58] sm:$0xff]  ;;  %v4921_v26 = vld [vmem:[%s6737_s1 + $0x10] sm:$0xff]  ;;  %v4920_v28 = vld [vmem:[%s6737_s1 + $0x8] sm:$0xff]  ;;  %v5190_v35 = vand.u32 127, %v28_v0  ;;  %v196_v39 = vperm.slane %v5122_v11, 5  ;;  %v209_v57 = vperm.slane %v5122_v11, 6 }
   0x7   :  { %2527 = vmatpush.bf16.msra.mxu0 %v4925_v17  ;;  %4938 = vmatpush.bf16.msra.mxu3 %v4925_v17  ;;  %v4929_v27 = vld [vmem:[%s6737_s1 + $0x50] sm:$0xff]  ;;  %v4928_v29 = vld [vmem:[%s6737_s1 + $0x48] sm:$0xff]  ;;  %v4919_v30 = vld [vmem:[%s6737_s1] sm:$0xff]  ;;  %s5070_s24 = smov 128   ;;  %s5071_s25 = smov 8  }
   0x8   :  { %v4927_v31 = vld [vmem:[%s6737_s1 + $0x40] sm:$0xff]  ;;  %v5186_v33 = vld [vmem:[%s6736_s0 + $0x30] sm:$0xff]  ;;  %v5194_v37 = vadd.s32 128, %v5190_v35 }
   0x9   :  { %2856 = vmatpush.bf16.msra.mxu1 %v4933_v18  ;;  %v651_v36 = vperm.slane %v5186_v33, 0  ;;  %v664_v62 = vperm.slane %v5186_v33, 1 }
   0xb   :  { %2528 = vmatpush.bf16.msra.mxu0 %v4924_v19  ;;  %4939 = vmatpush.bf16.msra.mxu3 %v4924_v19 }
   0xc   :  { %45 = vperm.xlu1 %4961, %v40_v3   ;;  %32 = vperm.xlu0 %4959, %v27_v4  }
   0xd   :  { %58 = vperm.xlu2 %4963, %v53_v5   ;;  %2857 = vmatpush.bf16.msra.mxu1 %v4932_v20 }
   0xf   :  { %2529 = vmatpush.bf16.msra.mxu0 %v4923_v21  ;;  %4940 = vmatpush.bf16.msra.mxu3 %v4923_v21 }
  0x11   :  { %2858 = vmatpush.bf16.msra.mxu1 %v4931_v22 }
  0x13   :  { %2530 = vmatpush.bf16.msra.mxu0 %v4922_v23  ;;  %4941 = vmatpush.bf16.msra.mxu3 %v4922_v23 }
  0x14   :  { %4962 = vset.pattern.permute.xlu1 %v5107_v6  ;;  %4960 = vset.pattern.permute.xlu0 %v5107_v6 }
  0x15   :  { %4964 = vset.pattern.permute.xlu2 %v5107_v6  ;;  %2859 = vmatpush.bf16.msra.mxu1 %v4930_v25 }
  0x17   :  { %2531 = vmatpush.bf16.msra.mxu0 %v4921_v26  ;;  %4942 = vmatpush.bf16.msra.mxu3 %v4921_v26 }
  0x19   :  { %2860 = vmatpush.bf16.msra.mxu1 %v4929_v27 }
  0x1b   :  { %2532 = vmatpush.bf16.msra.mxu0 %v4920_v28  ;;  %4943 = vmatpush.bf16.msra.mxu3 %v4920_v28  ;;  %v677_v28 = vperm.slane %v5186_v33, 2 }
  0x1c   :  { %51 = vperm.xlu1 %4962, %v40_v3   ;;  %38 = vperm.xlu0 %4960, %v27_v4  }
  0x1d   :  { %64 = vperm.xlu2 %4964, %v53_v5   ;;  %2861 = vmatpush.bf16.msra.mxu1 %v4928_v29 }
  0x1f   :  { %2533 = vmatpush.bf16.msra.mxu0 %v4919_v30  ;;  %4944 = vmatpush.bf16.msra.mxu3 %v4919_v30 }
  0x21   :  { %2862 = vmatpush.bf16.msra.mxu1 %v4927_v31 }
  0x23   :  { %4945 = vmatpush.bf16.msrb.mxu3 %v4934_v15 }
  0x24   :  { %4965 = vset.pattern.permute.xlu1 %v5098_v1  ;;  %4966 = vset.pattern.permute.xlu0 %v5098_v1 }
  0x25   :  { %77 = vperm.xlu2 %4964, %v66_v7  }
  0x27   :  { %4946 = vmatpush.bf16.msrb.mxu3 %v4933_v18 }
  0x2b   :  { %4947 = vmatpush.bf16.msrb.mxu3 %v4932_v20  ;;  %v222_v20 = vperm.slane %v5122_v11, 7 }
  0x2c   :  { %71 = vperm.xlu1 %4965, %v66_v7   ;;  %84 = vperm.xlu0 %4966, %v79_v8  }
  0x2d   :  { %4968 = vset.pattern.permute.xlu2 %v5098_v1 }
  0x2f   :  { %4948 = vmatpush.bf16.msrb.mxu3 %v4931_v22 }
  0x33   :  { %4949 = vmatpush.bf16.msrb.mxu3 %v4930_v25 }
  0x34   :  { %4967 = vset.pattern.permute.xlu1 %v5107_v6  ;;  %4969 = vset.pattern.permute.xlu0 %v5107_v6 }
  0x35   :  { %97 = vperm.xlu2 %4968, %v92_v9  }
  0x37   :  { %4950 = vmatpush.bf16.msrb.mxu3 %v4929_v27 }
  0x3b   :  { %4951 = vmatpush.bf16.msrb.mxu3 %v4928_v29 }
  0x3c   :  { %90 = vperm.xlu1 %4967, %v79_v8   ;;  %116 = vperm.xlu0 %4969, %v105_v10  }
  0x3d   :  { %110 = vperm.xlu2 %4968, %v105_v10   ;;  %v5226_v10 = vld [vmem:[%s6736_s0 + $0x10] sm:$0xff] }
  0x3f   :  { %4952 = vmatpush.bf16.msrb.mxu3 %v4927_v31 }
  0x44   :  { %103 = vperm.xlu1 %4967, %v92_v9   ;;  %4972 = vset.pattern.permute.xlu0 %v5098_v1 }
  0x45   :  { %4971 = vset.pattern.permute.xlu2 %v5107_v6 }
  0x4c   :  { %4970 = vset.pattern.permute.xlu1 %v5098_v1  ;;  %149 = vperm.xlu0 %4972, %v144_v13  }
  0x4d   :  { %129 = vperm.xlu2 %4971, %v118_v12  }
  0x54   :  { %123 = vperm.xlu1 %4970, %v118_v12   ;;  %4975 = vset.pattern.permute.xlu0 %v5107_v6 }
  0x55   :  { %142 = vperm.xlu2 %4971, %v131_v16  }
  0x5c   :  { %136 = vperm.xlu1 %4970, %v131_v16   ;;  %181 = vperm.xlu0 %4975, %v170_v32   ;;  %v235_v16 = vperm.slane %v5226_v10, 0 }
  0x5d   :  { %4974 = vset.pattern.permute.xlu2 %v5098_v1 }
  0x64   :  { %4973 = vset.pattern.permute.xlu1 %v5107_v6  ;;  %4978 = vset.pattern.permute.xlu0 %v5098_v1 }
  0x65   :  { %162 = vperm.xlu2 %4974, %v157_v24  }
  0x67   :  { %v59_v61 = vpop.permute.xlu2 %58 }
  0x68   :  { %vm870_vm8 = vcmp.eq.s32.totalorder %v59_v61, %v5190_v35  ;;  %vm871_vm9 = vcmp.eq.s32.totalorder %v59_v61, %v5194_v37 }
  0x69   :  { %v4535_v12 = vsel %vm870_vm8, 1.0, %v6741_v41 }
  0x6c   :  { %155 = vperm.xlu1 %4973, %v144_v13   ;;  %656 = vperm.xlu0 %4978, %v651_v36   ;;  %v4536_v13 = vsel %vm871_vm9, 1.0, %v6741_v41 }
  0x6d   :  { %175 = vperm.xlu2 %4974, %v170_v32   ;;  %v1634_v17 = vpack.c.bf16 %v4536_v13, %v4535_v12 }
  0x6f   :  { %v1926_v21 = vunpack.c.l.b16 %v1634_v17  ;;  %v1927_v23 = vunpack.c.h.b16 %v1634_v17 }
  0x74   :  { %168 = vperm.xlu1 %4973, %v157_v24   ;;  %4981 = vset.pattern.permute.xlu0 %v5107_v6 }
  0x75   :  { %4977 = vset.pattern.permute.xlu2 %v5107_v6 }
  0x77   :  { %v65_v7 = vpop.permute.xlu2 %64 }
  0x78   :  { %vm872_vm10 = vcmp.eq.s32.totalorder %v65_v7, %v5190_v35  ;;  %vm873_vm11 = vcmp.eq.s32.totalorder %v65_v7, %v5194_v37 }
  0x79   :  { %v4537_v14 = vsel %vm872_vm10, 1.0, %v6741_v41  ;;  %v4538_v15 = vsel %vm873_vm11, 1.0, %v6741_v41 }
  0x7a   :  { %v1635_v18 = vpack.c.bf16 %v4538_v15, %v4537_v14  ;;  %v703_v15 = vperm.slane %v5186_v33, 4 }
  0x7c   :  { %4976 = vset.pattern.permute.xlu1 %v5098_v1  ;;  %675 = vperm.xlu0 %4981, %v664_v62   ;;  %v1928_v22 = vunpack.c.l.b16 %v1635_v18  ;;  %v1929_v24 = vunpack.c.h.b16 %v1635_v18 }
  0x7d   :  { %194 = vperm.xlu2 %4977, %v183_v34  }
  0x7e   :  { %v33_v38 = vpop.permute.xlu0 %32  ;;  %v46_v40 = vpop.permute.xlu1 %45  ;;  %v2178_v26 = vpack.c.b16 %v1928_v22, %v1926_v21  ;;  %v2179_v27 = vpack.c.b16 %v1929_v24, %v1927_v23 }
  0x7f   :  { %vm862_vm0 = vcmp.eq.s32.totalorder %v33_v38, %v5190_v35  ;;  %vm863_vm1 = vcmp.eq.s32.totalorder %v33_v38, %v5194_v37  ;;  %vm866_vm4 = vcmp.eq.s32.totalorder %v46_v40, %v5190_v35  ;;  %vm867_vm5 = vcmp.eq.s32.totalorder %v46_v40, %v5194_v37  ;;  %v78_v19 = vpop.permute.xlu2 %77 }
  0x80   :  { %v4527_v42 = vsel %vm862_vm0, 1.0, %v6741_v41  ;;  %v4528_v43 = vsel %vm863_vm1, 1.0, %v6741_v41  ;;  %v4531_v56 = vsel %vm866_vm4, 1.0, %v6741_v41  ;;  %v4532_v58 = vsel %vm867_vm5, 1.0, %v6741_v41 }
  0x81   :  { %v1630_v45 = vpack.c.bf16 %v4528_v43, %v4527_v42  ;;  %v1632_v63 = vpack.c.bf16 %v4532_v58, %v4531_v56  ;;  %vm876_vm12 = vcmp.eq.s32.totalorder %v78_v19, %v5190_v35  ;;  %vm877_vm13 = vcmp.eq.s32.totalorder %v78_v19, %v5194_v37 }
  0x82   :  { %v4541_v29 = vsel %vm876_vm12, 1.0, %v6741_v41  ;;  %v4542_v30 = vsel %vm877_vm13, 1.0, %v6741_v41 }
  0x83   :  { %v1918_v49 = vunpack.c.l.b16 %v1630_v45  ;;  %v1919_v51 = vunpack.c.h.b16 %v1630_v45  ;;  %v1922_v2 = vunpack.c.l.b16 %v1632_v63  ;;  %v1923_v4 = vunpack.c.h.b16 %v1632_v63 }
  0x84   :  { %188 = vperm.xlu1 %4976, %v183_v34   ;;  %4984 = vset.pattern.permute.xlu0 %v5098_v1  ;;  %v1637_v34 = vpack.c.bf16 %v4542_v30, %v4541_v29 }
  0x85   :  { %207 = vperm.xlu2 %4977, %v196_v39  }
  0x86   :  { %v1932_v40 = vunpack.c.l.b16 %v1637_v34  ;;  %v1933_v43 = vunpack.c.h.b16 %v1637_v34 }
  0x8c   :  { %201 = vperm.xlu1 %4976, %v196_v39   ;;  %240 = vperm.xlu0 %4984, %v235_v16  }
  0x8d   :  { %4980 = vset.pattern.permute.xlu2 %v5098_v1 }
  0x8e   :  { %v39_v44 = vpop.permute.xlu0 %38  ;;  %v52_v53 = vpop.permute.xlu1 %51 }
  0x8f   :  { %vm864_vm2 = vcmp.eq.s32.totalorder %v39_v44, %v5190_v35  ;;  %vm865_vm3 = vcmp.eq.s32.totalorder %v39_v44, %v5194_v37  ;;  %vm868_vm6 = vcmp.eq.s32.totalorder %v52_v53, %v5190_v35  ;;  %vm869_vm7 = vcmp.eq.s32.totalorder %v52_v53, %v5194_v37  ;;  %v98_v11 = vpop.permute.xlu2 %97 }
  0x90   :  { %v4529_v46 = vsel %vm864_vm2, 1.0, %v6741_v41  ;;  %v4530_v47 = vsel %vm865_vm3, 1.0, %v6741_v41  ;;  %v4533_v59 = vsel %vm868_vm6, 1.0, %v6741_v41  ;;  %v4534_v60 = vsel %vm869_vm7, 1.0, %v6741_v41 }
  0x91   :  { %v1631_v48 = vpack.c.bf16 %v4530_v47, %v4529_v46  ;;  %v1633_v0 = vpack.c.bf16 %v4534_v60, %v4533_v59  ;;  %vm882_vm4 = vcmp.eq.s32.totalorder %v98_v11, %v5190_v35  ;;  %vm883_vm5 = vcmp.eq.s32.totalorder %v98_v11, %v5194_v37 }
  0x93   :  { %v1920_v50 = vunpack.c.l.b16 %v1631_v48  ;;  %v1921_v52 = vunpack.c.h.b16 %v1631_v48  ;;  %v1924_v3 = vunpack.c.l.b16 %v1633_v0  ;;  %v1925_v5 = vunpack.c.h.b16 %v1633_v0 }
  0x94   :  { %4979 = vset.pattern.permute.xlu1 %v5107_v6  ;;  %4987 = vset.pattern.permute.xlu0 %v5107_v6 }
  0x95   :  { %v2174_v54 = vpack.c.b16 %v1920_v50, %v1918_v49  ;;  %v2175_v55 = vpack.c.b16 %v1921_v52, %v1919_v51  ;;  %214 = vperm.xlu2 %4980, %v209_v57   ;;  %v2176_v8 = vpack.c.b16 %v1924_v3, %v1922_v2  ;;  %v2177_v9 = vpack.c.b16 %v1925_v5, %v1923_v4 }
  0x96   :  { %v690_v52 = vperm.slane %v5186_v33, 3  ;;  %v4547_v3 = vsel %vm882_vm4, 1.0, %v6741_v41  ;;  %v4548_v4 = vsel %vm883_vm5, 1.0, %v6741_v41 }
  0x97   :  { %2534 = vmatmul.bf16.vlgmr.msra.gmra.mxu0 %v2174_v54  ;;  %2863 = vmatmul.bf16.vlgmr.msra.gmra.mxu1 %v2175_v55  ;;  %v5246_v44 = vpop.permute.xlu2 %110  ;;  %v1640_v13 = vpack.c.bf16 %v4548_v4, %v4547_v3 }
  0x98   :  { %vm886_vm8 = vcmp.eq.s32.totalorder %v5246_v44, %v5190_v35  ;;  %vm887_vm9 = vcmp.eq.s32.totalorder %v5246_v44, %v5194_v37 }
  0x99   :  { %v1939_v18 = vunpack.c.h.b16 %v1640_v13 }
  0x9c   :  { %662 = vperm.xlu1 %4979, %v651_v36  }
  0x9d   :  { %669 = vperm.xlu2 %4980, %v664_v62  }
  0x9e   :  { %v72_v25 = vpop.permute.xlu1 %71  ;;  %v85_v45 = vpop.permute.xlu0 %84 }
  0x9f   :  { %vm874_vm14 = vcmp.eq.s32.totalorder %v72_v25, %v5190_v35  ;;  %vm875_vm15 = vcmp.eq.s32.totalorder %v72_v25, %v5194_v37  ;;  %vm878_vm2 = vcmp.eq.s32.totalorder %v85_v45, %v5190_v35  ;;  %vm879_vm3 = vcmp.eq.s32.totalorder %v85_v45, %v5194_v37 }
  0xa0   :  { %v4539_v31 = vsel %vm874_vm14, 1.0, %v6741_v41  ;;  %v4540_v32 = vsel %vm875_vm15, 1.0, %v6741_v41  ;;  %v4543_v50 = vsel %vm878_vm2, 1.0, %v6741_v41  ;;  %v4544_v51 = vsel %vm879_vm3, 1.0, %v6741_v41 }
  0xa1   :  { %v1636_v36 = vpack.c.bf16 %v4540_v32, %v4539_v31  ;;  %v1638_v56 = vpack.c.bf16 %v4544_v51, %v4543_v50  ;;  %v261_v25 = vperm.slane %v5226_v10, 2  ;;  %v5328_v51 = vld [vmem:[%s6738_s2 + $0x8] sm:$0xff] }
  0xa2   :  { %3467 = vmatpush.bf16.msra.mxu2 %v5328_v51 }
  0xa3   :  { %v1930_v39 = vunpack.c.l.b16 %v1636_v36  ;;  %v1931_v42 = vunpack.c.h.b16 %v1636_v36  ;;  %v1934_v58 = vunpack.c.l.b16 %v1638_v56  ;;  %v1935_v60 = vunpack.c.h.b16 %v1638_v56 }
  0xa4   :  { %220 = vperm.xlu1 %4979, %v209_v57   ;;  %v248_v57 = vperm.slane %v5226_v10, 1 }
  0xa5   :  { %4983 = vset.pattern.permute.xlu2 %v5107_v6  ;;  %v2180_v46 = vpack.c.b16 %v1932_v40, %v1930_v39  ;;  %v2181_v47 = vpack.c.b16 %v1933_v43, %v1931_v42 }
  0xa6   :  { %259 = vperm.xlu0 %4987, %v248_v57  }
  0xa7   :  { %2539 = vmatmul.bf16.gmra.mxu0 %v2176_v8  ;;  %2868 = vmatmul.bf16.gmra.mxu1 %v2177_v9  ;;  %v5259_v54 = vpop.permute.xlu2 %129  ;;  %v716_v9 = vperm.slane %v5186_v33, 5 }
  0xa8   :  { %vm892_vm15 = vcmp.eq.s32.totalorder %v5259_v54, %v5190_v35 }
  0xac   :  { %4982 = vset.pattern.permute.xlu1 %v5098_v1 }
  0xad   :  { %233 = vperm.xlu2 %4983, %v222_v20  }
  0xae   :  { %v91_v38 = vpop.permute.xlu1 %90  ;;  %4990 = vset.pattern.permute.xlu0 %v5098_v1 }
  0xaf   :  { %vm880_vm0 = vcmp.eq.s32.totalorder %v91_v38, %v5190_v35  ;;  %vm881_vm1 = vcmp.eq.s32.totalorder %v91_v38, %v5194_v37  ;;  %v5264_v2 = vpop.permute.xlu2 %142 }
  0xb0   :  { %v4545_v48 = vsel %vm880_vm0, 1.0, %v6741_v41  ;;  %v4546_v49 = vsel %vm881_vm1, 1.0, %v6741_v41  ;;  %vm893_vm1 = vcmp.eq.s32.totalorder %v5259_v54, %v5194_v37  ;;  %v729_v54 = vperm.slane %v5186_v33, 6 }
  0xb1   :  { %v1639_v55 = vpack.c.bf16 %v4546_v49, %v4545_v48 }
  0xb3   :  { %v1936_v59 = vunpack.c.l.b16 %v1639_v55  ;;  %v1937_v61 = vunpack.c.h.b16 %v1639_v55 }
  0xb4   :  { %227 = vperm.xlu1 %4982, %v222_v20   ;;  %v117_v20 = vpop.permute.xlu0 %116 }
  0xb5   :  { %688 = vperm.xlu2 %4983, %v677_v28   ;;  %v2182_v63 = vpack.c.b16 %v1936_v59, %v1934_v58  ;;  %v2183_v0 = vpack.c.b16 %v1937_v61, %v1935_v60  ;;  %vm888_vm10 = vcmp.eq.s32.totalorder %v117_v20, %v5190_v35  ;;  %vm889_vm11 = vcmp.eq.s32.totalorder %v117_v20, %v5194_v37 }
  0xb6   :  { %v104_v53 = vpop.permute.xlu1 %103  ;;  %721 = vperm.xlu0 %4990, %v716_v9   ;;  %v4553_v11 = vsel %vm888_vm10, 1.0, %v6741_v41 }
  0xb7   :  { %2544 = vmatmul.bf16.gmra.mxu0 %v2178_v26  ;;  %2873 = vmatmul.bf16.gmra.mxu1 %v2179_v27  ;;  %vm884_vm6 = vcmp.eq.s32.totalorder %v104_v53, %v5190_v35  ;;  %vm885_vm7 = vcmp.eq.s32.totalorder %v104_v53, %v5194_v37  ;;  %v4551_v26 = vsel %vm886_vm8, 1.0, %v6741_v41  ;;  %v4552_v27 = vsel %vm887_vm9, 1.0, %v6741_v41 }
  0xb8   :  { %v4549_v5 = vsel %vm884_vm6, 1.0, %v6741_v41  ;;  %v4550_v7 = vsel %vm885_vm7, 1.0, %v6741_v41  ;;  %v1642_v30 = vpack.c.bf16 %v4552_v27, %v4551_v26  ;;  %v4558_v53 = vsel %vm893_vm1, 1.0, %v6741_v41 }
  0xb9   :  { %v1641_v14 = vpack.c.bf16 %v4550_v7, %v4549_v5  ;;  %v5354_v7 = vld [vmem:[%s6738_s2] sm:$0xff]  ;;  %vm896_vm6 = vcmp.eq.s32.totalorder %v5264_v2, %v5190_v35  ;;  %vm897_vm7 = vcmp.eq.s32.totalorder %v5264_v2, %v5194_v37 }
  0xba   :  { %v1942_v34 = vunpack.c.l.b16 %v1642_v30  ;;  %v1943_v38 = vunpack.c.h.b16 %v1642_v30  ;;  %3468 = vmatpush.bf16.msra.mxu2 %v5354_v7  ;;  %v4562_v30 = vsel %vm897_vm7, 1.0, %v6741_v41 }
  0xbb   :  { %v1940_v17 = vunpack.c.l.b16 %v1641_v14  ;;  %v1941_v19 = vunpack.c.h.b16 %v1641_v14 }
  0xbc   :  { %682 = vperm.xlu1 %4982, %v677_v28   ;;  %v4554_v28 = vsel %vm889_vm11, 1.0, %v6741_v41 }
  0xbd   :  { %4986 = vset.pattern.permute.xlu2 %v5098_v1  ;;  %v2185_v24 = vpack.c.b16 %v1941_v19, %v1939_v18  ;;  %v1643_v31 = vpack.c.bf16 %v4554_v28, %v4553_v11 }
  0xbe   :  { %4993 = vset.pattern.permute.xlu0 %v5107_v6  ;;  %v5305_v40 = vpop.permute.xlu0 %149 }
  0xbf   :  { %v5280_v12 = vpop.permute.xlu2 %162  ;;  %v1944_v36 = vunpack.c.l.b16 %v1643_v31  ;;  %v1945_v39 = vunpack.c.h.b16 %v1643_v31  ;;  %vm899_vm7 = vcmp.eq.s32.totalorder %v5305_v40, %v5194_v37 }
  0xc1   :  { %v2186_v44 = vpack.c.b16 %v1944_v36, %v1942_v34  ;;  %v2187_v45 = vpack.c.b16 %v1945_v39, %v1943_v38 }
  0xc4   :  { %4985 = vset.pattern.permute.xlu1 %v5107_v6 }
  0xc5   :  { %695 = vperm.xlu2 %4986, %v690_v52  }
  0xc6   :  { %v5262_v62 = vpop.permute.xlu1 %123  ;;  %740 = vperm.xlu0 %4993, %v729_v54  }
  0xc7   :  { %2549 = vmatmul.bf16.gmra.mxu0 %v2180_v46  ;;  %2878 = vmatmul.bf16.gmra.mxu1 %v2181_v47  ;;  %v5287_v22 = vpop.permute.xlu2 %175  ;;  %vm890_vm14 = vcmp.eq.s32.totalorder %v5262_v62, %v5190_v35  ;;  %vm891_vm0 = vcmp.eq.s32.totalorder %v5262_v62, %v5194_v37 }
  0xc8   :  { %v4555_v48 = vsel %vm890_vm14, 1.0, %v6741_v41  ;;  %v4556_v50 = vsel %vm891_vm0, 1.0, %v6741_v41 }
  0xc9   :  { %v1644_v61 = vpack.c.bf16 %v4556_v50, %v4555_v48 }
  0xcb   :  { %v1947_v18 = vunpack.c.h.b16 %v1644_v61 }
  0xcc   :  { %246 = vperm.xlu1 %4985, %v235_v16   ;;  %v1938_v16 = vunpack.c.l.b16 %v1640_v13 }
  0xcd   :  { %253 = vperm.xlu2 %4986, %v248_v57   ;;  %v274_v57 = vperm.slane %v5226_v10, 3 }
  0xce   :  { %v5277_v8 = vpop.permute.xlu1 %136  ;;  %v2184_v23 = vpack.c.b16 %v1940_v17, %v1938_v16  ;;  %v5347_v3 = vpop.permute.xlu0 %181  ;;  %v1946_v16 = vunpack.c.l.b16 %v1644_v61  ;;  %4996 = vset.pattern.permute.xlu0 %v5098_v1 }
  0xcf   :  { %vm894_vm10 = vcmp.eq.s32.totalorder %v5277_v8, %v5190_v35  ;;  %vm895_vm11 = vcmp.eq.s32.totalorder %v5277_v8, %v5194_v37 }
  0xd0   :  { %v4559_v31 = vsel %vm894_vm10, 1.0, %v6741_v41  ;;  %v4560_v8 = vsel %vm895_vm11, 1.0, %v6741_v41 }
  0xd4   :  { %701 = vperm.xlu1 %4985, %v690_v52   ;;  %v4557_v52 = vsel %vm892_vm15, 1.0, %v6741_v41 }
  0xd5   :  { %4989 = vset.pattern.permute.xlu2 %v5107_v6 }
  0xd7   :  { %2554 = vmatmul.bf16.gmra.mxu0 %v2182_v63  ;;  %2883 = vmatmul.bf16.gmra.mxu1 %v2183_v0  ;;  %v195_v29 = vpop.permute.xlu2 %194  ;;  %v1645_v0 = vpack.c.bf16 %v4558_v53, %v4557_v52 }
  0xd8   :  { %vm912_vm12 = vcmp.eq.s32.totalorder %v195_v29, %v5190_v35  ;;  %vm913_vm13 = vcmp.eq.s32.totalorder %v195_v29, %v5194_v37  ;;  %v4561_v29 = vsel %vm896_vm6, 1.0, %v6741_v41  ;;  %vm898_vm6 = vcmp.eq.s32.totalorder %v5305_v40, %v5190_v35 }
  0xd9   :  { %v4577_v42 = vsel %vm912_vm12, 1.0, %v6741_v41  ;;  %v4578_v43 = vsel %vm913_vm13, 1.0, %v6741_v41  ;;  %v1949_v19 = vunpack.c.h.b16 %v1645_v0  ;;  %v1647_v2 = vpack.c.bf16 %v4562_v30, %v4561_v29 }
  0xda   :  { %v1655_v46 = vpack.c.bf16 %v4578_v43, %v4577_v42  ;;  %v1646_v43 = vpack.c.bf16 %v4560_v8, %v4559_v31  ;;  %v742_v29 = vperm.slane %v5186_v33, 7 }
  0xdb   :  { %v2189_v36 = vpack.c.b16 %v1949_v19, %v1947_v18  ;;  %v1952_v48 = vunpack.c.l.b16 %v1647_v2  ;;  %v1953_v50 = vunpack.c.h.b16 %v1647_v2 }
  0xdc   :  { %4988 = vset.pattern.permute.xlu1 %v5098_v1  ;;  %v1968_v58 = vunpack.c.l.b16 %v1655_v46  ;;  %v1969_v59 = vunpack.c.h.b16 %v1655_v46  ;;  %v300_v46 = vperm.slane %v5226_v10, 5 }
  0xdd   :  { %714 = vperm.xlu2 %4989, %v703_v15  }
  0xde   :  { %v5285_v21 = vpop.permute.xlu1 %155  ;;  %v657_v28 = vpop.permute.xlu0 %656  ;;  %305 = vperm.xlu0 %4996, %v300_v46  }
  0xdf   :  { %v208_v47 = vpop.permute.xlu2 %207  ;;  %vm1054_vm12 = vcmp.eq.s32.totalorder %v657_v28, %v5190_v35  ;;  %vm1055_vm13 = vcmp.eq.s32.totalorder %v657_v28, %v5194_v37 }
  0xe0   :  { %vm916_vm2 = vcmp.eq.s32.totalorder %v208_v47, %v5190_v35  ;;  %vm917_vm5 = vcmp.eq.s32.totalorder %v208_v47, %v5194_v37  ;;  %v1950_v47 = vunpack.c.l.b16 %v1646_v43 }
  0xe1   :  { %v4581_v62 = vsel %vm916_vm2, 1.0, %v6741_v41  ;;  %v4582_v63 = vsel %vm917_vm5, 1.0, %v6741_v41 }
  0xe2   :  { %v1657_v13 = vpack.c.bf16 %v4582_v63, %v4581_v62 }
  0xe4   :  { %708 = vperm.xlu1 %4988, %v703_v15  }
  0xe5   :  { %272 = vperm.xlu2 %4989, %v261_v25  }
  0xe6   :  { %v5301_v32 = vpop.permute.xlu1 %168  ;;  %4999 = vset.pattern.permute.xlu0 %v5107_v6 }
  0xe7   :  { %2559 = vmatmul.bf16.gmra.mxu0 %v2184_v23  ;;  %2888 = vmatmul.bf16.gmra.mxu1 %v2185_v24  ;;  %v1972_v24 = vunpack.c.l.b16 %v1657_v13 }
  0xec   :  { %266 = vperm.xlu1 %4988, %v261_v25   ;;  %v1973_v25 = vunpack.c.h.b16 %v1657_v13 }
  0xed   :  { %4992 = vset.pattern.permute.xlu2 %v5098_v1 }
  0xef   :  { %v215_v38 = vpop.permute.xlu2 %214 }
  0xf0   :  { %vm918_vm14 = vcmp.eq.s32.totalorder %v215_v38, %v5190_v35  ;;  %vm919_vm15 = vcmp.eq.s32.totalorder %v215_v38, %v5194_v37 }
  0xf1   :  { %v4583_v63 = vsel %vm918_vm14, 1.0, %v6741_v41 }
  0xf4   :  { %4991 = vset.pattern.permute.xlu1 %v5107_v6 }
  0xf5   :  { %279 = vperm.xlu2 %4992, %v274_v57  }
  0xf6   :  { %v189_v49 = vpop.permute.xlu1 %188 }
  0xf7   :  { %2564 = vmatmul.bf16.gmra.mxu0 %v2186_v44  ;;  %2893 = vmatmul.bf16.gmra.mxu1 %v2187_v45  ;;  %vm910_vm3 = vcmp.eq.s32.totalorder %v189_v49, %v5190_v35  ;;  %vm911_vm4 = vcmp.eq.s32.totalorder %v189_v49, %v5194_v37  ;;  %v4719_v44 = vsel %vm1054_vm12, 1.0, %v6741_v41  ;;  %v4720_v45 = vsel %vm1055_vm13, 1.0, %v6741_v41  ;;  %v670_v53 = vpop.permute.xlu2 %669 }
  0xf8   :  { %v4575_v55 = vsel %vm910_vm3, 1.0, %v6741_v41  ;;  %v4576_v56 = vsel %vm911_vm4, 1.0, %v6741_v41  ;;  %v1726_v49 = vpack.c.bf16 %v4720_v45, %v4719_v44  ;;  %vm1058_vm2 = vcmp.eq.s32.totalorder %v670_v53, %v5190_v35 }
  0xf9   :  { %v1654_v60 = vpack.c.bf16 %v4576_v56, %v4575_v55  ;;  %v2190_v55 = vpack.c.b16 %v1952_v48, %v1950_v47  ;;  %v1951_v56 = vunpack.c.h.b16 %v1646_v43  ;;  %vm1059_vm3 = vcmp.eq.s32.totalorder %v670_v53, %v5194_v37 }
  0xfa   :  { %v2110_v61 = vunpack.c.l.b16 %v1726_v49  ;;  %v4723_v18 = vsel %vm1058_vm2, 1.0, %v6741_v41  ;;  %vm3268_vm12 = vcmask 261120   ;;  %vm905_vm2 = vcmp.eq.s32.totalorder %v5301_v32, %v5194_v37 }
  0xfb   :  { %v1966_v4 = vunpack.c.l.b16 %v1654_v60  ;;  %v1967_v5 = vunpack.c.h.b16 %v1654_v60 }
  0xfc   :  { %727 = vperm.xlu1 %4991, %v716_v9   ;;  %v1948_v9 = vunpack.c.l.b16 %v1645_v0  ;;  %v2111_v0 = vunpack.c.h.b16 %v1726_v49 }
  0xfd   :  { %v5356_v14 = vpack.c.b16 %v1968_v58, %v1966_v4  ;;  %v5358_v15 = vpack.c.b16 %v1969_v59, %v1967_v5  ;;  %734 = vperm.xlu2 %4992, %v729_v54   ;;  %v287_v58 = vperm.slane %v5226_v10, 4  ;;  %v4584_v54 = vsel %vm919_vm15, 1.0, %v6741_v41 }
  0xfe   :  { %v202_v17 = vpop.permute.xlu1 %201  ;;  %v2188_v34 = vpack.c.b16 %v1948_v9, %v1946_v16  ;;  %v1658_v9 = vpack.c.bf16 %v4584_v54, %v4583_v63  ;;  %vm902_vm15 = vcmp.eq.s32.totalorder %v5280_v12, %v5190_v35 }
  0xff   :  { %vm914_vm8 = vcmp.eq.s32.totalorder %v202_v17, %v5190_v35  ;;  %vm915_vm9 = vcmp.eq.s32.totalorder %v202_v17, %v5194_v37  ;;  %v2191_v17 = vpack.c.b16 %v1953_v50, %v1951_v56 }
 0x100   :  { %v4579_v20 = vsel %vm914_vm8, 1.0, %v6741_v41  ;;  %v4580_v23 = vsel %vm915_vm9, 1.0, %v6741_v41  ;;  %vm900_vm8 = vcmp.eq.s32.totalorder %v5285_v21, %v5190_v35  ;;  %vm901_vm9 = vcmp.eq.s32.totalorder %v5285_v21, %v5194_v37 }
 0x101   :  { %v1656_v26 = vpack.c.bf16 %v4580_v23, %v4579_v20  ;;  %v4724_v20 = vsel %vm1059_vm3, 1.0, %v6741_v41  ;;  %v4565_v28 = vsel %vm900_vm8, 1.0, %v6741_v41  ;;  %v1975_v38 = vunpack.c.h.b16 %v1658_v9 }
 0x102   :  { %v1728_v30 = vpack.c.bf16 %v4724_v20, %v4723_v18  ;;  %v4567_v18 = vsel %vm902_vm15, 1.0, %v6741_v41 }
 0x103   :  { %v1970_v27 = vunpack.c.l.b16 %v1656_v26  ;;  %v1971_v11 = vunpack.c.h.b16 %v1656_v26  ;;  %v4564_v26 = vsel %vm899_vm7, 1.0, %v6741_v41 }
 0x104   :  { %285 = vperm.xlu1 %4991, %v274_v57   ;;  %v676_v57 = vpop.permute.xlu0 %675  ;;  %v2115_v43 = vunpack.c.h.b16 %v1728_v30 }
 0x105   :  { %v5384_v39 = vpack.c.b16 %v1972_v24, %v1970_v27  ;;  %v5386_v42 = vpack.c.b16 %v1973_v25, %v1971_v11  ;;  %4995 = vset.pattern.permute.xlu2 %v5107_v6  ;;  %vm1060_vm4 = vcmp.eq.s32.totalorder %v676_v57, %v5190_v35  ;;  %vm1061_vm5 = vcmp.eq.s32.totalorder %v676_v57, %v5194_v37 }
 0x106   :  { %v4725_v23 = vsel %vm1060_vm4, 1.0, %v6741_v41  ;;  %v4726_v24 = vsel %vm1061_vm5, 1.0, %v6741_v41  ;;  %v4563_v25 = vsel %vm898_vm6, 1.0, %v6741_v41 }
 0x107   :  { %2569 = vmatmul.bf16.gmra.mxu0 %v2188_v34  ;;  %2898 = vmatmul.bf16.gmra.mxu1 %v2189_v36  ;;  %v1729_v8 = vpack.c.bf16 %v4726_v24, %v4725_v23  ;;  %v4566_v34 = vsel %vm901_vm9, 1.0, %v6741_v41  ;;  %v1974_v36 = vunpack.c.l.b16 %v1658_v9  ;;  %v234_v33 = vpop.permute.xlu2 %233  ;;  %v1648_v49 = vpack.c.bf16 %v4564_v26, %v4563_v25 }
 0x108   :  { %v1649_v48 = vpack.c.bf16 %v4566_v34, %v4565_v28  ;;  %vm924_vm13 = vcmp.eq.s32.totalorder %v234_v33, %v5190_v35  ;;  %vm925_vm14 = vcmp.eq.s32.totalorder %v234_v33, %v5194_v37  ;;  %v4570_v23 = vsel %vm905_vm2, 1.0, %v6741_v41 }
 0x109   :  { %v2117_v44 = vunpack.c.h.b16 %v1729_v8  ;;  %v4589_v54 = vsel %vm924_vm13, 1.0, %v6741_v41  ;;  %vm906_vm9 = vcmp.eq.s32.totalorder %v5287_v22, %v5190_v35  ;;  %vm909_vm13 = vcmp.eq.s32.totalorder %v5347_v3, %v5194_v37 }
 0x10a   :  { %v1957_v63 = vunpack.c.h.b16 %v1649_v48 }
 0x10c   :  { %4994 = vset.pattern.permute.xlu1 %v5098_v1 }
 0x10d   :  { %298 = vperm.xlu2 %4995, %v287_v58  }
 0x10e   :  { %v663_v52 = vpop.permute.xlu1 %662 }
 0x10f   :  { %vm1056_vm0 = vcmp.eq.s32.totalorder %v663_v52, %v5190_v35  ;;  %vm1057_vm1 = vcmp.eq.s32.totalorder %v663_v52, %v5194_v37 }
 0x110   :  { %v4721_v59 = vsel %vm1056_vm0, 1.0, %v6741_v41  ;;  %v4722_v60 = vsel %vm1057_vm1, 1.0, %v6741_v41  ;;  %vm903_vm0 = vcmp.eq.s32.totalorder %v5280_v12, %v5194_v37  ;;  %vm904_vm1 = vcmp.eq.s32.totalorder %v5301_v32, %v5190_v35  ;;  %v5480_v12 = vld [vmem:[%s6736_s0 + $0x38] sm:$0xff] }
 0x111   :  { %v1727_v62 = vpack.c.bf16 %v4722_v60, %v4721_v59  ;;  %v1956_v59 = vunpack.c.l.b16 %v1649_v48  ;;  %v2114_v60 = vunpack.c.l.b16 %v1728_v30  ;;  %v4569_v32 = vsel %vm904_vm1, 1.0, %v6741_v41 }
 0x112   :  { %v755_v24 = vperm.slane %v5480_v12, 0 }
 0x113   :  { %v2113_v4 = vunpack.c.h.b16 %v1727_v62  ;;  %v2112_v5 = vunpack.c.l.b16 %v1727_v62  ;;  %v1955_v62 = vunpack.c.h.b16 %v1648_v49 }
 0x114   :  { %292 = vperm.xlu1 %4994, %v287_v58   ;;  %v2535_v13 = vpop.f32.mrf.mxu0  ;;  %v2864_v16 = vpop.f32.mrf.mxu1  ;;  %v1954_v58 = vunpack.c.l.b16 %v1648_v49 }
 0x115   :  { %v2270_v19 = vpack.c.b16 %v2112_v5, %v2110_v61  ;;  %v5439_v11 = vpack.c.b16 %v2113_v4, %v2111_v0  ;;  %753 = vperm.xlu2 %4995, %v742_v29   ;;  %v2865_v53 = vadd.f32 %v2864_v16, %v2535_v13  ;;  %v2116_v61 = vunpack.c.l.b16 %v1729_v8  ;;  %v689_v0 = vpop.permute.xlu2 %688 }
 0x116   :  { %v221_v27 = vpop.permute.xlu1 %220  ;;  %v2193_v9 = vpack.c.b16 %v1957_v63, %v1955_v62  ;;  %vm1064_vm3 = vcmp.eq.s32.totalorder %v689_v0, %v5190_v35  ;;  %vm1065_vm4 = vcmp.eq.s32.totalorder %v689_v0, %v5194_v37 }
 0x117   :  { %2574 = vmatmul.bf16.gmra.mxu0 %v2190_v55  ;;  %2903 = vmatmul.bf16.gmra.mxu1 %v2191_v17  ;;  %vm920_vm10 = vcmp.eq.s32.totalorder %v221_v27, %v5190_v35  ;;  %vm921_vm11 = vcmp.eq.s32.totalorder %v221_v27, %v5194_v37  ;;  %v2272_v16 = vpack.c.b16 %v2116_v61, %v2114_v60  ;;  %v4729_v30 = vsel %vm1064_vm3, 1.0, %v6741_v41 }
 0x118   :  { %2774 = vmatmul.bf16.vlgmr.msra.gmra.mxu3 %v2270_v19  ;;  %v4585_v40 = vsel %vm920_vm10, 1.0, %v6741_v41  ;;  %v4586_v31 = vsel %vm921_vm11, 1.0, %v6741_v41  ;;  %v2192_v17 = vpack.c.b16 %v1956_v59, %v1954_v58  ;;  %v4568_v19 = vsel %vm903_vm0, 1.0, %v6741_v41 }
 0x119   :  { %v1659_v2 = vpack.c.bf16 %v4586_v31, %v4585_v40  ;;  %4953 = vmatpush.bf16.msra.mxu3 %v5328_v51  ;;  %v5462_v51 = vpack.c.b16 %v2117_v44, %v2115_v43  ;;  %v4730_v40 = vsel %vm1065_vm4, 1.0, %v6741_v41  ;;  %v1650_v31 = vpack.c.bf16 %v4568_v19, %v4567_v18 }
 0x11a   :  { %v1731_v33 = vpack.c.bf16 %v4730_v40, %v4729_v30  ;;  %v313_v61 = vperm.slane %v5226_v10, 6  ;;  %vm907_vm10 = vcmp.eq.s32.totalorder %v5287_v22, %v5194_v37  ;;  %vm908_vm11 = vcmp.eq.s32.totalorder %v5347_v3, %v5190_v35 }
 0x11b   :  { %v1976_v45 = vunpack.c.l.b16 %v1659_v2  ;;  %v1977_v47 = vunpack.c.h.b16 %v1659_v2  ;;  %v1958_v48 = vunpack.c.l.b16 %v1650_v31  ;;  %v4574_v18 = vsel %vm909_vm13, 1.0, %v6741_v41 }
 0x11c   :  { %747 = vperm.xlu1 %4994, %v742_v29   ;;  %v2537_v50 = vpop.f32.mrf.mxu0  ;;  %v2866_v52 = vpop.f32.mrf.mxu1  ;;  %v2121_v58 = vunpack.c.h.b16 %v1731_v33  ;;  %v2120_v60 = vunpack.c.l.b16 %v1731_v33  ;;  %324 = vperm.xlu0 %4999, %v313_v61  }
 0x11d   :  { %v2867_v55 = vadd.f32 %v2866_v52, %v2537_v50  ;;  %v5455_v21 = vpack.c.b16 %v1976_v45, %v1974_v36  ;;  %v5457_v56 = vpack.c.b16 %v1977_v47, %v1975_v38  ;;  %4954 = vmatpush.bf16.msra.mxu3 %v5354_v7  ;;  %v4590_v7 = vsel %vm925_vm14, 1.0, %v6741_v41  ;;  %4998 = vset.pattern.permute.xlu2 %v5098_v1 }
 0x11e   :  { %v1661_v13 = vpack.c.bf16 %v4590_v7, %v4589_v54  ;;  %v1651_v36 = vpack.c.bf16 %v4570_v23, %v4569_v32  ;;  %v1959_v52 = vunpack.c.h.b16 %v1650_v31  ;;  %v781_v31 = vperm.slane %v5480_v12, 2 }
 0x11f   :  { %v3184_v57 = vpack.c.bf16 %v2867_v55, %v2865_v53  ;;  %v696_v19 = vpop.permute.xlu2 %695 }
 0x120   :  { %v1980_v25 = vunpack.c.l.b16 %v1661_v13  ;;  %v1981_v28 = vunpack.c.h.b16 %v1661_v13  ;;  %v1960_v53 = vunpack.c.l.b16 %v1651_v36  ;;  %v1961_v55 = vunpack.c.h.b16 %v1651_v36 }
 0x121   :  { %4855 = vmatmul.msk.bf16.vlgmr.msra.gmra.mxu2 %vm3268_vm12, %v3184_v57  ;;  %vm1066_vm14 = vcmp.eq.s32.totalorder %v696_v19, %v5190_v35  ;;  %vm1067_vm15 = vcmp.eq.s32.totalorder %v696_v19, %v5194_v37 }
 0x122   :  { %v2194_v0 = vpack.c.b16 %v1960_v53, %v1958_v48 }
 0x124   :  { %4997 = vset.pattern.permute.xlu1 %v5107_v6  ;;  %v2540_v4 = vpop.f32.mrf.mxu0  ;;  %v2869_v5 = vpop.f32.mrf.mxu1  ;;  %5002 = vset.pattern.permute.xlu0 %v5098_v1 }
 0x125   :  { %760 = vperm.xlu2 %4998, %v755_v24   ;;  %v2870_v43 = vadd.f32 %v2869_v5, %v2540_v4  ;;  %v2195_v4 = vpack.c.b16 %v1961_v55, %v1959_v52 }
 0x126   :  { %v228_v20 = vpop.permute.xlu1 %227 }
 0x127   :  { %2579 = vmatmul.bf16.gmra.mxu0 %v2192_v17  ;;  %2908 = vmatmul.bf16.gmra.mxu1 %v2193_v9  ;;  %vm922_vm5 = vcmp.eq.s32.totalorder %v228_v20, %v5190_v35  ;;  %vm923_vm6 = vcmp.eq.s32.totalorder %v228_v20, %v5194_v37  ;;  %v4572_v17 = vsel %vm907_vm10, 1.0, %v6741_v41  ;;  %v4573_v9 = vsel %vm908_vm11, 1.0, %v6741_v41 }
 0x128   :  { %v4587_v26 = vsel %vm922_vm5, 1.0, %v6741_v41  ;;  %v4588_v27 = vsel %vm923_vm6, 1.0, %v6741_v41  ;;  %2779 = vmatmul.bf16.gmra.mxu3 %v2272_v16  ;;  %v4571_v16 = vsel %vm906_vm9, 1.0, %v6741_v41  ;;  %v1653_v32 = vpack.c.bf16 %v4574_v18, %v4573_v9  ;;  %v5557_v18 = vld [vmem:[%s6736_s0 + $0x18] sm:$0xff] }
 0x129   :  { %v1660_v29 = vpack.c.bf16 %v4588_v27, %v4587_v26  ;;  %v1652_v22 = vpack.c.bf16 %v4572_v17, %v4571_v16  ;;  %v768_v27 = vperm.slane %v5480_v12, 1 }
 0x12a   :  { %v1965_v40 = vunpack.c.h.b16 %v1653_v32 }
 0x12b   :  { %v1978_v8 = vunpack.c.l.b16 %v1660_v29  ;;  %v1979_v34 = vunpack.c.h.b16 %v1660_v29  ;;  %v1964_v29 = vunpack.c.l.b16 %v1653_v32  ;;  %v1963_v30 = vunpack.c.h.b16 %v1652_v22 }
 0x12c   :  { %311 = vperm.xlu1 %4997, %v300_v46   ;;  %v2542_v38 = vpop.f32.mrf.mxu0  ;;  %v2871_v2 = vpop.f32.mrf.mxu1  ;;  %786 = vperm.xlu0 %5002, %v781_v31  }
 0x12d   :  { %v2872_v44 = vadd.f32 %v2871_v2, %v2542_v38  ;;  %v5497_v45 = vpack.c.b16 %v1980_v25, %v1978_v8  ;;  %v5499_v47 = vpack.c.b16 %v1981_v28, %v1979_v34  ;;  %318 = vperm.xlu2 %4998, %v313_v61   ;;  %v1962_v28 = vunpack.c.l.b16 %v1652_v22 }
 0x12e   :  { %v683_v49 = vpop.permute.xlu1 %682  ;;  %v4731_v8 = vsel %vm1066_vm14, 1.0, %v6741_v41  ;;  %v4732_v34 = vsel %vm1067_vm15, 1.0, %v6741_v41  ;;  %v2197_v33 = vpack.c.b16 %v1965_v40, %v1963_v30 }
 0x12f   :  { %v3185_v50 = vpack.c.bf16 %v2872_v44, %v2870_v43  ;;  %vm1062_vm7 = vcmp.eq.s32.totalorder %v683_v49, %v5190_v35  ;;  %vm1063_vm8 = vcmp.eq.s32.totalorder %v683_v49, %v5194_v37  ;;  %v2196_v2 = vpack.c.b16 %v1964_v29, %v1962_v28  ;;  %v5535_v44 = vpop.permute.xlu2 %253 }
 0x130   :  { %v4727_v46 = vsel %vm1062_vm7, 1.0, %v6741_v41  ;;  %v4728_v57 = vsel %vm1063_vm8, 1.0, %v6741_v41  ;;  %v1732_v43 = vpack.c.bf16 %v4732_v34, %v4731_v8  ;;  %v326_v49 = vperm.slane %v5226_v10, 7 }
 0x131   :  { %4856 = vmatmul.msk.bf16.gmra.mxu2 %vm3268_vm12, %v3185_v50  ;;  %v1730_v59 = vpack.c.bf16 %v4728_v57, %v4727_v46 }
 0x132   :  { %v2122_v55 = vunpack.c.l.b16 %v1732_v43  ;;  %v2123_v46 = vunpack.c.h.b16 %v1732_v43 }
 0x133   :  { %v2119_v62 = vunpack.c.h.b16 %v1730_v59  ;;  %v2118_v63 = vunpack.c.l.b16 %v1730_v59 }
 0x134   :  { %766 = vperm.xlu1 %4997, %v755_v24   ;;  %v2545_v54 = vpop.f32.mrf.mxu0  ;;  %v2874_v7 = vpop.f32.mrf.mxu1  ;;  %5005 = vset.pattern.permute.xlu0 %v5107_v6 }
 0x135   :  { %v2274_v5 = vpack.c.b16 %v2120_v60, %v2118_v63  ;;  %v5507_v13 = vpack.c.b16 %v2121_v58, %v2119_v62  ;;  %5001 = vset.pattern.permute.xlu2 %v5107_v6  ;;  %v2875_v23 = vadd.f32 %v2874_v7, %v2545_v54 }
 0x137   :  { %2584 = vmatmul.bf16.gmra.mxu0 %v2194_v0  ;;  %2913 = vmatmul.bf16.gmra.mxu1 %v2195_v4  ;;  %v715_v54 = vpop.permute.xlu2 %714  ;;  %v5548_v0 = vpop.permute.xlu0 %240 }
 0x138   :  { %2784 = vmatmul.bf16.gmra.mxu3 %v2274_v5  ;;  %vm1072_vm2 = vcmp.eq.s32.totalorder %v715_v54, %v5190_v35  ;;  %vm1073_vm3 = vcmp.eq.s32.totalorder %v715_v54, %v5194_v37 }
 0x139   :  { %v4737_v4 = vsel %vm1072_vm2, 1.0, %v6741_v41  ;;  %v4738_v5 = vsel %vm1073_vm3, 1.0, %v6741_v41  ;;  %vm926_vm3 = vcmp.eq.s32.totalorder %v5548_v0, %v5190_v35 }
 0x13a   :  { %v1735_v9 = vpack.c.bf16 %v4738_v5, %v4737_v4 }
 0x13c   :  { %5000 = vset.pattern.permute.xlu1 %v5098_v1  ;;  %v2547_v3 = vpop.f32.mrf.mxu0  ;;  %v2876_v20 = vpop.f32.mrf.mxu1 }
 0x13d   :  { %v2877_v24 = vadd.f32 %v2876_v20, %v2547_v3  ;;  %779 = vperm.xlu2 %5001, %v768_v27   ;;  %v339_v20 = vperm.slane %v5557_v18, 0 }
 0x13e   :  { %v5524_v25 = vpop.permute.xlu1 %246 }
 0x13f   :  { %v3186_v26 = vpack.c.bf16 %v2877_v24, %v2875_v23  ;;  %v2128_v23 = vunpack.c.l.b16 %v1735_v9  ;;  %v2129_v24 = vunpack.c.h.b16 %v1735_v9  ;;  %v5571_v8 = vpop.permute.xlu2 %272  ;;  %vm929_vm2 = vcmp.eq.s32.totalorder %v5524_v25, %v5194_v37 }
 0x141   :  { %4857 = vmatmul.msk.bf16.gmra.mxu2 %vm3268_vm12, %v3186_v26  ;;  %v794_v26 = vperm.slane %v5480_v12, 3 }
 0x143   :  { %805 = vperm.xlu0 %5005, %v794_v26  }
 0x144   :  { %773 = vperm.xlu1 %5000, %v768_v27   ;;  %v2550_v36 = vpop.f32.mrf.mxu0  ;;  %v2879_v38 = vpop.f32.mrf.mxu1 }
 0x145   :  { %337 = vperm.xlu2 %5001, %v326_v49   ;;  %v2880_v61 = vadd.f32 %v2879_v38, %v2550_v36  ;;  %v5567_v27 = vpop.permute.xlu0 %259 }
 0x146   :  { %v702_v48 = vpop.permute.xlu1 %701 }
 0x147   :  { %2589 = vmatmul.bf16.gmra.mxu0 %v2196_v2  ;;  %2918 = vmatmul.bf16.gmra.mxu1 %v2197_v33  ;;  %vm1068_vm0 = vcmp.eq.s32.totalorder %v702_v48, %v5190_v35  ;;  %vm1069_vm1 = vcmp.eq.s32.totalorder %v702_v48, %v5194_v37 }
 0x148   :  { %v4733_v50 = vsel %vm1068_vm0, 1.0, %v6741_v41  ;;  %v4734_v52 = vsel %vm1069_vm1, 1.0, %v6741_v41  ;;  %vm928_vm1 = vcmp.eq.s32.totalorder %v5524_v25, %v5190_v35 }
 0x149   :  { %v1733_v53 = vpack.c.bf16 %v4734_v52, %v4733_v50  ;;  %v365_v52 = vperm.slane %v5557_v18, 2  ;;  %v4593_v25 = vsel %vm928_vm1, 1.0, %v6741_v41 }
 0x14b   :  { %v2125_v57 = vunpack.c.h.b16 %v1733_v53  ;;  %v2124_v58 = vunpack.c.l.b16 %v1733_v53  ;;  %5008 = vset.pattern.permute.xlu0 %v5098_v1 }
 0x14c   :  { %331 = vperm.xlu1 %5000, %v326_v49   ;;  %v2552_v59 = vpop.f32.mrf.mxu0  ;;  %v2881_v60 = vpop.f32.mrf.mxu1 }
 0x14d   :  { %v2882_v62 = vadd.f32 %v2881_v60, %v2552_v59  ;;  %v2276_v63 = vpack.c.b16 %v2124_v58, %v2122_v55  ;;  %v5543_v10 = vpack.c.b16 %v2125_v57, %v2123_v46  ;;  %5004 = vset.pattern.permute.xlu2 %v5098_v1  ;;  %v722_v33 = vpop.permute.xlu0 %721 }
 0x14e   :  { %vm1074_vm6 = vcmp.eq.s32.totalorder %v722_v33, %v5190_v35  ;;  %vm1075_vm7 = vcmp.eq.s32.totalorder %v722_v33, %v5194_v37 }
 0x14f   :  { %v3187_v7 = vpack.c.bf16 %v2882_v62, %v2880_v61  ;;  %2789 = vmatmul.bf16.gmra.mxu3 %v2276_v63  ;;  %v5579_v48 = vpop.permute.xlu2 %279  ;;  %v4739_v49 = vsel %vm1074_vm6, 1.0, %v6741_v41  ;;  %v4740_v50 = vsel %vm1075_vm7, 1.0, %v6741_v41  ;;  %v352_v61 = vperm.slane %v5557_v18, 1 }
 0x150   :  { %v1736_v46 = vpack.c.bf16 %v4740_v50, %v4739_v49 }
 0x151   :  { %4858 = vmatmul.msk.bf16.gmra.mxu2 %vm3268_vm12, %v3187_v7 }
 0x152   :  { %v2130_v7 = vunpack.c.l.b16 %v1736_v46  ;;  %v2131_v4 = vunpack.c.h.b16 %v1736_v46 }
 0x153   :  { %370 = vperm.xlu0 %5008, %v365_v52  }
 0x154   :  { %5003 = vset.pattern.permute.xlu1 %v5107_v6  ;;  %v2555_v16 = vpop.f32.mrf.mxu0  ;;  %v2884_v17 = vpop.f32.mrf.mxu1 }
 0x155   :  { %344 = vperm.xlu2 %5004, %v339_v20   ;;  %v2885_v30 = vadd.f32 %v2884_v17, %v2555_v16  ;;  %v741_v60 = vpop.permute.xlu0 %740 }
 0x156   :  { %v709_v19 = vpop.permute.xlu1 %708  ;;  %vm1080_vm13 = vcmp.eq.s32.totalorder %v741_v60, %v5190_v35  ;;  %vm1081_vm14 = vcmp.eq.s32.totalorder %v741_v60, %v5194_v37  ;;  %v4591_v60 = vsel %vm926_vm3, 1.0, %v6741_v41  ;;  %vm937_vm3 = vcmp.eq.s32.totalorder %v5571_v8, %v5194_v37 }
 0x157   :  { %2594 = vmatmul.bf16.gmra.mxu0 %v5356_v14  ;;  %2923 = vmatmul.bf16.gmra.mxu1 %v5358_v15  ;;  %vm1070_vm4 = vcmp.eq.s32.totalorder %v709_v19, %v5190_v35  ;;  %vm1071_vm5 = vcmp.eq.s32.totalorder %v709_v19, %v5194_v37  ;;  %v735_v58 = vpop.permute.xlu2 %734 }
 0x158   :  { %v4735_v22 = vsel %vm1070_vm4, 1.0, %v6741_v41  ;;  %v4736_v3 = vsel %vm1071_vm5, 1.0, %v6741_v41  ;;  %vm1078_vm10 = vcmp.eq.s32.totalorder %v735_v58, %v5190_v35  ;;  %vm1079_vm11 = vcmp.eq.s32.totalorder %v735_v58, %v5194_v37 }
 0x159   :  { %v1734_v32 = vpack.c.bf16 %v4736_v3, %v4735_v22  ;;  %v4743_v19 = vsel %vm1078_vm10, 1.0, %v6741_v41  ;;  %v4744_v3 = vsel %vm1079_vm11, 1.0, %v6741_v41  ;;  %vm927_vm4 = vcmp.eq.s32.totalorder %v5548_v0, %v5194_v37 }
 0x15a   :  { %v4594_v58 = vsel %vm929_vm2, 1.0, %v6741_v41  ;;  %vm930_vm11 = vcmp.eq.s32.totalorder %v5535_v44, %v5190_v35  ;;  %vm936_vm2 = vcmp.eq.s32.totalorder %v5571_v8, %v5190_v35  ;;  %v391_v8 = vperm.slane %v5557_v18, 4 }
 0x15b   :  { %v2127_v14 = vunpack.c.h.b16 %v1734_v32  ;;  %v2126_v28 = vunpack.c.l.b16 %v1734_v32  ;;  %5011 = vset.pattern.permute.xlu0 %v5107_v6  ;;  %v4746_v32 = vsel %vm1081_vm14, 1.0, %v6741_v41  ;;  %vm932_vm14 = vcmp.eq.s32.totalorder %v5567_v27, %v5190_v35 }
 0x15c   :  { %792 = vperm.xlu1 %5003, %v781_v31   ;;  %v2557_v15 = vpop.f32.mrf.mxu0  ;;  %v2886_v29 = vpop.f32.mrf.mxu1 }
 0x15d   :  { %v2887_v40 = vadd.f32 %v2886_v29, %v2557_v15  ;;  %v2278_v34 = vpack.c.b16 %v2128_v23, %v2126_v28  ;;  %v5573_v36 = vpack.c.b16 %v2129_v24, %v2127_v14  ;;  %799 = vperm.xlu2 %5004, %v794_v26   ;;  %v807_v24 = vperm.slane %v5480_v12, 4 }
 0x15e   :  { %v5576_v2 = vpop.permute.xlu1 %266  ;;  %v1738_v26 = vpack.c.bf16 %v4744_v3, %v4743_v19 }
 0x15f   :  { %v3188_v38 = vpack.c.bf16 %v2887_v40, %v2885_v30  ;;  %2794 = vmatmul.bf16.gmra.mxu3 %v2278_v34 }
 0x160   :  { %v2135_v15 = vunpack.c.h.b16 %v1738_v26 }
 0x161   :  { %4859 = vmatmul.msk.bf16.gmra.mxu2 %vm3268_vm12, %v3188_v38 }
 0x164   :  { %350 = vperm.xlu1 %5003, %v339_v20   ;;  %v2560_v31 = vpop.f32.mrf.mxu0  ;;  %v2889_v43 = vpop.f32.mrf.mxu1  ;;  %v4745_v20 = vsel %vm1080_vm13, 1.0, %v6741_v41  ;;  %vm931_vm13 = vcmp.eq.s32.totalorder %v5535_v44, %v5194_v37 }
 0x165   :  { %5007 = vset.pattern.permute.xlu2 %v5107_v6  ;;  %v1739_v14 = vpack.c.bf16 %v4746_v32, %v4745_v20 }
 0x167   :  { %2599 = vmatmul.bf16.gmra.mxu0 %v5384_v39  ;;  %2928 = vmatmul.bf16.gmra.mxu1 %v5386_v42  ;;  %v2890_v39 = vadd.f32 %v2889_v43, %v2560_v31  ;;  %v299_v28 = vpop.permute.xlu2 %298  ;;  %v2137_v29 = vunpack.c.h.b16 %v1739_v14  ;;  %v2136_v43 = vunpack.c.l.b16 %v1739_v14 }
 0x168   :  { %vm944_vm15 = vcmp.eq.s32.totalorder %v299_v28, %v5190_v35  ;;  %vm945_vm0 = vcmp.eq.s32.totalorder %v299_v28, %v5194_v37 }
 0x169   :  { %v5614_v31 = vpack.c.b16 %v2137_v29, %v2135_v15  ;;  %v4609_v49 = vsel %vm944_vm15, 1.0, %v6741_v41  ;;  %v4610_v50 = vsel %vm945_vm0, 1.0, %v6741_v41  ;;  %vm933_vm15 = vcmp.eq.s32.totalorder %v5567_v27, %v5194_v37 }
 0x16a   :  { %v1671_v46 = vpack.c.bf16 %v4610_v50, %v4609_v49 }
 0x16c   :  { %5006 = vset.pattern.permute.xlu1 %v5098_v1  ;;  %v2562_v53 = vpop.f32.mrf.mxu0  ;;  %v2891_v55 = vpop.f32.mrf.mxu1 }
 0x16d   :  { %v2892_v42 = vadd.f32 %v2891_v55, %v2562_v53  ;;  %363 = vperm.xlu2 %5007, %v352_v61  }
 0x16e   :  { %v728_v57 = vpop.permute.xlu1 %727 }
 0x16f   :  { %v3189_v59 = vpack.c.bf16 %v2892_v42, %v2890_v39  ;;  %vm1076_vm8 = vcmp.eq.s32.totalorder %v728_v57, %v5190_v35  ;;  %vm1077_vm9 = vcmp.eq.s32.totalorder %v728_v57, %v5194_v37  ;;  %v754_v53 = vpop.permute.xlu2 %753 }
 0x170   :  { %v4741_v62 = vsel %vm1076_vm8, 1.0, %v6741_v41  ;;  %v4742_v63 = vsel %vm1077_vm9, 1.0, %v6741_v41  ;;  %vm1084_vm5 = vcmp.eq.s32.totalorder %v754_v53, %v5190_v35  ;;  %vm1085_vm8 = vcmp.eq.s32.totalorder %v754_v53, %v5194_v37 }
 0x171   :  { %4860 = vmatmul.msk.bf16.gmra.mxu2 %vm3268_vm12, %v3189_v59  ;;  %v1737_v54 = vpack.c.bf16 %v4742_v63, %v4741_v62  ;;  %v2000_v62 = vunpack.c.l.b16 %v1671_v46  ;;  %v2001_v63 = vunpack.c.h.b16 %v1671_v46 }
 0x173   :  { %v2133_v5 = vunpack.c.h.b16 %v1737_v54  ;;  %v2132_v16 = vunpack.c.l.b16 %v1737_v54  ;;  %v4749_v54 = vsel %vm1084_vm5, 1.0, %v6741_v41  ;;  %vm935_vm5 = vcmp.eq.s32.totalorder %v5576_v2, %v5194_v37 }
 0x174   :  { %357 = vperm.xlu1 %5006, %v352_v61   ;;  %v2565_v17 = vpop.f32.mrf.mxu0  ;;  %v2894_v9 = vpop.f32.mrf.mxu1 }
 0x175   :  { %v2280_v22 = vpack.c.b16 %v2132_v16, %v2130_v7  ;;  %v5607_v23 = vpack.c.b16 %v2133_v5, %v2131_v4  ;;  %818 = vperm.xlu2 %5007, %v807_v24   ;;  %v2895_v38 = vadd.f32 %v2894_v9, %v2565_v17  ;;  %v4750_v7 = vsel %vm1085_vm8, 1.0, %v6741_v41 }
 0x176   :  { %v5612_v30 = vpop.permute.xlu1 %285  ;;  %v1663_v4 = vpack.c.bf16 %v4594_v58, %v4593_v25  ;;  %v378_v17 = vperm.slane %v5557_v18, 3  ;;  %v1741_v32 = vpack.c.bf16 %v4750_v7, %v4749_v54  ;;  %v4596_v25 = vsel %vm931_vm13, 1.0, %v6741_v41 }
 0x177   :  { %2604 = vmatmul.bf16.gmra.mxu0 %v5455_v21  ;;  %2933 = vmatmul.bf16.gmra.mxu1 %v5457_v56  ;;  %v2134_v56 = vunpack.c.l.b16 %v1738_v26  ;;  %v4597_v58 = vsel %vm932_vm14, 1.0, %v6741_v41  ;;  %vm940_vm13 = vcmp.eq.s32.totalorder %v5612_v30, %v5190_v35  ;;  %vm941_vm14 = vcmp.eq.s32.totalorder %v5612_v30, %v5194_v37 }
 0x178   :  { %2799 = vmatmul.bf16.gmra.mxu3 %v2280_v22  ;;  %389 = vperm.xlu0 %5011, %v378_v17   ;;  %v1984_v28 = vunpack.c.l.b16 %v1663_v4  ;;  %v1985_v29 = vunpack.c.h.b16 %v1663_v4  ;;  %v833_v4 = vperm.slane %v5480_v12, 6  ;;  %v4605_v30 = vsel %vm940_vm13, 1.0, %v6741_v41 }
 0x179   :  { %v2282_v42 = vpack.c.b16 %v2136_v43, %v2134_v56  ;;  %v2140_v56 = vunpack.c.l.b16 %v1741_v32 }
 0x17c   :  { %812 = vperm.xlu1 %5006, %v807_v24   ;;  %v2567_v40 = vpop.f32.mrf.mxu0  ;;  %v2896_v34 = vpop.f32.mrf.mxu1 }
 0x17d   :  { %v2897_v33 = vadd.f32 %v2896_v34, %v2567_v40  ;;  %5010 = vset.pattern.permute.xlu2 %v5098_v1 }
 0x17f   :  { %v3190_v21 = vpack.c.bf16 %v2897_v33, %v2895_v38  ;;  %v2141_v33 = vunpack.c.h.b16 %v1741_v32  ;;  %v761_v44 = vpop.permute.xlu2 %760 }
 0x180   :  { %5014 = vset.pattern.permute.xlu0 %v5098_v1  ;;  %vm1086_vm0 = vcmp.eq.s32.totalorder %v761_v44, %v5190_v35  ;;  %vm1087_vm1 = vcmp.eq.s32.totalorder %v761_v44, %v5194_v37 }
 0x181   :  { %4861 = vmatmul.msk.bf16.gmra.mxu2 %vm3268_vm12, %v3190_v21 }
 0x184   :  { %5009 = vset.pattern.permute.xlu1 %v5107_v6  ;;  %v2570_v55 = vpop.f32.mrf.mxu0  ;;  %v2899_v39 = vpop.f32.mrf.mxu1 }
 0x185   :  { %v2900_v3 = vadd.f32 %v2899_v39, %v2570_v55 }
 0x186   :  { %v293_v57 = vpop.permute.xlu1 %292 }
 0x187   :  { %2609 = vmatmul.bf16.gmra.mxu0 %v5497_v45  ;;  %2938 = vmatmul.bf16.gmra.mxu1 %v5499_v47  ;;  %vm942_vm6 = vcmp.eq.s32.totalorder %v293_v57, %v5190_v35  ;;  %vm943_vm7 = vcmp.eq.s32.totalorder %v293_v57, %v5194_v37  ;;  %v4592_v45 = vsel %vm927_vm4, 1.0, %v6741_v41  ;;  %v820_v47 = vperm.slane %v5480_v12, 5 }
 0x188   :  { %v4607_v0 = vsel %vm942_vm6, 1.0, %v6741_v41  ;;  %v4608_v59 = vsel %vm943_vm7, 1.0, %v6741_v41  ;;  %2804 = vmatmul.bf16.gmra.mxu3 %v2282_v42  ;;  %v1662_v9 = vpack.c.bf16 %v4592_v45, %v4591_v60  ;;  %v4595_v57 = vsel %vm930_vm11, 1.0, %v6741_v41 }
 0x189   :  { %v1670_v61 = vpack.c.bf16 %v4608_v59, %v4607_v0  ;;  %825 = vperm.xlu2 %5010, %v820_v47   ;;  %v4598_v0 = vsel %vm933_vm15, 1.0, %v6741_v41  ;;  %v846_v60 = vperm.slane %v5480_v12, 7  ;;  %vm934_vm4 = vcmp.eq.s32.totalorder %v5576_v2, %v5190_v35 }
 0x18a   :  { %v1982_v40 = vunpack.c.l.b16 %v1662_v9  ;;  %v1983_v38 = vunpack.c.h.b16 %v1662_v9  ;;  %vm939_vm11 = vcmp.eq.s32.totalorder %v5579_v48, %v5194_v37 }
 0x18b   :  { %v1998_v5 = vunpack.c.l.b16 %v1670_v61  ;;  %v1999_v16 = vunpack.c.h.b16 %v1670_v61  ;;  %v1665_v61 = vpack.c.bf16 %v4598_v0, %v4597_v58  ;;  %851 = vperm.xlu0 %5014, %v846_v60  }
 0x18c   :  { %376 = vperm.xlu1 %5009, %v365_v52   ;;  %v2572_v19 = vpop.f32.mrf.mxu0  ;;  %v2901_v22 = vpop.f32.mrf.mxu1  ;;  %v2206_v55 = vpack.c.b16 %v1984_v28, %v1982_v40  ;;  %v2207_v39 = vpack.c.b16 %v1985_v29, %v1983_v38 }
 0x18d   :  { %v2902_v20 = vadd.f32 %v2901_v22, %v2572_v19  ;;  %v5651_v26 = vpack.c.b16 %v2000_v62, %v1998_v5  ;;  %v5653_v14 = vpack.c.b16 %v2001_v63, %v1999_v16  ;;  %v1989_v9 = vunpack.c.h.b16 %v1665_v61 }
 0x18e   :  { %v748_v24 = vpop.permute.xlu1 %747  ;;  %v4751_v19 = vsel %vm1086_vm0, 1.0, %v6741_v41  ;;  %v4752_v22 = vsel %vm1087_vm1, 1.0, %v6741_v41 }
 0x18f   :  { %v3191_v15 = vpack.c.bf16 %v2902_v20, %v2900_v3  ;;  %vm1082_vm9 = vcmp.eq.s32.totalorder %v748_v24, %v5190_v35  ;;  %vm1083_vm10 = vcmp.eq.s32.totalorder %v748_v24, %v5194_v37  ;;  %v1742_v29 = vpack.c.bf16 %v4752_v22, %v4751_v19 }
 0x190   :  { %v4747_v52 = vsel %vm1082_vm9, 1.0, %v6741_v41  ;;  %v4748_v34 = vsel %vm1083_vm10, 1.0, %v6741_v41  ;;  %vm938_vm10 = vcmp.eq.s32.totalorder %v5579_v48, %v5190_v35 }
 0x191   :  { %4862 = vmatmul.msk.bf16.gmra.mxu2 %vm3268_vm12, %v3191_v15  ;;  %v1740_v21 = vpack.c.bf16 %v4748_v34, %v4747_v52  ;;  %383 = vperm.xlu2 %5010, %v378_v17   ;;  %v1988_v17 = vunpack.c.l.b16 %v1665_v61  ;;  %v5703_v52 = vpop.permute.xlu2 %318  ;;  %v5708_v34 = vld [vmem:[%s6739_s3] ss:$0 sm:$0xff]  ;;  %v4603_v48 = vsel %vm938_vm10, 1.0, %v6741_v41 }
 0x193   :  { %v2139_v43 = vunpack.c.h.b16 %v1740_v21  ;;  %v2138_v49 = vunpack.c.l.b16 %v1740_v21  ;;  %5017 = vset.pattern.permute.xlu0 %v5107_v6  ;;  %v4601_v21 = vsel %vm936_vm2, 1.0, %v6741_v41 }
 0x194   :  { %831 = vperm.xlu1 %5009, %v820_v47   ;;  %v2575_v50 = vpop.f32.mrf.mxu0  ;;  %v2904_v53 = vpop.f32.mrf.mxu1  ;;  %v1664_v47 = vpack.c.bf16 %v4596_v25, %v4595_v57 }
 0x195   :  { %v2284_v42 = vpack.c.b16 %v2140_v56, %v2138_v49  ;;  %v5661_v46 = vpack.c.b16 %v2141_v33, %v2139_v43  ;;  %v2905_v62 = vadd.f32 %v2904_v53, %v2575_v50  ;;  %v4602_v56 = vsel %vm937_vm3, 1.0, %v6741_v41 }
 0x196   :  { %v1986_v5 = vunpack.c.l.b16 %v1664_v47  ;;  %v1987_v16 = vunpack.c.h.b16 %v1664_v47  ;;  %v2142_v49 = vunpack.c.l.b16 %v1742_v29  ;;  %v4599_v50 = vsel %vm934_vm4, 1.0, %v6741_v41 }
 0x197   :  { %2614 = vmatmul.bf16.gmra.mxu0 %v2206_v55  ;;  %2943 = vmatmul.bf16.gmra.mxu1 %v2207_v39  ;;  %v4600_v53 = vsel %vm935_vm5, 1.0, %v6741_v41  ;;  %v2143_v55 = vunpack.c.h.b16 %v1742_v29  ;;  %v1667_v57 = vpack.c.bf16 %v4602_v56, %v4601_v21  ;;  %vm4430_vm3 = vcmask 1041409  }
 0x198   :  { %2809 = vmatmul.bf16.gmra.mxu3 %v2284_v42  ;;  %v2208_v28 = vpack.c.b16 %v1988_v17, %v1986_v5  ;;  %v2209_v15 = vpack.c.b16 %v1989_v9, %v1987_v16  ;;  %v1666_v44 = vpack.c.bf16 %v4600_v53, %v4599_v50  ;;  %v4604_v50 = vsel %vm939_vm11, 1.0, %v6741_v41 }
 0x199   :  { %5013 = vset.pattern.permute.xlu2 %v5107_v6  ;;  %v1992_v17 = vunpack.c.l.b16 %v1667_v57  ;;  %v1993_v9 = vunpack.c.h.b16 %v1667_v57 }
 0x19a   :  { %v1990_v19 = vunpack.c.l.b16 %v1666_v44  ;;  %v1991_v22 = vunpack.c.h.b16 %v1666_v44 }
 0x19b   :  { %v5675_v59 = vpop.f32.mrf.mxu3 }
 0x19c   :  { %5012 = vset.pattern.permute.xlu1 %v5098_v1  ;;  %v2577_v27 = vpop.f32.mrf.mxu0  ;;  %v2906_v45 = vpop.f32.mrf.mxu1 }
 0x19d   :  { %v2907_v63 = vadd.f32 %v2906_v45, %v2577_v27 }
 0x19e   :  { %v5682_v54 = vpop.permute.xlu1 %311 }
 0x19f   :  { %v3192_v7 = vpack.c.bf16 %v2907_v63, %v2905_v62  ;;  %vm949_vm10 = vcmp.eq.s32.totalorder %v5682_v54, %v5194_v37 }
 0x1a1   :  { %4863 = vmatmul.msk.bf16.gmra.mxu2 %vm3268_vm12, %v3192_v7  ;;  %844 = vperm.xlu2 %5013, %v833_v4   ;;  %v780_v7 = vpop.permute.xlu2 %779 }
 0x1a2   :  { %vm1092_vm8 = vcmp.eq.s32.totalorder %v780_v7, %v5190_v35  ;;  %vm1093_vm9 = vcmp.eq.s32.totalorder %v780_v7, %v5194_v37 }
 0x1a3   :  { %v5690_v3 = vpop.f32.mrf.mxu3 }
 0x1a4   :  { %838 = vperm.xlu1 %5012, %v833_v4   ;;  %v2580_v20 = vpop.f32.mrf.mxu0  ;;  %v2909_v32 = vpop.f32.mrf.mxu1 }
 0x1a5   :  { %v3470_v24 = vpop.f32.mrf.mxu2  ;;  %v2910_v27 = vadd.f32 %v2909_v32, %v2580_v20  ;;  %v5729_v20 = vpop.permute.xlu0 %305 }
 0x1a6   :  { %v767_v40 = vpop.permute.xlu1 %766  ;;  %v3471_v25 = vadd.f32 %v5708_v34, %v3470_v24  ;;  %v4757_v24 = vsel %vm1092_vm8, 1.0, %v6741_v41  ;;  %vm946_vm11 = vcmp.eq.s32.totalorder %v5729_v20, %v5190_v35  ;;  %vm947_vm13 = vcmp.eq.s32.totalorder %v5729_v20, %v5194_v37 }
 0x1a7   :  { %2619 = vmatmul.bf16.gmra.mxu0 %v2208_v28  ;;  %2948 = vmatmul.bf16.gmra.mxu1 %v2209_v15  ;;  %vm1088_vm6 = vcmp.eq.s32.totalorder %v767_v40, %v5190_v35  ;;  %vm1089_vm7 = vcmp.eq.s32.totalorder %v767_v40, %v5194_v37  ;;  %v4758_v28 = vsel %vm1093_vm9, 1.0, %v6741_v41 }
 0x1a8   :  { %v4753_v38 = vsel %vm1088_vm6, 1.0, %v6741_v41  ;;  %v4754_v33 = vsel %vm1089_vm7, 1.0, %v6741_v41  ;;  %v3790_v5 = vmax.f32 %v3471_v25, 0.0  ;;  %vm948_vm6 = vcmp.eq.s32.totalorder %v5682_v54, %v5190_v35 }
 0x1a9   :  { %v1743_v43 = vpack.c.bf16 %v4754_v33, %v4753_v38  ;;  %402 = vperm.xlu2 %5013, %v391_v8   ;;  %v2211_v38 = vpack.c.b16 %v1993_v9, %v1991_v22  ;;  %v1745_v33 = vpack.c.bf16 %v4758_v28, %v4757_v24  ;;  %v5762_v24 = vpop.permute.xlu2 %337 }
 0x1ab   :  { %v2145_v39 = vunpack.c.h.b16 %v1743_v43  ;;  %v2144_v42 = vunpack.c.l.b16 %v1743_v43  ;;  %v5722_v62 = vpop.f32.mrf.mxu3 }
 0x1ac   :  { %396 = vperm.xlu1 %5012, %v391_v8   ;;  %v2582_v58 = vpop.f32.mrf.mxu0  ;;  %v2911_v0 = vpop.f32.mrf.mxu1  ;;  %v2210_v8 = vpack.c.b16 %v1992_v17, %v1990_v19 }
 0x1ad   :  { %v2912_v45 = vadd.f32 %v2911_v0, %v2582_v58  ;;  %v3472_v47 = vpop.f32.mrf.mxu2  ;;  %v2286_v61 = vpack.c.b16 %v2144_v42, %v2142_v49  ;;  %v5724_v4 = vpack.c.b16 %v2145_v39, %v2143_v55  ;;  %v2148_v55 = vunpack.c.l.b16 %v1745_v33  ;;  %v5753_v57 = vpop.permute.xlu0 %324 }
 0x1ae   :  { %v3473_v2 = vadd.f32 %v5708_v34, %v3472_v47  ;;  %v4606_v39 = vsel %vm941_vm14, 1.0, %v6741_v41  ;;  %v404_v58 = vperm.slane %v5557_v18, 5  ;;  %v1668_v0 = vpack.c.bf16 %v4604_v50, %v4603_v48 }
 0x1af   :  { %v3193_v63 = vpack.c.bf16 %v2912_v45, %v2910_v27  ;;  %2814 = vmatmul.bf16.gmra.mxu3 %v2286_v61  ;;  %v2149_v47 = vunpack.c.h.b16 %v1745_v33 }
 0x1b0   :  { %v3791_v16 = vmax.f32 %v3473_v2, 0.0  ;;  %v1669_v2 = vpack.c.bf16 %v4606_v39, %v4605_v30  ;;  %v1994_v28 = vunpack.c.l.b16 %v1668_v0 }
 0x1b1   :  { %4864 = vmatmul.msk.bf16.gmra.mxu2 %vm3268_vm12, %v3193_v63  ;;  %5016 = vset.pattern.permute.xlu2 %v5098_v1 }
 0x1b2   :  { %v3918_v32 = vmax.f32 %v3790_v5, %v3791_v16 }
 0x1b3   :  { %v5745_v56 = vpop.f32.mrf.mxu3 }
 0x1b4   :  { %5015 = vset.pattern.permute.xlu1 %v5107_v6  ;;  %v2585_v15 = vpop.f32.mrf.mxu0  ;;  %v2914_v29 = vpop.f32.mrf.mxu1  ;;  %v3919_v42 = vrot.slane %v3918_v32, 4 }
 0x1b5   :  { %v3475_v40 = vpop.f32.mrf.mxu2  ;;  %v2915_v63 = vadd.f32 %v2914_v29, %v2585_v15 }
 0x1b6   :  { %v774_v21 = vpop.permute.xlu1 %773  ;;  %v3476_v44 = vadd.f32 %v5708_v34, %v3475_v40  ;;  %v3920_v17 = vmax.f32 %v3918_v32, %v3919_v42  ;;  %v1995_v40 = vunpack.c.h.b16 %v1668_v0  ;;  %v5771_v42 = vpop.permute.xlu2 %344 }
 0x1b7   :  { %2624 = vmatmul.bf16.gmra.mxu0 %v2210_v8  ;;  %2953 = vmatmul.bf16.gmra.mxu1 %v2211_v38  ;;  %vm1090_vm15 = vcmp.eq.s32.totalorder %v774_v21, %v5190_v35  ;;  %vm1091_vm0 = vcmp.eq.s32.totalorder %v774_v21, %v5194_v37  ;;  %v1996_v8 = vunpack.c.l.b16 %v1669_v2  ;;  %v1997_v38 = vunpack.c.h.b16 %v1669_v2  ;;  %v787_v21 = vpop.permute.xlu0 %786 }
 0x1b8   :  { %v4755_v43 = vsel %vm1090_vm15, 1.0, %v6741_v41  ;;  %v4756_v49 = vsel %vm1091_vm0, 1.0, %v6741_v41  ;;  %v3792_v12 = vmax.f32 %v3476_v44, 0.0  ;;  %v3921_v15 = vrot.slane %v3920_v17, 2 }
 0x1b9   :  { %v1744_v53 = vpack.c.bf16 %v4756_v49, %v4755_v43  ;;  %409 = vperm.xlu2 %5016, %v404_v58   ;;  %vm1094_vm1 = vcmp.eq.s32.totalorder %v787_v21, %v5190_v35  ;;  %vm1095_vm2 = vcmp.eq.s32.totalorder %v787_v21, %v5194_v37  ;;  %vm4432_vm15 = vcmask 1042434  }
 0x1ba   :  { %v3922_v30 = vmax.f32 %v3920_v17, %v3921_v15  ;;  %vm950_vm0 = vcmp.eq.s32.totalorder %v5703_v52, %v5190_v35 }
 0x1bb   :  { %v2146_v25 = vunpack.c.l.b16 %v1744_v53  ;;  %v2147_v61 = vunpack.c.h.b16 %v1744_v53  ;;  %v5765_v33 = vpop.f32.mrf.mxu3  ;;  %v2212_v53 = vpack.c.b16 %v1996_v8, %v1994_v28 }
 0x1bc   :  { %857 = vperm.xlu1 %5015, %v846_v60   ;;  %v2587_v27 = vpop.f32.mrf.mxu0  ;;  %v2916_v45 = vpop.f32.mrf.mxu1  ;;  %v3923_v0 = vrot.slane %v3922_v30, 1 }
 0x1bd   :  { %v2917_v7 = vadd.f32 %v2916_v45, %v2587_v27  ;;  %v3477_v5 = vpop.f32.mrf.mxu2  ;;  %v2288_v16 = vpack.c.b16 %v2148_v55, %v2146_v25  ;;  %v5760_v19 = vpack.c.b16 %v2149_v47, %v2147_v61  ;;  %v2213_v55 = vpack.c.b16 %v1997_v38, %v1995_v40 }
 0x1be   :  { %v3478_v9 = vadd.f32 %v5708_v34, %v3477_v5  ;;  %v5767_v32 = vpop.permute.xlu1 %331  ;;  %v4759_v27 = vsel %vm1094_vm1, 1.0, %v6741_v41  ;;  %v417_v47 = vperm.slane %v5557_v18, 6  ;;  %v800_v38 = vpop.permute.xlu2 %799  ;;  %vm951_vm1 = vcmp.eq.s32.totalorder %v5703_v52, %v5194_v37 }
 0x1bf   :  { %v3194_v22 = vpack.c.bf16 %v2917_v7, %v2915_v63  ;;  %2819 = vmatmul.bf16.gmra.mxu3 %v2288_v16  ;;  %vm1098_vm7 = vcmp.eq.s32.totalorder %v800_v38, %v5190_v35  ;;  %vm1099_vm8 = vcmp.eq.s32.totalorder %v800_v38, %v5194_v37  ;;  %v4615_v52 = vsel %vm950_vm0, 1.0, %v6741_v41 }
 0x1c0   :  { %v3793_v60 = vmax.f32 %v3478_v9, 0.0  ;;  %428 = vperm.xlu0 %5017, %v417_v47  }
 0x1c1   :  { %4865 = vmatmul.msk.bf16.gmra.mxu2 %vm3268_vm12, %v3194_v22  ;;  %422 = vperm.xlu2 %5016, %v417_v47   ;;  %v3924_v22 = vmax.f32 %v3922_v30, %v3923_v0 }
 0x1c2   :  { %v3925_v29 = vmax.f32 %v3792_v12, %v3793_v60 }
 0x1c3   :  { %v5778_v17 = vpop.f32.mrf.mxu3 }
 0x1c4   :  { %v3926_v43 = vrot.slane %v3925_v29, 4  ;;  %v2590_v49 = vpop.f32.mrf.mxu0  ;;  %v2919_v48 = vpop.f32.mrf.mxu1  ;;  %415 = vperm.xlu1 %5015, %v404_v58   ;;  %v4760_v58 = vsel %vm1095_vm2, 1.0, %v6741_v41  ;;  %vm952_vm2 = vcmp.eq.s32.totalorder %v5753_v57, %v5190_v35 }
 0x1c5   :  { %v3480_v50 = vpop.f32.mrf.mxu2  ;;  %v2920_v7 = vadd.f32 %v2919_v48, %v2590_v49  ;;  %v1746_v9 = vpack.c.bf16 %v4760_v58, %v4759_v27 }
 0x1c6   :  { %v3927_v39 = vmax.f32 %v3925_v29, %v3926_v43  ;;  %v3481_v45 = vadd.f32 %v5708_v34, %v3480_v50  ;;  %v806_v50 = vpop.permute.xlu0 %805 }
 0x1c7   :  { %2629 = vmatmul.bf16.gmra.mxu0 %v2212_v53  ;;  %2958 = vmatmul.bf16.gmra.mxu1 %v2213_v55  ;;  %v2150_v48 = vunpack.c.l.b16 %v1746_v9  ;;  %vm1100_vm9 = vcmp.eq.s32.totalorder %v806_v50, %v5190_v35  ;;  %v2151_v27 = vunpack.c.h.b16 %v1746_v9  ;;  %vm1101_vm14 = vcmp.eq.s32.totalorder %v806_v50, %v5194_v37  ;;  %v5826_v9 = vpop.permute.xlu2 %363 }
 0x1c8   :  { %v3928_v25 = vrot.slane %v3927_v39, 2  ;;  %v3794_v40 = vmax.f32 %v3481_v45, 0.0  ;;  %5020 = vset.pattern.permute.xlu0 %v5098_v1 }
 0x1c9   :  { %5019 = vset.pattern.permute.xlu2 %v5107_v6 }
 0x1ca   :  { %v3929_v44 = vmax.f32 %v3927_v39, %v3928_v25 }
 0x1cc   :  { %v3930_v61 = vrot.slane %v3929_v44, 1  ;;  %v2592_v2 = vpop.f32.mrf.mxu0  ;;  %v2921_v63 = vpop.f32.mrf.mxu1  ;;  %5018 = vset.pattern.permute.xlu1 %v5098_v1 }
 0x1cd   :  { %v2922_v5 = vadd.f32 %v2921_v63, %v2592_v2  ;;  %v3482_v16 = vpop.f32.mrf.mxu2  ;;  %v4764_v2 = vsel %vm1099_vm8, 1.0, %v6741_v41  ;;  %v4765_v63 = vsel %vm1100_vm9, 1.0, %v6741_v41 }
 0x1ce   :  { %v3931_v12 = vmax.f32 %v3929_v44, %v3930_v61  ;;  %v3483_v60 = vadd.f32 %v5708_v34, %v3482_v16  ;;  %v793_v28 = vpop.permute.xlu1 %792  ;;  %v4763_v61 = vsel %vm1098_vm7, 1.0, %v6741_v41  ;;  %v4611_v16 = vsel %vm946_vm11, 1.0, %v6741_v41 }
 0x1cf   :  { %v3195_v8 = vpack.c.bf16 %v2922_v5, %v2920_v7  ;;  %vm1096_vm4 = vcmp.eq.s32.totalorder %v793_v28, %v5190_v35  ;;  %vm1097_vm5 = vcmp.eq.s32.totalorder %v793_v28, %v5194_v37  ;;  %v4766_v7 = vsel %vm1101_vm14, 1.0, %v6741_v41 }
 0x1d0   :  { %v5784_v15 = vsel %vm4430_vm3, %v3931_v12, %v3924_v22  ;;  %v3795_v29 = vmax.f32 %v3483_v60, 0.0  ;;  %v4761_v21 = vsel %vm1096_vm4, 1.0, %v6741_v41  ;;  %v4762_v43 = vsel %vm1097_vm5, 1.0, %v6741_v41 }
 0x1d1   :  { %4866 = vmatmul.msk.bf16.gmra.mxu2 %vm3268_vm12, %v3195_v8  ;;  %v1747_v49 = vpack.c.bf16 %v4762_v43, %v4761_v21  ;;  %v4612_v12 = vsel %vm947_vm13, 1.0, %v6741_v41  ;;  %v1748_v28 = vpack.c.bf16 %v4764_v2, %v4763_v61  ;;  %vm953_vm4 = vcmp.eq.s32.totalorder %v5753_v57, %v5194_v37 }
 0x1d2   :  { %v3932_v53 = vmax.f32 %v3794_v40, %v3795_v29  ;;  %v5796_v58 = vpop.f32.mrf.mxu3  ;;  %v1749_v40 = vpack.c.bf16 %v4766_v7, %v4765_v63  ;;  %v1672_v50 = vpack.c.bf16 %v4612_v12, %v4611_v16  ;;  %v819_v16 = vpop.permute.xlu2 %818  ;;  %v430_v12 = vperm.slane %v5557_v18, 7 }
 0x1d3   :  { %v2152_v55 = vunpack.c.l.b16 %v1747_v49  ;;  %v2153_v44 = vunpack.c.h.b16 %v1747_v49  ;;  %v2155_v49 = vunpack.c.h.b16 %v1748_v28  ;;  %v2154_v63 = vunpack.c.l.b16 %v1748_v28 }
 0x1d4   :  { %v3933_v30 = vrot.slane %v3932_v53, 4  ;;  %v2595_v39 = vpop.f32.mrf.mxu0  ;;  %v2924_v25 = vpop.f32.mrf.mxu1  ;;  %v2156_v7 = vunpack.c.l.b16 %v1749_v40  ;;  %435 = vperm.xlu1 %5018, %v430_v12   ;;  %441 = vperm.xlu2 %5019, %v430_v12   ;;  %vm1104_vm5 = vcmp.eq.s32.totalorder %v819_v16, %v5190_v35  ;;  %v4618_v57 = vsel %vm953_vm4, 1.0, %v6741_v41 }
 0x1d5   :  { %v3485_v0 = vpop.f32.mrf.mxu2  ;;  %v2290_v45 = vpack.c.b16 %v2152_v55, %v2150_v48  ;;  %v5828_v22 = vpack.c.b16 %v2153_v44, %v2151_v27  ;;  %v2157_v48 = vunpack.c.h.b16 %v1749_v40  ;;  %vm4434_vm7 = vcmask 1043459  }
 0x1d6   :  { %v3934_v47 = vmax.f32 %v3932_v53, %v3933_v30  ;;  %v3486_v8 = vadd.f32 %v5708_v34, %v3485_v0  ;;  %v5835_v38 = vpop.permute.xlu1 %350  ;;  %v2925_v53 = vadd.f32 %v2924_v25, %v2595_v39  ;;  %v2002_v25 = vunpack.c.l.b16 %v1672_v50 }
 0x1d7   :  { %2634 = vmatmul.bf16.gmra.mxu0 %v5651_v26  ;;  %2963 = vmatmul.bf16.gmra.mxu1 %v5653_v14  ;;  %v4613_v26 = vsel %vm948_vm6, 1.0, %v6741_v41  ;;  %v4614_v14 = vsel %vm949_vm10, 1.0, %v6741_v41  ;;  %v5838_v27 = vpack.c.b16 %v2157_v48, %v2155_v49  ;;  %v2292_v40 = vpack.c.b16 %v2156_v7, %v2154_v63 }
 0x1d8   :  { %v3935_v5 = vrot.slane %v3934_v47, 2  ;;  %2824 = vmatmul.bf16.gmra.mxu3 %v2290_v45  ;;  %v1673_v54 = vpack.c.bf16 %v4614_v14, %v4613_v26  ;;  %v3796_v45 = vmax.f32 %v3486_v8, 0.0  ;;  %v2003_v26 = vunpack.c.h.b16 %v1672_v50 }
 0x1d9   :  { %vm1105_vm6 = vcmp.eq.s32.totalorder %v819_v16, %v5194_v37  ;;  %v4617_v50 = vsel %vm952_vm2, 1.0, %v6741_v41  ;;  %vm956_vm10 = vcmp.eq.s32.totalorder %v5762_v24, %v5190_v35  ;;  %vm957_vm11 = vcmp.eq.s32.totalorder %v5762_v24, %v5194_v37 }
 0x1da   :  { %v3936_v60 = vmax.f32 %v3934_v47, %v3935_v5  ;;  %v5840_v47 = vpop.f32.mrf.mxu3  ;;  %v2004_v5 = vunpack.c.l.b16 %v1673_v54  ;;  %v2005_v39 = vunpack.c.h.b16 %v1673_v54  ;;  %vm954_vm13 = vcmp.eq.s32.totalorder %v5767_v32, %v5190_v35 }
 0x1db   :  { %vm955_vm14 = vcmp.eq.s32.totalorder %v5767_v32, %v5194_v37  ;;  %vm958_vm2 = vcmp.eq.s32.totalorder %v5771_v42, %v5190_v35  ;;  %vm959_vm4 = vcmp.eq.s32.totalorder %v5771_v42, %v5194_v37 }
 0x1dc   :  { %v3937_v29 = vrot.slane %v3936_v60, 1  ;;  %v2597_v21 = vpop.f32.mrf.mxu0  ;;  %v2926_v43 = vpop.f32.mrf.mxu1  ;;  %v2216_v54 = vpack.c.b16 %v2004_v5, %v2002_v25 }
 0x1dd   :  { %v2927_v55 = vadd.f32 %v2926_v43, %v2597_v21  ;;  %v3487_v30 = vpop.f32.mrf.mxu2  ;;  %v4616_v43 = vsel %vm951_vm1, 1.0, %v6741_v41 }
 0x1de   :  { %v3938_v20 = vmax.f32 %v3936_v60, %v3937_v29  ;;  %v3488_v44 = vadd.f32 %v5708_v34, %v3487_v30  ;;  %v2217_v29 = vpack.c.b16 %v2005_v39, %v2003_v26  ;;  %v4769_v30 = vsel %vm1104_vm5, 1.0, %v6741_v41 }
 0x1df   :  { %v3196_v0 = vpack.c.bf16 %v2927_v55, %v2925_v53  ;;  %v1674_v53 = vpack.c.bf16 %v4616_v43, %v4615_v52  ;;  %vm960_vm5 = vcmp.eq.s32.totalorder %v5835_v38, %v5190_v35 }
 0x1e0   :  { %v5844_v61 = vsel %vm4432_vm15, %v3938_v20, %v5784_v15  ;;  %v3797_v2 = vmax.f32 %v3488_v44, 0.0  ;;  %v4770_v20 = vsel %vm1105_vm6, 1.0, %v6741_v41  ;;  %v5873_v44 = vld [vmem:[%s6736_s0 + $0x20] sm:$0xff]  ;;  %vm961_vm6 = vcmp.eq.s32.totalorder %v5835_v38, %v5194_v37 }
 0x1e1   :  { %4867 = vmatmul.msk.bf16.gmra.mxu2 %vm3268_vm12, %v3196_v0  ;;  %v1675_v0 = vpack.c.bf16 %v4618_v57, %v4617_v50  ;;  %v1751_v26 = vpack.c.bf16 %v4770_v20, %v4769_v30 }
 0x1e2   :  { %v3939_v14 = vmax.f32 %v3796_v45, %v3797_v2  ;;  %v5862_v49 = vpop.f32.mrf.mxu3  ;;  %v443_v45 = vperm.slane %v5873_v44, 0 }
 0x1e3   :  { %6743 = vst [vmem:[#allocation5_spill] sm:$0xff] %v5862_v49  ;;  %v2160_v52 = vunpack.c.l.b16 %v1751_v26  ;;  %v2161_v43 = vunpack.c.h.b16 %v1751_v26  ;;  %v4620_v26 = vsel %vm955_vm14, 1.0, %v6741_v41  ;;  %vm965_vm14 = vcmp.eq.s32.totalorder %v5826_v9, %v5194_v37 }
 0x1e4   :  { %v3940_v15 = vrot.slane %v3939_v14, 4  ;;  %v2600_v60 = vpop.f32.mrf.mxu0  ;;  %v2929_v28 = vpop.f32.mrf.mxu1  ;;  %448 = vperm.xlu1 %5018, %v443_v45   ;;  %454 = vperm.xlu2 %5019, %v443_v45  }
 0x1e5   :  { %v5852_v8 = vpop.f32.mrf.mxu2  ;;  %v2930_v5 = vadd.f32 %v2929_v28, %v2600_v60 }
 0x1e6   :  { %v3941_v18 = vmax.f32 %v3939_v14, %v3940_v15  ;;  %v5858_v21 = vpop.permute.xlu1 %357  ;;  %v2006_v14 = vunpack.c.l.b16 %v1674_v53  ;;  %v2007_v15 = vunpack.c.h.b16 %v1674_v53  ;;  %v3491_v38 = vadd.f32 %v5708_v34, %v5852_v8 }
 0x1e7   :  { %2639 = vmatmul.bf16.gmra.mxu0 %v2216_v54  ;;  %2968 = vmatmul.bf16.gmra.mxu1 %v2217_v29  ;;  %v2008_v54 = vunpack.c.l.b16 %v1675_v0 }
 0x1e8   :  { %v3942_v48 = vrot.slane %v3941_v18, 2  ;;  %2829 = vmatmul.bf16.gmra.mxu3 %v2292_v40 }
 0x1e9   :  { %v2218_v20 = vpack.c.b16 %v2008_v54, %v2006_v14 }
 0x1ea   :  { %v3943_v55 = vmax.f32 %v3941_v18, %v3942_v48  ;;  %v2009_v18 = vunpack.c.h.b16 %v1675_v0  ;;  %v5887_v50 = vpop.f32.mrf.mxu3 }
 0x1eb   :  { %6744 = vst [vmem:[#allocation6_spill] sm:$0xff] %v5887_v50 }
 0x1ec   :  { %v3944_v2 = vrot.slane %v3943_v55, 1  ;;  %v2602_v63 = vpop.f32.mrf.mxu0  ;;  %v2931_v7 = vpop.f32.mrf.mxu1  ;;  %5021 = vset.pattern.permute.xlu1 %v5107_v6  ;;  %5022 = vset.pattern.permute.xlu2 %v5098_v1 }
 0x1ed   :  { %v2932_v39 = vadd.f32 %v2931_v7, %v2602_v63  ;;  %v5876_v25 = vpop.f32.mrf.mxu2  ;;  %v826_v63 = vpop.permute.xlu2 %825  ;;  %v4621_v7 = vsel %vm956_vm10, 1.0, %v6741_v41 }
 0x1ee   :  { %v3945_v16 = vmax.f32 %v3943_v55, %v3944_v2  ;;  %v813_v12 = vpop.permute.xlu1 %812  ;;  %vm1106_vm0 = vcmp.eq.s32.totalorder %v826_v63, %v5190_v35  ;;  %vm1107_vm1 = vcmp.eq.s32.totalorder %v826_v63, %v5194_v37 }
 0x1ef   :  { %v3197_v40 = vpack.c.bf16 %v2932_v39, %v2930_v5  ;;  %vm1102_vm8 = vcmp.eq.s32.totalorder %v813_v12, %v5190_v35  ;;  %vm1103_vm9 = vcmp.eq.s32.totalorder %v813_v12, %v5194_v37  ;;  %v4622_v5 = vsel %vm957_vm11, 1.0, %v6741_v41 }
 0x1f0   :  { %v5882_v29 = vsel %vm4434_vm7, %v3945_v16, %v5844_v61  ;;  %v4767_v60 = vsel %vm1102_vm8, 1.0, %v6741_v41  ;;  %v4768_v28 = vsel %vm1103_vm9, 1.0, %v6741_v41  ;;  %v2219_v61 = vpack.c.b16 %v2009_v18, %v2007_v15 }
 0x1f1   :  { %4868 = vmatmul.msk.bf16.gmra.mxu2 %vm3268_vm12, %v3197_v40  ;;  %v1750_v48 = vpack.c.bf16 %v4768_v28, %v4767_v60  ;;  %v4619_v39 = vsel %vm954_vm13, 1.0, %v6741_v41  ;;  %v1677_v24 = vpack.c.bf16 %v4622_v5, %v4621_v7  ;;  %vm964_vm13 = vcmp.eq.s32.totalorder %v5826_v9, %v5190_v35 }
 0x1f2   :  { %v1676_v15 = vpack.c.bf16 %v4620_v26, %v4619_v39  ;;  %v3493_v26 = vadd.f32 %v5708_v34, %v5876_v25 }
 0x1f3   :  { %v2158_v57 = vunpack.c.l.b16 %v1750_v48  ;;  %v2159_v53 = vunpack.c.h.b16 %v1750_v48  ;;  %v2012_v18 = vunpack.c.l.b16 %v1677_v24 }
 0x1f4   :  { %v2605_v55 = vpop.f32.mrf.mxu0  ;;  %v2934_v30 = vpop.f32.mrf.mxu1  ;;  %v2011_v48 = vunpack.c.h.b16 %v1676_v15 }
 0x1f5   :  { %v5889_v45 = vpop.f32.mrf.mxu2  ;;  %v2294_v2 = vpack.c.b16 %v2160_v52, %v2158_v57  ;;  %v5893_v0 = vpack.c.b16 %v2161_v43, %v2159_v53  ;;  %v2935_v40 = vadd.f32 %v2934_v30, %v2605_v55  ;;  %v2013_v52 = vunpack.c.h.b16 %v1677_v24  ;;  %v5918_v57 = vpop.permute.xlu2 %383 }
 0x1f6   :  { %v2010_v43 = vunpack.c.l.b16 %v1676_v15  ;;  %v4771_v53 = vsel %vm1106_vm0, 1.0, %v6741_v41  ;;  %v4772_v55 = vsel %vm1107_vm1, 1.0, %v6741_v41  ;;  %v4623_v30 = vsel %vm958_vm2, 1.0, %v6741_v41 }
 0x1f7   :  { %6745 = vst [vmem:[#allocation7_spill] sm:$0xff] %v5893_v0  ;;  %2644 = vmatmul.bf16.gmra.mxu0 %v2218_v20  ;;  %2973 = vmatmul.bf16.gmra.mxu1 %v2219_v61  ;;  %v4624_v20 = vsel %vm959_vm4, 1.0, %v6741_v41  ;;  %v2221_v7 = vpack.c.b16 %v2013_v52, %v2011_v48  ;;  %v1752_v5 = vpack.c.bf16 %v4772_v55, %v4771_v53  ;;  %v4626_v15 = vsel %vm961_vm6, 1.0, %v6741_v41 }
 0x1f8   :  { %2834 = vmatmul.bf16.gmra.mxu3 %v2294_v2  ;;  %v2220_v63 = vpack.c.b16 %v2012_v18, %v2010_v43  ;;  %v456_v52 = vperm.slane %v5873_v44, 1  ;;  %v3799_v43 = vmax.f32 %v3493_v26, 0.0  ;;  %v3496_v48 = vadd.f32 %v5708_v34, %v5889_v45 }
 0x1f9   :  { %v2163_v55 = vunpack.c.h.b16 %v1752_v5  ;;  %vm962_vm0 = vcmp.eq.s32.totalorder %v5858_v21, %v5190_v35  ;;  %vm963_vm1 = vcmp.eq.s32.totalorder %v5858_v21, %v5194_v37 }
 0x1fa   :  { %467 = vperm.xlu1 %5021, %v456_v52   ;;  %461 = vperm.xlu0 %5020, %v456_v52   ;;  %v5951_v52 = vpop.permute.xlu0 %370 }
 0x1fb   :  { %v5907_v14 = vpop.f32.mrf.mxu3 }
 0x1fc   :  { %6746 = vst [vmem:[#allocation8_spill] sm:$0xff] %v5907_v14  ;;  %v2607_v16 = vpop.f32.mrf.mxu0  ;;  %v2936_v12 = vpop.f32.mrf.mxu1 }
 0x1fd   :  { %v2937_v32 = vadd.f32 %v2936_v12, %v2607_v16  ;;  %v3497_v54 = vpop.f32.mrf.mxu2  ;;  %v5932_v16 = vpack.c.bf16 %v4624_v20, %v4623_v30  ;;  %v4625_v12 = vsel %vm960_vm5, 1.0, %v6741_v41  ;;  %v845_v20 = vpop.permute.xlu2 %844 }
 0x1fe   :  { %v5909_v60 = vpop.permute.xlu1 %376  ;;  %vm1112_vm10 = vcmp.eq.s32.totalorder %v845_v20, %v5190_v35  ;;  %vm1113_vm11 = vcmp.eq.s32.totalorder %v845_v20, %v5194_v37 }
 0x1ff   :  { %v3198_v28 = vpack.c.bf16 %v2937_v32, %v2935_v40  ;;  %v3498_v32 = vadd.f32 %v5708_v34, %v3497_v54  ;;  %v2014_v53 = vunpack.c.l.b16 %v5932_v16  ;;  %vm968_vm5 = vcmp.eq.s32.totalorder %v5909_v60, %v5190_v35 }
 0x200   :  { %vm969_vm6 = vcmp.eq.s32.totalorder %v5909_v60, %v5194_v37 }
 0x201   :  { %4869 = vmatmul.msk.bf16.gmra.mxu2 %vm3268_vm12, %v3198_v28  ;;  %v2162_v28 = vunpack.c.l.b16 %v1752_v5  ;;  %v3801_v26 = vmax.f32 %v3498_v32, 0.0  ;;  %v2015_v5 = vunpack.c.h.b16 %v5932_v16 }
 0x202   :  { %5023 = vset.pattern.permute.xlu0 %v5107_v6  ;;  %v5978_v21 = vpop.permute.xlu0 %389 }
 0x203   :  { %v5928_v39 = vpop.f32.mrf.mxu3 }
 0x204   :  { %v2610_v61 = vpop.f32.mrf.mxu0  ;;  %v2939_v2 = vpop.f32.mrf.mxu1  ;;  %6747 = vst [vmem:[#allocation9_spill] sm:$0xff] %v5928_v39 }
 0x205   :  { %v3500_v42 = vpop.f32.mrf.mxu2 }
 0x206   :  { %v832_v24 = vpop.permute.xlu1 %831  ;;  %v3501_v54 = vadd.f32 %v5708_v34, %v3500_v42 }
 0x207   :  { %2649 = vmatmul.bf16.gmra.mxu0 %v2220_v63  ;;  %2978 = vmatmul.bf16.gmra.mxu1 %v2221_v7  ;;  %vm1108_vm8 = vcmp.eq.s32.totalorder %v832_v24, %v5190_v35  ;;  %vm1109_vm9 = vcmp.eq.s32.totalorder %v832_v24, %v5194_v37  ;;  %v3798_v63 = vmax.f32 %v3491_v38, 0.0  ;;  %v1679_v7 = vpack.c.bf16 %v4626_v15, %v4625_v12 }
 0x208   :  { %v4773_v40 = vsel %vm1108_vm8, 1.0, %v6741_v41  ;;  %v4774_v25 = vsel %vm1109_vm9, 1.0, %v6741_v41  ;;  %v2940_v41 = vadd.f32 %v2939_v2, %v2610_v61  ;;  %v3802_v16 = vmax.f32 %v3501_v54, 0.0 }
 0x209   :  { %v1753_v18 = vpack.c.bf16 %v4774_v25, %v4773_v40  ;;  %v469_v25 = vperm.slane %v5873_v44, 2  ;;  %v3946_v50 = vmax.f32 %v3798_v63, %v3799_v43  ;;  %v2016_v2 = vunpack.c.l.b16 %v1679_v7 }
 0x20a   :  { %v2017_v38 = vunpack.c.h.b16 %v1679_v7  ;;  %v6750_v43 = vmov 0.0   ;;  %vm966_vm8 = vcmp.eq.s32.totalorder %v5951_v52, %v5190_v35  ;;  %vm967_vm9 = vcmp.eq.s32.totalorder %v5951_v52, %v5194_v37 }
 0x20b   :  { %v2164_v8 = vunpack.c.l.b16 %v1753_v18  ;;  %v2165_v30 = vunpack.c.h.b16 %v1753_v18  ;;  %v3800_v18 = vmax.f32 %v3496_v48, 0.0  ;;  %474 = vperm.xlu2 %5022, %v469_v25   ;;  %v5953_v42 = vpop.f32.mrf.mxu3  ;;  %v4777_v48 = vsel %vm1112_vm10, 1.0, %v6750_v43  ;;  %480 = vperm.xlu1 %5021, %v469_v25  }
 0x20c   :  { %v2612_v24 = vpop.f32.mrf.mxu0  ;;  %v2941_v40 = vpop.f32.mrf.mxu1  ;;  %6748 = vst [vmem:[#allocation10_spill] sm:$0xff] %v5953_v42  ;;  %v4630_v9 = vsel %vm965_vm14, 1.0, %v6750_v43  ;;  %vm4438_vm14 = vcmask 1045509   ;;  %v4634_v52 = vsel %vm969_vm6, 1.0, %v6750_v43  ;;  %vm971_vm6 = vcmp.eq.s32.totalorder %v5918_v57, %v5194_v37 }
 0x20d   :  { %v2942_v39 = vadd.f32 %v2941_v40, %v2612_v24  ;;  %v3502_v45 = vpop.f32.mrf.mxu2  ;;  %v2296_v14 = vpack.c.b16 %v2164_v8, %v2162_v28  ;;  %v5957_v61 = vpack.c.b16 %v2165_v30, %v2163_v55  ;;  %v3953_v32 = vmax.f32 %v3800_v18, %v3801_v26 }
 0x20e   :  { %v3503_v49 = vadd.f32 %v5708_v34, %v3502_v45  ;;  %v2222_v8 = vpack.c.b16 %v2016_v2, %v2014_v53  ;;  %v2223_v30 = vpack.c.b16 %v2017_v38, %v2015_v5  ;;  %v4629_v40 = vsel %vm964_vm13, 1.0, %v6750_v43 }
 0x20f   :  { %v3199_v12 = vpack.c.bf16 %v2942_v39, %v2940_v41  ;;  %2839 = vmatmul.bf16.gmra.mxu3 %v2296_v14  ;;  %6749 = vst [vmem:[#allocation11_spill] sm:$0xff] %v5957_v61  ;;  %v4778_v41 = vsel %vm1113_vm11, 1.0, %v6750_v43  ;;  %v3947_v14 = vrot.slane %v3946_v50, 4  ;;  %v4627_v53 = vsel %vm962_vm0, 1.0, %v6750_v43 }
 0x210   :  { %v3803_v15 = vmax.f32 %v3503_v49, 0.0  ;;  %v3954_v49 = vrot.slane %v3953_v32, 4  ;;  %v1755_v63 = vpack.c.bf16 %v4778_v41, %v4777_v48  ;;  %v482_v41 = vperm.slane %v5873_v44, 3 }
 0x211   :  { %4870 = vmatmul.msk.bf16.gmra.mxu2 %vm3268_vm12, %v3199_v12  ;;  %v3948_v24 = vmax.f32 %v3946_v50, %v3947_v14  ;;  %v4628_v50 = vsel %vm963_vm1, 1.0, %v6750_v43  ;;  %v1681_v14 = vpack.c.bf16 %v4630_v9, %v4629_v40  ;;  %vm4436_vm13 = vcmask 1044484  }
 0x212   :  { %v3960_v28 = vmax.f32 %v3802_v16, %v3803_v15  ;;  %v3955_v45 = vmax.f32 %v3953_v32, %v3954_v49  ;;  %v2168_v5 = vunpack.c.l.b16 %v1755_v63  ;;  %v2169_v38 = vunpack.c.h.b16 %v1755_v63  ;;  %493 = vperm.xlu0 %5023, %v482_v41  }
 0x213   :  { %v5981_v12 = vpop.f32.mrf.mxu3  ;;  %v3949_v16 = vrot.slane %v3948_v24, 2  ;;  %5024 = vset.pattern.permute.xlu1 %v5098_v1  ;;  %487 = vperm.xlu2 %5022, %v482_v41   ;;  %v2020_v40 = vunpack.c.l.b16 %v1681_v14  ;;  %vm4440_vm0 = vcmask 1046534   ;;  %vm4442_vm1 = vcmask 1047559  }
 0x214   :  { %v2615_v39 = vpop.f32.mrf.mxu0  ;;  %v2944_v55 = vpop.f32.mrf.mxu1  ;;  %v3961_v7 = vrot.slane %v3960_v28, 4  ;;  %6751 = vst [vmem:[#allocation12_spill] sm:$0xff] %v5981_v12  ;;  %v3956_v32 = vrot.slane %v3955_v45, 2 }
 0x215   :  { %v3505_v20 = vpop.f32.mrf.mxu2  ;;  %v2945_v49 = vadd.f32 %v2944_v55, %v2615_v39 }
 0x216   :  { %v839_v54 = vpop.permute.xlu1 %838  ;;  %v3962_v2 = vmax.f32 %v3960_v28, %v3961_v7  ;;  %v3957_v39 = vmax.f32 %v3955_v45, %v3956_v32 }
 0x217   :  { %2654 = vmatmul.bf16.gmra.mxu0 %v2222_v8  ;;  %2983 = vmatmul.bf16.gmra.mxu1 %v2223_v30  ;;  %vm1110_vm2 = vcmp.eq.s32.totalorder %v839_v54, %v5190_v35  ;;  %vm1111_vm4 = vcmp.eq.s32.totalorder %v839_v54, %v5194_v37  ;;  %v1680_v8 = vpack.c.bf16 %v4628_v50, %v4627_v53  ;;  %v2021_v50 = vunpack.c.h.b16 %v1681_v14 }
 0x218   :  { %v4775_v25 = vsel %vm1110_vm2, 1.0, %v6750_v43  ;;  %v4776_v26 = vsel %vm1111_vm4, 1.0, %v6750_v43  ;;  %v3506_v30 = vadd.f32 %v5708_v34, %v3505_v20  ;;  %v3963_v28 = vrot.slane %v3962_v2, 2 }
 0x219   :  { %v1754_v18 = vpack.c.bf16 %v4776_v26, %v4775_v25  ;;  %v2018_v9 = vunpack.c.l.b16 %v1680_v8  ;;  %v2019_v0 = vunpack.c.h.b16 %v1680_v8 }
 0x21a   :  { %v3804_v20 = vmax.f32 %v3506_v30, 0.0  ;;  %5026 = vset.pattern.permute.xlu0 %v5098_v1 }
 0x21b   :  { %v2166_v15 = vunpack.c.l.b16 %v1754_v18  ;;  %v2167_v48 = vunpack.c.h.b16 %v1754_v18  ;;  %v3950_v18 = vmax.f32 %v3948_v24, %v3949_v16  ;;  %v2225_v45 = vpack.c.b16 %v2021_v50, %v2019_v0  ;;  %5025 = vset.pattern.permute.xlu2 %v5107_v6 }
 0x21c   :  { %v2617_v54 = vpop.f32.mrf.mxu0  ;;  %v2946_v42 = vpop.f32.mrf.mxu1  ;;  %v4633_v0 = vsel %vm968_vm5, 1.0, %v6750_v43  ;;  %vm970_vm5 = vcmp.eq.s32.totalorder %v5918_v57, %v5190_v35 }
 0x21d   :  { %v2947_v25 = vadd.f32 %v2946_v42, %v2617_v54  ;;  %v3507_v26 = vpop.f32.mrf.mxu2  ;;  %v2298_v12 = vpack.c.b16 %v2168_v5, %v2166_v15  ;;  %v5987_v7 = vpack.c.b16 %v2169_v38, %v2167_v48  ;;  %v3964_v42 = vmax.f32 %v3962_v2, %v3963_v28  ;;  %v852_v5 = vpop.permute.xlu0 %851 }
 0x21e   :  { %v3508_v63 = vadd.f32 %v5708_v34, %v3507_v26  ;;  %v3951_v15 = vrot.slane %v3950_v18, 1  ;;  %v5990_v41 = vpop.permute.xlu1 %396  ;;  %v5992_v38 = vpop.f32.mrf.mxu3  ;;  %v2224_v48 = vpack.c.b16 %v2020_v40, %v2018_v9  ;;  %v3958_v54 = vrot.slane %v3957_v39, 1 }
 0x21f   :  { %v3200_v61 = vpack.c.bf16 %v2947_v25, %v2945_v49  ;;  %2844 = vmatmul.bf16.gmra.mxu3 %v2298_v12  ;;  %v3965_v2 = vrot.slane %v3964_v42, 1  ;;  %vm1114_vm10 = vcmp.eq.s32.totalorder %v852_v5, %v5190_v35  ;;  %vm1115_vm11 = vcmp.eq.s32.totalorder %v852_v5, %v5194_v37 }
 0x220   :  { %v3805_v53 = vmax.f32 %v3508_v63, 0.0  ;;  %v3952_v8 = vmax.f32 %v3950_v18, %v3951_v15  ;;  %v3959_v32 = vmax.f32 %v3957_v39, %v3958_v54  ;;  %v4631_v49 = vsel %vm966_vm8, 1.0, %v6750_v43 }
 0x221   :  { %4871 = vmatmul.msk.bf16.gmra.mxu2 %vm3268_vm12, %v3200_v61  ;;  %v4632_v25 = vsel %vm967_vm9, 1.0, %v6750_v43  ;;  %v3966_v26 = vmax.f32 %v3964_v42, %v3965_v2  ;;  %v4779_v63 = vsel %vm1114_vm10, 1.0, %v6750_v43  ;;  %v4780_v18 = vsel %vm1115_vm11, 1.0, %v6750_v43 }
 0x222   :  { %v3967_v55 = vmax.f32 %v3804_v20, %v3805_v53  ;;  %v4437_v40 = vsel %vm4436_vm13, %v3952_v8, %v5882_v29  ;;  %v1683_v20 = vpack.c.bf16 %v4634_v52, %v4633_v0  ;;  %v1682_v60 = vpack.c.bf16 %v4632_v25, %v4631_v49 }
 0x223   :  { %vm972_vm8 = vcmp.eq.s32.totalorder %v5978_v21, %v5190_v35  ;;  %vm973_vm9 = vcmp.eq.s32.totalorder %v5978_v21, %v5194_v37 }
 0x224   :  { %v3968_v24 = vrot.slane %v3967_v55, 4  ;;  %v2620_v16 = vpop.f32.mrf.mxu0  ;;  %v2949_v12 = vpop.f32.mrf.mxu1  ;;  %v2025_v25 = vunpack.c.h.b16 %v1683_v20  ;;  %v4638_v57 = vsel %vm973_vm9, 1.0, %v6750_v43 }
 0x225   :  { %v3510_v61 = vpop.f32.mrf.mxu2  ;;  %v2950_v42 = vadd.f32 %v2949_v12, %v2620_v16 }
 0x226   :  { %v3969_v14 = vmax.f32 %v3967_v55, %v3968_v24  ;;  %v3511_v9 = vadd.f32 %v5708_v34, %v3510_v61  ;;  %v4439_v55 = vsel %vm4438_vm14, %v3959_v32, %v4437_v40  ;;  %v1756_v24 = vpack.c.bf16 %v4780_v18, %v4779_v63  ;;  %v6028_v34 = vld [vmem:[%s6739_s3] ss:$0 sm:$0xff] }
 0x227   :  { %2659 = vmatmul.bf16.gmra.mxu0 %v2224_v48  ;;  %2988 = vmatmul.bf16.gmra.mxu1 %v2225_v45  ;;  %v6022_v48 = vpop.f32.mrf.mxu3  ;;  %v4441_v54 = vsel %vm4440_vm0, %v3966_v26, %v4439_v55  ;;  %v2022_v32 = vunpack.c.l.b16 %v1682_v60  ;;  %v2023_v26 = vunpack.c.h.b16 %v1682_v60 }
 0x228   :  { %v3970_v30 = vrot.slane %v3969_v14, 2  ;;  %v3806_v2 = vmax.f32 %v3511_v9, 0.0  ;;  %v2170_v49 = vunpack.c.l.b16 %v1756_v24  ;;  %v2171_v63 = vunpack.c.h.b16 %v1756_v24 }
 0x229   :  { %v495_v9 = vperm.slane %v5873_v44, 4  ;;  %v4636_v24 = vsel %vm971_vm6, 1.0, %v6750_v43 }
 0x22a   :  { %v3971_v28 = vmax.f32 %v3969_v14, %v3970_v30  ;;  %v2024_v30 = vunpack.c.l.b16 %v1683_v20  ;;  %v2227_v20 = vpack.c.b16 %v2025_v25, %v2023_v26 }
 0x22b   :  { %500 = vperm.xlu1 %5024, %v495_v9   ;;  %506 = vperm.xlu2 %5025, %v495_v9  }
 0x22c   :  { %v3972_v53 = vrot.slane %v3971_v28, 1  ;;  %v2622_v50 = vpop.f32.mrf.mxu0  ;;  %v2951_v39 = vpop.f32.mrf.mxu1  ;;  %v2226_v55 = vpack.c.b16 %v2024_v30, %v2022_v32 }
 0x22d   :  { %v2952_v5 = vadd.f32 %v2951_v39, %v2622_v50  ;;  %v3512_v15 = vpop.f32.mrf.mxu2 }
 0x22e   :  { %v3973_v29 = vmax.f32 %v3971_v28, %v3972_v53  ;;  %v3513_v61 = vadd.f32 %v6028_v34, %v3512_v15  ;;  %v858_v45 = vpop.permute.xlu1 %857  ;;  %v4635_v15 = vsel %vm970_vm5, 1.0, %v6750_v43 }
 0x22f   :  { %v3201_v14 = vpack.c.bf16 %v2952_v5, %v2950_v42  ;;  %vm1116_vm2 = vcmp.eq.s32.totalorder %v858_v45, %v5190_v35  ;;  %vm1117_vm4 = vcmp.eq.s32.totalorder %v858_v45, %v5194_v37  ;;  %v1684_v45 = vpack.c.bf16 %v4636_v24, %v4635_v15 }
 0x230   :  { %v4443_v16 = vsel %vm4442_vm1, %v3973_v29, %v4441_v54  ;;  %v3807_v12 = vmax.f32 %v3513_v61, 0.0  ;;  %v4781_v8 = vsel %vm1116_vm2, 1.0, %v6750_v43  ;;  %v4782_v0 = vsel %vm1117_vm4, 1.0, %v6750_v43 }
 0x231   :  { %4501 = vst [vmem:[#allocation2] sm:$0xff] %v4443_v16  ;;  %v1757_v52 = vpack.c.bf16 %v4782_v0, %v4781_v8  ;;  %4872 = vmatmul.msk.bf16.gmra.mxu2 %vm3268_vm12, %v3201_v14  ;;  %v4637_v54 = vsel %vm972_vm8, 1.0, %v6750_v43  ;;  %v508_v61 = vperm.slane %v5873_v44, 5  ;;  %vm974_vm2 = vcmp.eq.s32.totalorder %v5990_v41, %v5190_v35 }
 0x232   :  { %v3974_v28 = vmax.f32 %v3806_v2, %v3807_v12  ;;  %v6038_v5 = vpop.f32.mrf.mxu3  ;;  %v1685_v21 = vpack.c.bf16 %v4638_v57, %v4637_v54  ;;  %vm975_vm4 = vcmp.eq.s32.totalorder %v5990_v41, %v5194_v37 }
 0x233   :  { %v2172_v18 = vunpack.c.l.b16 %v1757_v52  ;;  %v2173_v40 = vunpack.c.h.b16 %v1757_v52  ;;  %513 = vperm.xlu1 %5024, %v508_v61   ;;  %519 = vperm.xlu2 %5025, %v508_v61  }
 0x234   :  { %v2625_v53 = vpop.f32.mrf.mxu0  ;;  %v2954_v50 = vpop.f32.mrf.mxu1  ;;  %v3975_v29 = vrot.slane %v3974_v28, 4  ;;  %v2029_v9 = vunpack.c.h.b16 %v1685_v21 }
 0x235   :  { %v3515_v39 = vpop.f32.mrf.mxu2  ;;  %v2300_v42 = vpack.c.b16 %v2172_v18, %v2170_v49  ;;  %v6044_v60 = vpack.c.b16 %v2173_v40, %v2171_v63  ;;  %v2955_v12 = vadd.f32 %v2954_v50, %v2625_v53  ;;  %v2026_v63 = vunpack.c.l.b16 %v1684_v45  ;;  %v403_v50 = vpop.permute.xlu2 %402 }
 0x236   :  { %v3516_v2 = vadd.f32 %v6028_v34, %v3515_v39  ;;  %v3976_v30 = vmax.f32 %v3974_v28, %v3975_v29  ;;  %v2027_v18 = vunpack.c.h.b16 %v1684_v45  ;;  %v2028_v40 = vunpack.c.l.b16 %v1685_v21 }
 0x237   :  { %2664 = vmatmul.bf16.gmra.mxu0 %v2226_v55  ;;  %2849 = vmatmul.bf16.gmra.mxu3 %v2300_v42  ;;  %vm976_vm10 = vcmp.eq.s32.totalorder %v403_v50, %v5190_v35  ;;  %vm977_vm11 = vcmp.eq.s32.totalorder %v403_v50, %v5194_v37 }
 0x238   :  { %2993 = vmatmul.bf16.gmra.mxu1 %v2227_v20  ;;  %v3808_v25 = vmax.f32 %v3516_v2, 0.0  ;;  %v3977_v39 = vrot.slane %v3976_v30, 2  ;;  %v2228_v15 = vpack.c.b16 %v2028_v40, %v2026_v63  ;;  %v2229_v24 = vpack.c.b16 %v2029_v9, %v2027_v18 }
 0x239   :  { %v4641_v45 = vsel %vm976_vm10, 1.0, %v6750_v43  ;;  %v4642_v2 = vsel %vm977_vm11, 1.0, %v6750_v43 }
 0x23a   :  { %v6057_v49 = vpop.f32.mrf.mxu3  ;;  %v3978_v54 = vmax.f32 %v3976_v30, %v3977_v39 }
 0x23b   :  { %5027 = vset.pattern.permute.xlu1 %v5107_v6  ;;  %5028 = vset.pattern.permute.xlu2 %v5098_v1 }
 0x23c   :  { %v2627_v14 = vpop.f32.mrf.mxu0  ;;  %v2956_v16 = vpop.f32.mrf.mxu1  ;;  %v3979_v21 = vrot.slane %v3978_v54, 1 }
 0x23d   :  { %v2957_v8 = vadd.f32 %v2956_v16, %v2627_v14  ;;  %v3517_v0 = vpop.f32.mrf.mxu2  ;;  %v4639_v14 = vsel %vm974_vm2, 1.0, %v6750_v43  ;;  %v4640_v16 = vsel %vm975_vm4, 1.0, %v6750_v43 }
 0x23e   :  { %v3518_v32 = vadd.f32 %v6028_v34, %v3517_v0  ;;  %v3980_v63 = vmax.f32 %v3978_v54, %v3979_v21  ;;  %v521_v54 = vperm.slane %v5873_v44, 6 }
 0x23f   :  { %v3202_v52 = vpack.c.bf16 %v2957_v8, %v2955_v12 }
 0x240   :  { %v3809_v26 = vmax.f32 %v3518_v32, 0.0  ;;  %v1687_v32 = vpack.c.bf16 %v4642_v2, %v4641_v45  ;;  %526 = vperm.xlu0 %5026, %v521_v54  }
 0x241   :  { %4873 = vmatmul.msk.bf16.gmra.mxu2 %vm3268_vm12, %v3202_v52 }
 0x242   :  { %v3981_v53 = vmax.f32 %v3808_v25, %v3809_v26  ;;  %v6069_v29 = vpop.f32.mrf.mxu3 }
 0x243   :  { %532 = vperm.xlu1 %5027, %v521_v54  }
 0x244   :  { %v3982_v55 = vrot.slane %v3981_v53, 4  ;;  %v2630_v42 = vpop.f32.mrf.mxu0  ;;  %v2959_v20 = vpop.f32.mrf.mxu1 }
 0x245   :  { %v3520_v28 = vpop.f32.mrf.mxu2  ;;  %v2960_v52 = vadd.f32 %v2959_v20, %v2630_v42  ;;  %v410_v20 = vpop.permute.xlu2 %409 }
 0x246   :  { %v3983_v57 = vmax.f32 %v3981_v53, %v3982_v55  ;;  %v3521_v41 = vadd.f32 %v6028_v34, %v3520_v28  ;;  %vm978_vm5 = vcmp.eq.s32.totalorder %v410_v20, %v5190_v35  ;;  %vm979_vm6 = vcmp.eq.s32.totalorder %v410_v20, %v5194_v37 }
 0x247   :  { %2669 = vmatmul.bf16.gmra.mxu0 %v2228_v15  ;;  %3103 = vmatmul.bf16.vlgmr.msrb.gmra.mxu3 %v5439_v11  ;;  %v1686_v11 = vpack.c.bf16 %v4640_v16, %v4639_v14  ;;  %v2032_v15 = vunpack.c.l.b16 %v1687_v32 }
 0x248   :  { %v3984_v61 = vrot.slane %v3983_v57, 2  ;;  %2998 = vmatmul.bf16.gmra.mxu1 %v2229_v24  ;;  %v3810_v53 = vmax.f32 %v3521_v41, 0.0  ;;  %5029 = vset.pattern.permute.xlu0 %v5107_v6 }
 0x249   :  { %v2030_v55 = vunpack.c.l.b16 %v1686_v11  ;;  %v2031_v24 = vunpack.c.h.b16 %v1686_v11 }
 0x24a   :  { %v3985_v12 = vmax.f32 %v3983_v57, %v3984_v61  ;;  %v6079_v28 = vpop.f32.mrf.mxu3  ;;  %v2033_v57 = vunpack.c.h.b16 %v1687_v32  ;;  %v416_v61 = vpop.permute.xlu1 %415 }
 0x24b   :  { %v2230_v21 = vpack.c.b16 %v2032_v15, %v2030_v55  ;;  %vm980_vm8 = vcmp.eq.s32.totalorder %v416_v61, %v5190_v35  ;;  %vm981_vm9 = vcmp.eq.s32.totalorder %v416_v61, %v5194_v37 }
 0x24c   :  { %v3986_v8 = vrot.slane %v3985_v12, 1  ;;  %v2632_v0 = vpop.f32.mrf.mxu0  ;;  %v2961_v30 = vpop.f32.mrf.mxu1  ;;  %v4645_v32 = vsel %vm980_vm8, 1.0, %v6750_v43 }
 0x24d   :  { %v2962_v25 = vadd.f32 %v2961_v30, %v2632_v0  ;;  %v3522_v26 = vpop.f32.mrf.mxu2  ;;  %v4643_v0 = vsel %vm978_vm5, 1.0, %v6750_v43  ;;  %v4644_v30 = vsel %vm979_vm6, 1.0, %v6750_v43 }
 0x24e   :  { %v3987_v18 = vmax.f32 %v3985_v12, %v3986_v8  ;;  %v3523_v40 = vadd.f32 %v6028_v34, %v3522_v26  ;;  %v2231_v8 = vpack.c.b16 %v2033_v57, %v2031_v24  ;;  %v534_v26 = vperm.slane %v5873_v44, 7 }
 0x24f   :  { %v3203_v9 = vpack.c.bf16 %v2962_v25, %v2960_v52  ;;  %v4646_v52 = vsel %vm981_vm9, 1.0, %v6750_v43 }
 0x250   :  { %v4444_v39 = vsel %vm4430_vm3, %v3987_v18, %v3980_v63  ;;  %v3811_v50 = vmax.f32 %v3523_v40, 0.0  ;;  %v1688_v18 = vpack.c.bf16 %v4644_v30, %v4643_v0  ;;  %545 = vperm.xlu1 %5027, %v534_v26   ;;  %539 = vperm.xlu2 %5028, %v534_v26  }
 0x251   :  { %4874 = vmatmul.msk.bf16.gmra.mxu2 %vm3268_vm12, %v3203_v9 }
 0x252   :  { %v3988_v42 = vmax.f32 %v3810_v53, %v3811_v50  ;;  %v1689_v53 = vpack.c.bf16 %v4646_v52, %v4645_v32  ;;  %v2034_v54 = vunpack.c.l.b16 %v1688_v18 }
 0x254   :  { %v3989_v45 = vrot.slane %v3988_v42, 4  ;;  %v2635_v2 = vpop.f32.mrf.mxu0  ;;  %v2964_v14 = vpop.f32.mrf.mxu1 }
 0x255   :  { %v3525_v16 = vpop.f32.mrf.mxu2  ;;  %v2965_v50 = vadd.f32 %v2964_v14, %v2635_v2  ;;  %v423_v14 = vpop.permute.xlu2 %422 }
 0x256   :  { %v3990_v12 = vmax.f32 %v3988_v42, %v3989_v45  ;;  %v3526_v40 = vadd.f32 %v6028_v34, %v3525_v16  ;;  %v2035_v45 = vunpack.c.h.b16 %v1688_v18  ;;  %v2036_v16 = vunpack.c.l.b16 %v1689_v53 }
 0x257   :  { %2674 = vmatmul.bf16.gmra.mxu0 %v2230_v21  ;;  %3108 = vmatmul.bf16.gmra.mxu3 %v5462_v51  ;;  %v2037_v21 = vunpack.c.h.b16 %v1689_v53  ;;  %vm982_vm10 = vcmp.eq.s32.totalorder %v423_v14, %v5190_v35  ;;  %vm983_vm11 = vcmp.eq.s32.totalorder %v423_v14, %v5194_v37  ;;  %v6116_v53 = vld [vmem:[%s6736_s0 + $0x28] sm:$0xff] }
 0x258   :  { %v3991_v41 = vrot.slane %v3990_v12, 2  ;;  %3003 = vmatmul.bf16.gmra.mxu1 %v2231_v8  ;;  %v3812_v20 = vmax.f32 %v3526_v40, 0.0  ;;  %5030 = vset.pattern.permute.xlu1 %v5098_v1  ;;  %v4648_v18 = vsel %vm983_vm11, 1.0, %v6750_v43 }
 0x259   :  { %v2233_v32 = vpack.c.b16 %v2037_v21, %v2035_v45 }
 0x25a   :  { %v3992_v11 = vmax.f32 %v3990_v12, %v3991_v41  ;;  %v429_v12 = vpop.permute.xlu0 %428 }
 0x25b   :  { %v6091_v25 = vpop.f32.mrf.mxu3  ;;  %vm984_vm2 = vcmp.eq.s32.totalorder %v429_v12, %v5190_v35  ;;  %vm985_vm4 = vcmp.eq.s32.totalorder %v429_v12, %v5194_v37 }
 0x25c   :  { %v3993_v63 = vrot.slane %v3992_v11, 1  ;;  %v2637_v51 = vpop.f32.mrf.mxu0  ;;  %v2966_v9 = vpop.f32.mrf.mxu1  ;;  %v4649_v40 = vsel %vm984_vm2, 1.0, %v6750_v43 }
 0x25d   :  { %v2967_v55 = vadd.f32 %v2966_v9, %v2637_v51  ;;  %v3527_v15 = vpop.f32.mrf.mxu2  ;;  %v4650_v51 = vsel %vm985_vm4, 1.0, %v6750_v43 }
 0x25e   :  { %v3994_v24 = vmax.f32 %v3992_v11, %v3993_v63  ;;  %v3528_v57 = vadd.f32 %v6028_v34, %v3527_v15  ;;  %v4647_v63 = vsel %vm982_vm10, 1.0, %v6750_v43 }
 0x25f   :  { %v3204_v42 = vpack.c.bf16 %v2967_v55, %v2965_v50  ;;  %v1690_v15 = vpack.c.bf16 %v4648_v18, %v4647_v63 }
 0x260   :  { %v4445_v44 = vsel %vm4432_vm15, %v3994_v24, %v4444_v39  ;;  %v3813_v61 = vmax.f32 %v3528_v57, 0.0  ;;  %v2232_v39 = vpack.c.b16 %v2036_v16, %v2034_v54  ;;  %v1691_v24 = vpack.c.bf16 %v4650_v51, %v4649_v40 }
 0x261   :  { %4875 = vmatmul.msk.bf16.gmra.mxu2 %vm3268_vm12, %v3204_v42  ;;  %v2039_v12 = vunpack.c.h.b16 %v1690_v15 }
 0x262   :  { %v3995_v2 = vmax.f32 %v3812_v20, %v3813_v61  ;;  %v2040_v14 = vunpack.c.l.b16 %v1691_v24 }
 0x263   :  { %v6099_v8 = vpop.f32.mrf.mxu3 }
 0x264   :  { %v3996_v41 = vrot.slane %v3995_v2, 4  ;;  %v2640_v0 = vpop.f32.mrf.mxu0  ;;  %v2969_v30 = vpop.f32.mrf.mxu1 }
 0x265   :  { %v6102_v11 = vpop.f32.mrf.mxu2  ;;  %v2970_v20 = vadd.f32 %v2969_v30, %v2640_v0 }
 0x266   :  { %v3997_v52 = vmax.f32 %v3995_v2, %v3996_v41  ;;  %v2038_v2 = vunpack.c.l.b16 %v1690_v15  ;;  %v2041_v41 = vunpack.c.h.b16 %v1691_v24 }
 0x267   :  { %2679 = vmatmul.bf16.gmra.mxu0 %v2232_v39  ;;  %3113 = vmatmul.bf16.gmra.mxu3 %v5507_v13  ;;  %v547_v13 = vperm.slane %v6116_v53, 0  ;;  %v442_v39 = vpop.permute.xlu2 %441 }
 0x268   :  { %v3998_v26 = vrot.slane %v3997_v52, 2  ;;  %3008 = vmatmul.bf16.gmra.mxu1 %v2233_v32  ;;  %v436_v32 = vpop.permute.xlu1 %435  ;;  %vm988_vm5 = vcmp.eq.s32.totalorder %v442_v39, %v5190_v35  ;;  %vm989_vm6 = vcmp.eq.s32.totalorder %v442_v39, %v5194_v37 }
 0x269   :  { %558 = vperm.xlu0 %5029, %v547_v13   ;;  %552 = vperm.xlu2 %5028, %v547_v13   ;;  %vm986_vm8 = vcmp.eq.s32.totalorder %v436_v32, %v5190_v35  ;;  %vm987_vm9 = vcmp.eq.s32.totalorder %v436_v32, %v5194_v37  ;;  %v4653_v18 = vsel %vm988_vm5, 1.0, %v6750_v43  ;;  %v4654_v40 = vsel %vm989_vm6, 1.0, %v6750_v43 }
 0x26a   :  { %v3999_v9 = vmax.f32 %v3997_v52, %v3998_v26  ;;  %v2234_v26 = vpack.c.b16 %v2040_v14, %v2038_v2  ;;  %v4651_v51 = vsel %vm986_vm8, 1.0, %v6750_v43  ;;  %v1693_v13 = vpack.c.bf16 %v4654_v40, %v4653_v18 }
 0x26b   :  { %v6118_v50 = vpop.f32.mrf.mxu3  ;;  %v560_v32 = vperm.slane %v6116_v53, 1  ;;  %v3531_v40 = vadd.f32 %v6028_v34, %v6102_v11 }
 0x26c   :  { %v4000_v55 = vrot.slane %v3999_v9, 1  ;;  %v2642_v57 = vpop.f32.mrf.mxu0  ;;  %v2971_v42 = vpop.f32.mrf.mxu1  ;;  %v2045_v2 = vunpack.c.h.b16 %v1693_v13 }
 0x26d   :  { %v2972_v61 = vadd.f32 %v2971_v42, %v2642_v57  ;;  %v3532_v54 = vpop.f32.mrf.mxu2  ;;  %565 = vperm.xlu1 %5030, %v560_v32  }
 0x26e   :  { %v4001_v45 = vmax.f32 %v3999_v9, %v4000_v55  ;;  %v4652_v9 = vsel %vm987_vm9, 1.0, %v6750_v43 }
 0x26f   :  { %v3205_v16 = vpack.c.bf16 %v2972_v61, %v2970_v20  ;;  %v1692_v55 = vpack.c.bf16 %v4652_v9, %v4651_v51 }
 0x270   :  { %v6122_v21 = vsel %vm4434_vm7, %v4001_v45, %v4445_v44  ;;  %v2235_v44 = vpack.c.b16 %v2041_v41, %v2039_v12  ;;  %v2044_v45 = vunpack.c.l.b16 %v1693_v13  ;;  %v455_v12 = vpop.permute.xlu2 %454  ;;  %v449_v41 = vpop.permute.xlu1 %448 }
 0x271   :  { %4876 = vmatmul.msk.bf16.gmra.mxu2 %vm3268_vm12, %v3205_v16  ;;  %5031 = vset.pattern.permute.xlu2 %v5107_v6  ;;  %v2043_v14 = vunpack.c.h.b16 %v1692_v55  ;;  %vm992_vm10 = vcmp.eq.s32.totalorder %v455_v12, %v5190_v35  ;;  %vm993_vm11 = vcmp.eq.s32.totalorder %v455_v12, %v5194_v37  ;;  %vm990_vm2 = vcmp.eq.s32.totalorder %v449_v41, %v5190_v35 }
 0x272   :  { %5032 = vset.pattern.permute.xlu0 %v5098_v1  ;;  %vm991_vm4 = vcmp.eq.s32.totalorder %v449_v41, %v5194_v37  ;;  %v4657_v9 = vsel %vm992_vm10, 1.0, %v6750_v43  ;;  %v4658_v13 = vsel %vm993_vm11, 1.0, %v6750_v43 }
 0x273   :  { %v6125_v52 = vpop.f32.mrf.mxu3  ;;  %v2237_v18 = vpack.c.b16 %v2045_v2, %v2043_v14  ;;  %v1695_v11 = vpack.c.bf16 %v4658_v13, %v4657_v9 }
 0x274   :  { %v2645_v0 = vpop.f32.mrf.mxu0  ;;  %v2974_v30 = vpop.f32.mrf.mxu1 }
 0x275   :  { %v3535_v63 = vpop.f32.mrf.mxu2  ;;  %v2975_v57 = vadd.f32 %v2974_v30, %v2645_v0  ;;  %v3533_v30 = vadd.f32 %v6028_v34, %v3532_v54  ;;  %v4655_v54 = vsel %vm990_vm2, 1.0, %v6750_v43 }
 0x277   :  { %2684 = vmatmul.bf16.gmra.mxu0 %v2234_v26  ;;  %3118 = vmatmul.bf16.gmra.mxu3 %v5543_v10  ;;  %v2042_v10 = vunpack.c.l.b16 %v1692_v55  ;;  %v4656_v55 = vsel %vm991_vm4, 1.0, %v6750_v43 }
 0x278   :  { %3013 = vmatmul.bf16.gmra.mxu1 %v2235_v44 }
 0x279   :  { %v2236_v39 = vpack.c.b16 %v2044_v45, %v2042_v10  ;;  %571 = vperm.xlu2 %5031, %v560_v32   ;;  %v1694_v45 = vpack.c.bf16 %v4656_v55, %v4655_v54  ;;  %v462_v55 = vpop.permute.xlu0 %461 }
 0x27a   :  { %vm994_vm8 = vcmp.eq.s32.totalorder %v462_v55, %v5190_v35  ;;  %vm995_vm9 = vcmp.eq.s32.totalorder %v462_v55, %v5194_v37 }
 0x27b   :  { %v6138_v61 = vpop.f32.mrf.mxu3 }
 0x27c   :  { %v2647_v15 = vpop.f32.mrf.mxu0  ;;  %v2976_v24 = vpop.f32.mrf.mxu1  ;;  %6752 = vst [vmem:[#allocation13_spill] sm:$0xff] %v6138_v61 }
 0x27d   :  { %v2977_v42 = vadd.f32 %v2976_v24, %v2647_v15  ;;  %v3537_v20 = vpop.f32.mrf.mxu2  ;;  %v3815_v15 = vmax.f32 %v3533_v30, 0.0 }
 0x27e   :  { %v3538_v24 = vadd.f32 %v6028_v34, %v3537_v20 }
 0x27f   :  { %v3206_v16 = vpack.c.bf16 %v2977_v42, %v2975_v57  ;;  %v573_v57 = vperm.slane %v6116_v53, 2  ;;  %v3536_v42 = vadd.f32 %v6028_v34, %v3535_v63 }
 0x280   :  { %v3817_v32 = vmax.f32 %v3538_v24, 0.0 }
 0x281   :  { %4877 = vmatmul.msk.bf16.gmra.mxu2 %vm3268_vm12, %v3206_v16  ;;  %578 = vperm.xlu1 %5030, %v573_v57   ;;  %v3816_v30 = vmax.f32 %v3536_v42, 0.0 }
 0x282   :  { %584 = vperm.xlu2 %5031, %v573_v57  }
 0x283   :  { %v6150_v51 = vpop.f32.mrf.mxu3 }
 0x284   :  { %v2650_v26 = vpop.f32.mrf.mxu0  ;;  %v2979_v44 = vpop.f32.mrf.mxu1  ;;  %6753 = vst [vmem:[#allocation14_spill] sm:$0xff] %v6150_v51  ;;  %v2046_v51 = vunpack.c.l.b16 %v1694_v45 }
 0x285   :  { %v3540_v0 = vpop.f32.mrf.mxu2  ;;  %v2980_v2 = vadd.f32 %v2979_v44, %v2650_v26  ;;  %v4009_v26 = vmax.f32 %v3816_v30, %v3817_v32  ;;  %v2049_v44 = vunpack.c.h.b16 %v1695_v11 }
 0x286   :  { %v3541_v14 = vadd.f32 %v6028_v34, %v3540_v0  ;;  %v2047_v0 = vunpack.c.h.b16 %v1694_v45 }
 0x287   :  { %2689 = vmatmul.bf16.gmra.mxu0 %v2236_v39  ;;  %3123 = vmatmul.bf16.gmra.mxu3 %v5573_v36  ;;  %v3814_v36 = vmax.f32 %v3531_v40, 0.0  ;;  %v2048_v40 = vunpack.c.l.b16 %v1695_v11  ;;  %v4010_v45 = vrot.slane %v4009_v26, 4 }
 0x288   :  { %3018 = vmatmul.bf16.gmra.mxu1 %v2237_v18  ;;  %v3818_v9 = vmax.f32 %v3541_v14, 0.0 }
 0x289   :  { %v4002_v39 = vmax.f32 %v3814_v36, %v3815_v15  ;;  %v468_v15 = vpop.permute.xlu1 %467  ;;  %v2238_v42 = vpack.c.b16 %v2048_v40, %v2046_v51  ;;  %5033 = vset.pattern.permute.xlu1 %v5107_v6 }
 0x28a   :  { %vm996_vm5 = vcmp.eq.s32.totalorder %v468_v15, %v5190_v35  ;;  %vm997_vm6 = vcmp.eq.s32.totalorder %v468_v15, %v5194_v37  ;;  %5034 = vset.pattern.permute.xlu2 %v5098_v1 }
 0x28b   :  { %v4003_v13 = vrot.slane %v4002_v39, 4  ;;  %v4661_v51 = vsel %vm996_vm5, 1.0, %v6750_v43  ;;  %v4662_v14 = vsel %vm997_vm6, 1.0, %v6750_v43 }
 0x28c   :  { %v2652_v10 = vpop.f32.mrf.mxu0  ;;  %v2981_v16 = vpop.f32.mrf.mxu1  ;;  %v1697_v30 = vpack.c.bf16 %v4662_v14, %v4661_v51 }
 0x28d   :  { %v2982_v12 = vadd.f32 %v2981_v16, %v2652_v10  ;;  %v3542_v41 = vpop.f32.mrf.mxu2  ;;  %v4004_v11 = vmax.f32 %v4002_v39, %v4003_v13  ;;  %v2239_v16 = vpack.c.b16 %v2049_v44, %v2047_v0 }
 0x28e   :  { %v3543_v20 = vadd.f32 %v6028_v34, %v3542_v41  ;;  %v4660_v41 = vsel %vm995_vm9, 1.0, %v6750_v43 }
 0x28f   :  { %v3207_v18 = vpack.c.bf16 %v2982_v12, %v2980_v2  ;;  %v4659_v12 = vsel %vm994_vm8, 1.0, %v6750_v43  ;;  %v4005_v32 = vrot.slane %v4004_v11, 2 }
 0x290   :  { %v3819_v63 = vmax.f32 %v3543_v20, 0.0  ;;  %v4011_v20 = vmax.f32 %v4009_v26, %v4010_v45  ;;  %v1696_v39 = vpack.c.bf16 %v4660_v41, %v4659_v12  ;;  %v2053_v45 = vunpack.c.h.b16 %v1697_v30 }
 0x291   :  { %4878 = vmatmul.msk.bf16.gmra.mxu2 %vm3268_vm12, %v3207_v18  ;;  %v4006_v55 = vmax.f32 %v4004_v11, %v4005_v32  ;;  %v586_v11 = vperm.slane %v6116_v53, 3 }
 0x292   :  { %v6162_v54 = vpop.f32.mrf.mxu3  ;;  %v4016_v57 = vmax.f32 %v3818_v9, %v3819_v63  ;;  %v4012_v15 = vrot.slane %v4011_v20, 2  ;;  %v2050_v26 = vunpack.c.l.b16 %v1696_v39  ;;  %v2051_v51 = vunpack.c.h.b16 %v1696_v39 }
 0x293   :  { %6754 = vst [vmem:[#allocation15_spill] sm:$0xff] %v6162_v54  ;;  %v2052_v54 = vunpack.c.l.b16 %v1697_v30  ;;  %v4007_v32 = vrot.slane %v4006_v55, 1  ;;  %597 = vperm.xlu1 %5033, %v586_v11   ;;  %591 = vperm.xlu0 %5032, %v586_v11  }
 0x294   :  { %v2655_v24 = vpop.f32.mrf.mxu0  ;;  %v2984_v36 = vpop.f32.mrf.mxu1  ;;  %v4017_v2 = vrot.slane %v4016_v57, 4 }
 0x295   :  { %v3545_v10 = vpop.f32.mrf.mxu2  ;;  %v2985_v13 = vadd.f32 %v2984_v36, %v2655_v24  ;;  %v475_v24 = vpop.permute.xlu2 %474  ;;  %v2240_v41 = vpack.c.b16 %v2052_v54, %v2050_v26  ;;  %v4008_v54 = vmax.f32 %v4006_v55, %v4007_v32 }
 0x296   :  { %v4018_v18 = vmax.f32 %v4016_v57, %v4017_v2  ;;  %v3546_v63 = vadd.f32 %v6028_v34, %v3545_v10  ;;  %v4013_v10 = vmax.f32 %v4011_v20, %v4012_v15  ;;  %v481_v36 = vpop.permute.xlu1 %480  ;;  %vm998_vm10 = vcmp.eq.s32.totalorder %v475_v24, %v5190_v35 }
 0x297   :  { %2694 = vmatmul.bf16.gmra.mxu0 %v2238_v42  ;;  %3128 = vmatmul.bf16.gmra.mxu3 %v5607_v23  ;;  %vm999_vm11 = vcmp.eq.s32.totalorder %v475_v24, %v5194_v37  ;;  %vm1000_vm2 = vcmp.eq.s32.totalorder %v481_v36, %v5190_v35  ;;  %vm1001_vm4 = vcmp.eq.s32.totalorder %v481_v36, %v5194_v37 }
 0x298   :  { %3023 = vmatmul.bf16.gmra.mxu1 %v2239_v16  ;;  %v4019_v16 = vrot.slane %v4018_v18, 2  ;;  %v3820_v57 = vmax.f32 %v3546_v63, 0.0  ;;  %v4014_v30 = vrot.slane %v4013_v10, 1  ;;  %v4663_v63 = vsel %vm998_vm10, 1.0, %v6750_v43 }
 0x299   :  { %v4664_v15 = vsel %vm999_vm11, 1.0, %v6750_v43  ;;  %v4665_v26 = vsel %vm1000_vm2, 1.0, %v6750_v43 }
 0x29a   :  { %v6175_v40 = vpop.f32.mrf.mxu3  ;;  %v4020_v12 = vmax.f32 %v4018_v18, %v4019_v16  ;;  %v1698_v55 = vpack.c.bf16 %v4664_v15, %v4663_v63 }
 0x29b   :  { %5035 = vset.pattern.permute.xlu0 %v5107_v6 }
 0x29c   :  { %v2657_v9 = vpop.f32.mrf.mxu0  ;;  %v2986_v23 = vpop.f32.mrf.mxu1  ;;  %v4021_v20 = vrot.slane %v4020_v12, 1 }
 0x29d   :  { %v2987_v44 = vadd.f32 %v2986_v23, %v2657_v9  ;;  %v3547_v0 = vpop.f32.mrf.mxu2 }
 0x29e   :  { %v3548_v42 = vadd.f32 %v6028_v34, %v3547_v0 }
 0x29f   :  { %v3208_v61 = vpack.c.bf16 %v2987_v44, %v2985_v13  ;;  %v2241_v13 = vpack.c.b16 %v2053_v45, %v2051_v51  ;;  %v4022_v45 = vmax.f32 %v4020_v12, %v4021_v20  ;;  %v4447_v51 = vsel %vm4436_vm13, %v4008_v54, %v6122_v21 }
 0x2a0   :  { %v3821_v2 = vmax.f32 %v3548_v42, 0.0  ;;  %v4015_v42 = vmax.f32 %v4013_v10, %v4014_v30 }
 0x2a1   :  { %4879 = vmatmul.msk.bf16.gmra.mxu2 %vm3268_vm12, %v3208_v61 }
 0x2a2   :  { %v4023_v14 = vmax.f32 %v3820_v57, %v3821_v2  ;;  %v6183_v61 = vpop.f32.mrf.mxu3  ;;  %v4666_v57 = vsel %vm1001_vm4, 1.0, %v6750_v43  ;;  %v599_v2 = vperm.slane %v6116_v53, 4  ;;  %v4448_v12 = vsel %vm4438_vm14, %v4015_v42, %v4447_v51  ;;  %v488_v42 = vpop.permute.xlu2 %487 }
 0x2a3   :  { %v4449_v21 = vsel %vm4440_vm0, %v4022_v45, %v4448_v12  ;;  %vm1002_vm5 = vcmp.eq.s32.totalorder %v488_v42, %v5190_v35  ;;  %vm1003_vm6 = vcmp.eq.s32.totalorder %v488_v42, %v5194_v37 }
 0x2a4   :  { %v4024_v9 = vrot.slane %v4023_v14, 4  ;;  %v2660_v23 = vpop.f32.mrf.mxu0  ;;  %v2989_v0 = vpop.f32.mrf.mxu1  ;;  %610 = vperm.xlu1 %5033, %v599_v2   ;;  %604 = vperm.xlu2 %5034, %v599_v2  }
 0x2a5   :  { %v3550_v44 = vpop.f32.mrf.mxu2  ;;  %v2990_v11 = vadd.f32 %v2989_v0, %v2660_v23  ;;  %v2054_v23 = vunpack.c.l.b16 %v1698_v55 }
 0x2a6   :  { %v4025_v39 = vmax.f32 %v4023_v14, %v4024_v9  ;;  %v3551_v14 = vadd.f32 %v6028_v34, %v3550_v44 }
 0x2a7   :  { %2699 = vmatmul.bf16.gmra.mxu0 %v2240_v41  ;;  %3133 = vmatmul.bf16.gmra.mxu3 %v5614_v31  ;;  %v1699_v41 = vpack.c.bf16 %v4666_v57, %v4665_v26 }
 0x2a8   :  { %v4026_v18 = vrot.slane %v4025_v39, 2  ;;  %3028 = vmatmul.bf16.gmra.mxu1 %v2241_v13 }
 0x2a9   :  { %v2056_v0 = vunpack.c.l.b16 %v1699_v41  ;;  %v2057_v63 = vunpack.c.h.b16 %v1699_v41 }
 0x2aa   :  { %v4027_v16 = vmax.f32 %v4025_v39, %v4026_v18  ;;  %v3822_v39 = vmax.f32 %v3551_v14, 0.0  ;;  %v6201_v54 = vpop.f32.mrf.mxu3  ;;  %v2055_v18 = vunpack.c.h.b16 %v1698_v55  ;;  %v4668_v55 = vsel %vm1003_vm6, 1.0, %v6750_v43 }
 0x2ab   :  { %v2242_v2 = vpack.c.b16 %v2056_v0, %v2054_v23 }
 0x2ac   :  { %v4028_v31 = vrot.slane %v4027_v16, 1  ;;  %v2662_v24 = vpop.f32.mrf.mxu0  ;;  %v2991_v36 = vpop.f32.mrf.mxu1  ;;  %5036 = vset.pattern.permute.xlu1 %v5098_v1  ;;  %v2243_v51 = vpack.c.b16 %v2057_v63, %v2055_v18 }
 0x2ad   :  { %v2992_v10 = vadd.f32 %v2991_v36, %v2662_v24  ;;  %v3552_v32 = vpop.f32.mrf.mxu2 }
 0x2ae   :  { %v4029_v9 = vmax.f32 %v4027_v16, %v4028_v31  ;;  %v3553_v13 = vadd.f32 %v6028_v34, %v3552_v32  ;;  %v494_v16 = vpop.permute.xlu0 %493  ;;  %v4667_v31 = vsel %vm1002_vm5, 1.0, %v6750_v43 }
 0x2af   :  { %v3209_v30 = vpack.c.bf16 %v2992_v10, %v2990_v11  ;;  %vm1004_vm8 = vcmp.eq.s32.totalorder %v494_v16, %v5190_v35  ;;  %vm1005_vm9 = vcmp.eq.s32.totalorder %v494_v16, %v5194_v37  ;;  %v1700_v1 = vpack.c.bf16 %v4668_v55, %v4667_v31 }
 0x2b0   :  { %v4450_v44 = vsel %vm4442_vm1, %v4029_v9, %v4449_v21  ;;  %v3823_v20 = vmax.f32 %v3553_v13, 0.0  ;;  %v4669_v24 = vsel %vm1004_vm8, 1.0, %v6750_v43  ;;  %v4670_v36 = vsel %vm1005_vm9, 1.0, %v6750_v43 }
 0x2b1   :  { %4502 = vst [vmem:[#allocation2 + $0x8] sm:$0xff] %v4450_v44  ;;  %4880 = vmatmul.msk.bf16.gmra.mxu2 %vm3268_vm12, %v3209_v30  ;;  %v612_v11 = vperm.slane %v6116_v53, 5  ;;  %v1701_v10 = vpack.c.bf16 %v4670_v36, %v4669_v24  ;;  %v2059_v42 = vunpack.c.h.b16 %v1700_v1 }
 0x2b2   :  { %v4030_v15 = vmax.f32 %v3822_v39, %v3823_v20  ;;  %v2058_v39 = vunpack.c.l.b16 %v1700_v1 }
 0x2b3   :  { %623 = vperm.xlu0 %5035, %v612_v11   ;;  %617 = vperm.xlu2 %5034, %v612_v11   ;;  %v2060_v20 = vunpack.c.l.b16 %v1701_v10  ;;  %v2061_v16 = vunpack.c.h.b16 %v1701_v10 }
 0x2b4   :  { %v2665_v26 = vpop.f32.mrf.mxu0  ;;  %v4031_v14 = vrot.slane %v4030_v15, 4 }
 0x2b5   :  { %v2994_v57 = vpop.f32.mrf.mxu1  ;;  %v3555_v45 = vpop.f32.mrf.mxu2  ;;  %v2245_v1 = vpack.c.b16 %v2061_v16, %v2059_v42 }
 0x2b6   :  { %v3556_v32 = vadd.f32 %v6028_v34, %v3555_v45  ;;  %v2995_v21 = vadd.f32 %v2994_v57, %v2665_v26  ;;  %v507_v45 = vpop.permute.xlu2 %506  ;;  %v501_v26 = vpop.permute.xlu1 %500  ;;  %v2244_v57 = vpack.c.b16 %v2060_v20, %v2058_v39 }
 0x2b7   :  { %2704 = vmatmul.bf16.gmra.mxu0 %v2242_v2  ;;  %3138 = vmatmul.bf16.gmra.mxu3 %v5661_v46  ;;  %v4032_v46 = vmax.f32 %v4030_v15, %v4031_v14  ;;  %vm1008_vm10 = vcmp.eq.s32.totalorder %v507_v45, %v5190_v35  ;;  %vm1009_vm11 = vcmp.eq.s32.totalorder %v507_v45, %v5194_v37 }
 0x2b8   :  { %3033 = vmatmul.bf16.gmra.mxu1 %v2243_v51  ;;  %v3824_v23 = vmax.f32 %v3556_v32, 0.0  ;;  %vm1006_vm2 = vcmp.eq.s32.totalorder %v501_v26, %v5190_v35  ;;  %vm1007_vm4 = vcmp.eq.s32.totalorder %v501_v26, %v5194_v37  ;;  %v4673_v11 = vsel %vm1008_vm10, 1.0, %v6750_v43 }
 0x2b9   :  { %v4033_v63 = vrot.slane %v4032_v46, 2  ;;  %v4674_v32 = vsel %vm1009_vm11, 1.0, %v6750_v43 }
 0x2ba   :  { %v6214_v41 = vpop.f32.mrf.mxu3 }
 0x2bb   :  { %v4034_v55 = vmax.f32 %v4032_v46, %v4033_v63  ;;  %5037 = vset.pattern.permute.xlu2 %v5107_v6  ;;  %v4672_v46 = vsel %vm1007_vm4, 1.0, %v6750_v43 }
 0x2bc   :  { %v2667_v12 = vpop.f32.mrf.mxu0 }
 0x2bd   :  { %v2996_v9 = vpop.f32.mrf.mxu1  ;;  %v3557_v13 = vpop.f32.mrf.mxu2 }
 0x2be   :  { %v2997_v30 = vadd.f32 %v2996_v9, %v2667_v12  ;;  %v3558_v44 = vadd.f32 %v6028_v34, %v3557_v13  ;;  %v4671_v12 = vsel %vm1006_vm2, 1.0, %v6750_v43  ;;  %v4035_v9 = vrot.slane %v4034_v55, 1 }
 0x2bf   :  { %v1702_v6 = vpack.c.bf16 %v4672_v46, %v4671_v12 }
 0x2c0   :  { %v3210_v0 = vpack.c.bf16 %v2997_v30, %v2995_v21  ;;  %v3825_v18 = vmax.f32 %v3558_v44, 0.0  ;;  %v1703_v30 = vpack.c.bf16 %v4674_v32, %v4673_v11  ;;  %v514_v32 = vpop.permute.xlu1 %513 }
 0x2c1   :  { %v2063_v26 = vunpack.c.h.b16 %v1702_v6  ;;  %vm1010_vm8 = vcmp.eq.s32.totalorder %v514_v32, %v5190_v35  ;;  %vm1011_vm9 = vcmp.eq.s32.totalorder %v514_v32, %v5194_v37 }
 0x2c2   :  { %v4037_v2 = vmax.f32 %v3824_v23, %v3825_v18  ;;  %4881 = vmatmul.msk.bf16.gmra.mxu2 %vm3268_vm12, %v3210_v0  ;;  %v6220_v15 = vpop.f32.mrf.mxu3  ;;  %v4036_v23 = vmax.f32 %v4034_v55, %v4035_v9  ;;  %v2065_v45 = vunpack.c.h.b16 %v1703_v30 }
 0x2c4   :  { %v4038_v51 = vrot.slane %v4037_v2, 4  ;;  %v2670_v31 = vpop.f32.mrf.mxu0  ;;  %v2247_v9 = vpack.c.b16 %v2065_v45, %v2063_v26  ;;  %v638_v26 = vperm.slane %v6116_v53, 7 }
 0x2c5   :  { %v2999_v14 = vpop.f32.mrf.mxu1  ;;  %v3560_v24 = vpop.f32.mrf.mxu2 }
 0x2c6   :  { %v4039_v36 = vmax.f32 %v4037_v2, %v4038_v51  ;;  %v3561_v39 = vadd.f32 %v6028_v34, %v3560_v24  ;;  %v3000_v63 = vadd.f32 %v2999_v14, %v2670_v31  ;;  %v2064_v2 = vunpack.c.l.b16 %v1703_v30 }
 0x2c7   :  { %2709 = vmatmul.bf16.gmra.mxu0 %v2244_v57  ;;  %3143 = vmatmul.bf16.gmra.mxu3 %v5724_v4  ;;  %v2062_v51 = vunpack.c.l.b16 %v1702_v6  ;;  %v625_v6 = vperm.slane %v6116_v53, 6 }
 0x2c8   :  { %v4040_v10 = vrot.slane %v4039_v36, 2  ;;  %3038 = vmatmul.bf16.gmra.mxu1 %v2245_v1 }
 0x2c9   :  { %v2246_v14 = vpack.c.b16 %v2064_v2, %v2062_v51  ;;  %630 = vperm.xlu1 %5036, %v625_v6   ;;  %636 = vperm.xlu2 %5037, %v625_v6   ;;  %v527_v6 = vpop.permute.xlu0 %526 }
 0x2ca   :  { %v4041_v13 = vmax.f32 %v4039_v36, %v4040_v10  ;;  %v3104_v21 = vpop.f32.mrf.mxu3  ;;  %v3826_v36 = vmax.f32 %v3561_v39, 0.0  ;;  %v520_v10 = vpop.permute.xlu2 %519  ;;  %vm1014_vm2 = vcmp.eq.s32.totalorder %v527_v6, %v5190_v35  ;;  %vm1015_vm4 = vcmp.eq.s32.totalorder %v527_v6, %v5194_v37 }
 0x2cb   :  { %v6237_v31 = vadd.f32 %v3104_v21, %v5675_v59  ;;  %vm1012_vm5 = vcmp.eq.s32.totalorder %v520_v10, %v5190_v35  ;;  %vm1013_vm6 = vcmp.eq.s32.totalorder %v520_v10, %v5194_v37 }
 0x2cc   :  { %v4042_v44 = vrot.slane %v4041_v13, 1  ;;  %v2672_v20 = vpop.f32.mrf.mxu0  ;;  %v4678_v39 = vsel %vm1013_vm6, 1.0, %v6750_v43 }
 0x2cd   :  { %v3001_v0 = vpop.f32.mrf.mxu1  ;;  %v3562_v4 = vpop.f32.mrf.mxu2 }
 0x2ce   :  { %v4043_v18 = vmax.f32 %v4041_v13, %v4042_v44  ;;  %v3002_v42 = vadd.f32 %v3001_v0, %v2672_v20  ;;  %v3563_v16 = vadd.f32 %v6028_v34, %v3562_v4  ;;  %v4675_v20 = vsel %vm1010_vm8, 1.0, %v6750_v43 }
 0x2d0   :  { %v4451_v57 = vsel %vm4430_vm3, %v4043_v18, %v4036_v23  ;;  %v3211_v1 = vpack.c.bf16 %v3002_v42, %v3000_v63  ;;  %v3827_v11 = vmax.f32 %v3563_v16, 0.0  ;;  %v4676_v23 = vsel %vm1011_vm9, 1.0, %v6750_v43 }
 0x2d1   :  { %v1704_v63 = vpack.c.bf16 %v4676_v23, %v4675_v20  ;;  %643 = vperm.xlu1 %5036, %v638_v26   ;;  %649 = vperm.xlu2 %5037, %v638_v26  }
 0x2d2   :  { %v4044_v24 = vmax.f32 %v3826_v36, %v3827_v11  ;;  %4882 = vmatmul.msk.bf16.gmra.mxu2 %vm3268_vm12, %v3211_v1  ;;  %v3106_v55 = vpop.f32.mrf.mxu3 }
 0x2d3   :  { %v6240_v34 = vadd.f32 %v3106_v55, %v5690_v3  ;;  %v4677_v3 = vsel %vm1012_vm5, 1.0, %v6750_v43  ;;  %v2066_v32 = vunpack.c.l.b16 %v1704_v63 }
 0x2d4   :  { %v4045_v12 = vrot.slane %v4044_v24, 4  ;;  %v2675_v46 = vpop.f32.mrf.mxu0  ;;  %v1705_v18 = vpack.c.bf16 %v4678_v39, %v4677_v3 }
 0x2d5   :  { %v3004_v59 = vpop.f32.mrf.mxu1  ;;  %v3565_v21 = vpop.f32.mrf.mxu2 }
 0x2d6   :  { %v4046_v30 = vmax.f32 %v4044_v24, %v4045_v12  ;;  %v3005_v1 = vadd.f32 %v3004_v59, %v2675_v46  ;;  %v2068_v24 = vunpack.c.l.b16 %v1705_v18 }
 0x2d7   :  { %2714 = vmatmul.bf16.gmra.mxu0 %v2246_v14  ;;  %3148 = vmatmul.bf16.gmra.mxu3 %v5760_v19  ;;  %v6257_v19 = vld [vmem:[%s6739_s3] ss:$0 sm:$0xff] }
 0x2d8   :  { %v4047_v44 = vrot.slane %v4046_v30, 2  ;;  %3043 = vmatmul.bf16.gmra.mxu1 %v2247_v9  ;;  %v3566_v16 = vadd.f32 %v6257_v19, %v3565_v21  ;;  %v2069_v21 = vunpack.c.h.b16 %v1705_v18  ;;  %v2248_v20 = vpack.c.b16 %v2068_v24, %v2066_v32 }
 0x2da   :  { %v4048_v0 = vmax.f32 %v4046_v30, %v4047_v44  ;;  %v3109_v4 = vpop.f32.mrf.mxu3  ;;  %v3828_v14 = vmax.f32 %v3566_v16, 0.0  ;;  %v2067_v30 = vunpack.c.h.b16 %v1704_v63  ;;  %v533_v44 = vpop.permute.xlu1 %532  ;;  %v4679_v16 = vsel %vm1014_vm2, 1.0, %v6750_v43 }
 0x2db   :  { %v6265_v46 = vadd.f32 %v3109_v4, %v5722_v62  ;;  %vm1016_vm10 = vcmp.eq.s32.totalorder %v533_v44, %v5190_v35  ;;  %vm1017_vm11 = vcmp.eq.s32.totalorder %v533_v44, %v5194_v37 }
 0x2dc   :  { %v4049_v42 = vrot.slane %v4048_v0, 1  ;;  %v2677_v2 = vpop.f32.mrf.mxu0  ;;  %v4681_v4 = vsel %vm1016_vm10, 1.0, %v6750_v43 }
 0x2dd   :  { %v3006_v45 = vpop.f32.mrf.mxu1  ;;  %v3567_v51 = vpop.f32.mrf.mxu2 }
 0x2de   :  { %v4050_v36 = vmax.f32 %v4048_v0, %v4049_v42  ;;  %v3007_v11 = vadd.f32 %v3006_v45, %v2677_v2  ;;  %v3568_v10 = vadd.f32 %v6257_v19, %v3567_v51  ;;  %v4682_v42 = vsel %vm1017_vm11, 1.0, %v6750_v43 }
 0x2df   :  { %v4680_v2 = vsel %vm1015_vm4, 1.0, %v6750_v43  ;;  %v1707_v26 = vpack.c.bf16 %v4682_v42, %v4681_v4 }
 0x2e0   :  { %v4452_v55 = vsel %vm4432_vm15, %v4050_v36, %v4451_v57  ;;  %v3212_v12 = vpack.c.bf16 %v3007_v11, %v3005_v1  ;;  %v3829_v9 = vmax.f32 %v3568_v10, 0.0  ;;  %v1706_v36 = vpack.c.bf16 %v4680_v2, %v4679_v16 }
 0x2e2   :  { %v4051_v3 = vmax.f32 %v3828_v14, %v3829_v9  ;;  %4883 = vmatmul.msk.bf16.gmra.mxu2 %vm3268_vm12, %v3212_v12  ;;  %v3111_v53 = vpop.f32.mrf.mxu3  ;;  %v2070_v9 = vunpack.c.l.b16 %v1706_v36 }
 0x2e3   :  { %v6268_v59 = vadd.f32 %v3111_v53, %v5745_v56  ;;  %v2249_v56 = vpack.c.b16 %v2069_v21, %v2067_v30  ;;  %v2073_v30 = vunpack.c.h.b16 %v1707_v26  ;;  %v2071_v53 = vunpack.c.h.b16 %v1706_v36 }
 0x2e4   :  { %v4052_v57 = vrot.slane %v4051_v3, 4  ;;  %v2680_v39 = vpop.f32.mrf.mxu0 }
 0x2e5   :  { %v3009_v0 = vpop.f32.mrf.mxu1  ;;  %v6273_v18 = vpop.f32.mrf.mxu2 }
 0x2e6   :  { %v4053_v62 = vmax.f32 %v4051_v3, %v4052_v57  ;;  %v3010_v14 = vadd.f32 %v3009_v0, %v2680_v39  ;;  %v540_v57 = vpop.permute.xlu2 %539  ;;  %v546_v0 = vpop.permute.xlu1 %545 }
 0x2e7   :  { %2719 = vmatmul.bf16.gmra.mxu0 %v2248_v20  ;;  %3153 = vmatmul.bf16.gmra.mxu3 %v5828_v22  ;;  %v2072_v22 = vunpack.c.l.b16 %v1707_v26  ;;  %vm1018_vm5 = vcmp.eq.s32.totalorder %v540_v57, %v5190_v35  ;;  %vm1019_vm6 = vcmp.eq.s32.totalorder %v540_v57, %v5194_v37  ;;  %vm1020_vm8 = vcmp.eq.s32.totalorder %v546_v0, %v5190_v35 }
 0x2e8   :  { %v4054_v63 = vrot.slane %v4053_v62, 2  ;;  %3048 = vmatmul.bf16.gmra.mxu1 %v2249_v56  ;;  %v2251_v56 = vpack.c.b16 %v2073_v30, %v2071_v53  ;;  %vm1021_vm9 = vcmp.eq.s32.totalorder %v546_v0, %v5194_v37  ;;  %v4685_v42 = vsel %vm1020_vm8, 1.0, %v6750_v43  ;;  %v559_v53 = vpop.permute.xlu0 %558 }
 0x2e9   :  { %v2250_v39 = vpack.c.b16 %v2072_v22, %v2070_v9  ;;  %v4686_v16 = vsel %vm1021_vm9, 1.0, %v6750_v43  ;;  %vm1024_vm2 = vcmp.eq.s32.totalorder %v559_v53, %v5190_v35  ;;  %vm1025_vm4 = vcmp.eq.s32.totalorder %v559_v53, %v5194_v37 }
 0x2ea   :  { %v4055_v45 = vmax.f32 %v4053_v62, %v4054_v63  ;;  %v3114_v51 = vpop.f32.mrf.mxu3  ;;  %v1709_v26 = vpack.c.bf16 %v4686_v16, %v4685_v42 }
 0x2eb   :  { %v6288_v44 = vadd.f32 %v3114_v51, %v5765_v33  ;;  %v4683_v33 = vsel %vm1018_vm5, 1.0, %v6750_v43 }
 0x2ec   :  { %v4056_v1 = vrot.slane %v4055_v45, 1  ;;  %v2682_v11 = vpop.f32.mrf.mxu0  ;;  %v2077_v22 = vunpack.c.h.b16 %v1709_v26 }
 0x2ed   :  { %v3011_v10 = vpop.f32.mrf.mxu1  ;;  %v3572_v24 = vpop.f32.mrf.mxu2 }
 0x2ee   :  { %v4057_v32 = vmax.f32 %v4055_v45, %v4056_v1  ;;  %v3012_v12 = vadd.f32 %v3011_v10, %v2682_v11  ;;  %v553_v9 = vpop.permute.xlu2 %552 }
 0x2ef   :  { %vm1022_vm10 = vcmp.eq.s32.totalorder %v553_v9, %v5190_v35  ;;  %vm1023_vm11 = vcmp.eq.s32.totalorder %v553_v9, %v5194_v37 }
 0x2f0   :  { %v6284_v21 = vsel %vm4434_vm7, %v4057_v32, %v4452_v55  ;;  %v3213_v3 = vpack.c.bf16 %v3012_v12, %v3010_v14  ;;  %v2076_v12 = vunpack.c.l.b16 %v1709_v26  ;;  %v4688_v16 = vsel %vm1023_vm11, 1.0, %v6750_v43 }
 0x2f2   :  { %4884 = vmatmul.msk.bf16.gmra.mxu2 %vm3268_vm12, %v3213_v3  ;;  %v3116_v6 = vpop.f32.mrf.mxu3 }
 0x2f3   :  { %v6291_v20 = vadd.f32 %v3116_v6, %v5778_v17  ;;  %v4684_v17 = vsel %vm1019_vm6, 1.0, %v6750_v43 }
 0x2f4   :  { %v2685_v62 = vpop.f32.mrf.mxu0  ;;  %v1708_v51 = vpack.c.bf16 %v4684_v17, %v4683_v33  ;;  %v3573_v33 = vadd.f32 %v6257_v19, %v3572_v24  ;;  %v4687_v17 = vsel %vm1022_vm10, 1.0, %v6750_v43  ;;  %v4689_v24 = vsel %vm1024_vm2, 1.0, %v6750_v43 }
 0x2f5   :  { %v3234_v55 = vpack.c.bf16 %v6291_v20, %v6288_v44  ;;  %v3014_v4 = vpop.f32.mrf.mxu1  ;;  %v3575_v63 = vpop.f32.mrf.mxu2 }
 0x2f6   :  { %v3015_v11 = vadd.f32 %v3014_v4, %v2685_v62  ;;  %v2074_v14 = vunpack.c.l.b16 %v1708_v51  ;;  %v3576_v26 = vadd.f32 %v6257_v19, %v3575_v63 }
 0x2f7   :  { %2724 = vmatmul.bf16.gmra.mxu0 %v2250_v39  ;;  %3158 = vmatmul.bf16.gmra.mxu3 %v5838_v27  ;;  %v2075_v27 = vunpack.c.h.b16 %v1708_v51 }
 0x2f8   :  { %3053 = vmatmul.bf16.gmra.mxu1 %v2251_v56  ;;  %v2252_v56 = vpack.c.b16 %v2076_v12, %v2074_v14  ;;  %v3832_v53 = vmax.f32 %v3576_v26, 0.0  ;;  %v572_v26 = vpop.permute.xlu2 %571 }
 0x2f9   :  { %v2253_v4 = vpack.c.b16 %v2077_v22, %v2075_v27  ;;  %vm1028_vm5 = vcmp.eq.s32.totalorder %v572_v26, %v5190_v35  ;;  %vm1029_vm6 = vcmp.eq.s32.totalorder %v572_v26, %v5194_v37 }
 0x2fa   :  { %v3119_v2 = vpop.f32.mrf.mxu3 }
 0x2fb   :  { %v6306_v3 = vadd.f32 %v3119_v2, %v5796_v58  ;;  %v6755_v58 = vld [vmem:[#allocation7_spill] sm:$0xff]  ;;  %v4690_v2 = vsel %vm1025_vm4, 1.0, %v6750_v43 }
 0x2fc   :  { %v2687_v45 = vpop.f32.mrf.mxu0 }
 0x2fd   :  { %v3016_v36 = vpop.f32.mrf.mxu1  ;;  %v3577_v1 = vpop.f32.mrf.mxu2 }
 0x2fe   :  { %v3017_v10 = vadd.f32 %v3016_v36, %v2687_v45  ;;  %v3578_v42 = vadd.f32 %v6257_v19, %v3577_v1  ;;  %v3831_v45 = vmax.f32 %v3573_v33, 0.0 }
 0x300   :  { %v3214_v32 = vpack.c.bf16 %v3017_v10, %v3015_v11  ;;  %v1710_v11 = vpack.c.bf16 %v4688_v16, %v4687_v17  ;;  %v1711_v10 = vpack.c.bf16 %v4690_v2, %v4689_v24 }
 0x302   :  { %4885 = vmatmul.msk.bf16.gmra.mxu2 %vm3268_vm12, %v3214_v32  ;;  %v3121_v30 = vpop.f32.mrf.mxu3  ;;  %v2079_v16 = vunpack.c.h.b16 %v1710_v11  ;;  %v2081_v24 = vunpack.c.h.b16 %v1711_v10 }
 0x303   :  { %v6309_v6 = vadd.f32 %v3121_v30, %v5840_v47  ;;  %v3571_v47 = vadd.f32 %v6257_v19, %v6273_v18  ;;  %v3833_v18 = vmax.f32 %v3578_v42, 0.0  ;;  %v6756_v42 = vld [vmem:[#allocation5_spill] sm:$0xff] }
 0x304   :  { %v2690_v57 = vpop.f32.mrf.mxu0 }
 0x305   :  { %v3019_v0 = vpop.f32.mrf.mxu1  ;;  %v3580_v62 = vpop.f32.mrf.mxu2  ;;  %v3830_v36 = vmax.f32 %v3571_v47, 0.0  ;;  %v4065_v63 = vmax.f32 %v3832_v53, %v3833_v18  ;;  %v4694_v53 = vsel %vm1029_vm6, 1.0, %v6750_v43 }
 0x306   :  { %v3581_v14 = vadd.f32 %v6257_v19, %v3580_v62  ;;  %v3020_v22 = vadd.f32 %v3019_v0, %v2690_v57  ;;  %v6757_v0 = vld [vmem:[#allocation6_spill] sm:$0xff] }
 0x307   :  { %2729 = vmatmul.bf16.gmra.mxu0 %v2252_v56  ;;  %3163 = vmatmul.bf16.gmra.mxu3 %v6755_v58  ;;  %v4058_v1 = vmax.f32 %v3830_v36, %v3831_v45  ;;  %v2078_v56 = vunpack.c.l.b16 %v1710_v11  ;;  %v4066_v11 = vrot.slane %v4065_v63, 4 }
 0x308   :  { %3058 = vmatmul.bf16.gmra.mxu1 %v2253_v4  ;;  %v2080_v4 = vunpack.c.l.b16 %v1711_v10  ;;  %v3834_v47 = vmax.f32 %v3581_v14, 0.0 }
 0x309   :  { %v4059_v17 = vrot.slane %v4058_v1, 4 }
 0x30a   :  { %v3124_v51 = vpop.f32.mrf.mxu3  ;;  %v2254_v18 = vpack.c.b16 %v2080_v4, %v2078_v56 }
 0x30b   :  { %v6331_v2 = vadd.f32 %v3124_v51, %v6756_v42  ;;  %v4060_v51 = vmax.f32 %v4058_v1, %v4059_v17 }
 0x30c   :  { %v2692_v32 = vpop.f32.mrf.mxu0 }
 0x30d   :  { %v3021_v27 = vpop.f32.mrf.mxu1  ;;  %v3582_v12 = vpop.f32.mrf.mxu2 }
 0x30e   :  { %v3022_v9 = vadd.f32 %v3021_v27, %v2692_v32  ;;  %v3583_v30 = vadd.f32 %v6257_v19, %v3582_v12  ;;  %v566_v32 = vpop.permute.xlu1 %565  ;;  %v2255_v12 = vpack.c.b16 %v2081_v24, %v2079_v16 }
 0x30f   :  { %vm1026_vm8 = vcmp.eq.s32.totalorder %v566_v32, %v5190_v35  ;;  %vm1027_vm9 = vcmp.eq.s32.totalorder %v566_v32, %v5194_v37 }
 0x310   :  { %v3215_v33 = vpack.c.bf16 %v3022_v9, %v3020_v22  ;;  %v3835_v58 = vmax.f32 %v3583_v30, 0.0  ;;  %v6758_v9 = vld [vmem:[#allocation11_spill] sm:$0xff]  ;;  %v4693_v30 = vsel %vm1028_vm5, 1.0, %v6750_v43  ;;  %v4691_v56 = vsel %vm1026_vm8, 1.0, %v6750_v43 }
 0x311   :  { %v4692_v4 = vsel %vm1027_vm9, 1.0, %v6750_v43  ;;  %v1713_v42 = vpack.c.bf16 %v4694_v53, %v4693_v30  ;;  %v585_v53 = vpop.permute.xlu2 %584 }
 0x312   :  { %4886 = vmatmul.msk.bf16.gmra.mxu2 %vm3268_vm12, %v3215_v33  ;;  %v3126_v62 = vpop.f32.mrf.mxu3  ;;  %v4072_v57 = vmax.f32 %v3834_v47, %v3835_v58  ;;  %v4067_v33 = vmax.f32 %v4065_v63, %v4066_v11  ;;  %v4061_v58 = vrot.slane %v4060_v51, 2  ;;  %v1712_v1 = vpack.c.bf16 %v4692_v4, %v4691_v56 }
 0x313   :  { %v6334_v45 = vadd.f32 %v3126_v62, %v6757_v0  ;;  %v2084_v10 = vunpack.c.l.b16 %v1713_v42  ;;  %vm1032_vm10 = vcmp.eq.s32.totalorder %v585_v53, %v5190_v35  ;;  %vm1033_vm11 = vcmp.eq.s32.totalorder %v585_v53, %v5194_v37 }
 0x314   :  { %v2695_v36 = vpop.f32.mrf.mxu0  ;;  %v4073_v22 = vrot.slane %v4072_v57, 4  ;;  %v4068_v24 = vrot.slane %v4067_v33, 2  ;;  %v4062_v32 = vmax.f32 %v4060_v51, %v4061_v58  ;;  %v2082_v63 = vunpack.c.l.b16 %v1712_v1 }
 0x315   :  { %v3024_v14 = vpop.f32.mrf.mxu1  ;;  %v3585_v27 = vpop.f32.mrf.mxu2  ;;  %v2083_v39 = vunpack.c.h.b16 %v1712_v1 }
 0x316   :  { %v4074_v62 = vmax.f32 %v4072_v57, %v4073_v22  ;;  %v3586_v17 = vadd.f32 %v6257_v19, %v3585_v27  ;;  %v4069_v30 = vmax.f32 %v4067_v33, %v4068_v24  ;;  %v4063_v27 = vrot.slane %v4062_v32, 1  ;;  %v579_v4 = vpop.permute.xlu1 %578 }
 0x317   :  { %2734 = vmatmul.bf16.gmra.mxu0 %v2254_v18  ;;  %3168 = vmatmul.bf16.gmra.mxu3 %v6758_v9  ;;  %v3025_v18 = vadd.f32 %v3024_v14, %v2695_v36  ;;  %v6759_v14 = vld [vmem:[#allocation8_spill] sm:$0xff]  ;;  %vm1030_vm2 = vcmp.eq.s32.totalorder %v579_v4, %v5190_v35  ;;  %vm1031_vm4 = vcmp.eq.s32.totalorder %v579_v4, %v5194_v37 }
 0x318   :  { %3063 = vmatmul.bf16.gmra.mxu1 %v2255_v12  ;;  %v4075_v13 = vrot.slane %v4074_v62, 2  ;;  %v2085_v12 = vunpack.c.h.b16 %v1713_v42  ;;  %v3836_v11 = vmax.f32 %v3586_v17, 0.0  ;;  %v2256_v42 = vpack.c.b16 %v2084_v10, %v2082_v63 }
 0x319   :  { %v4070_v1 = vrot.slane %v4069_v30, 1  ;;  %v4696_v63 = vsel %vm1031_vm4, 1.0, %v6750_v43 }
 0x31a   :  { %v3129_v47 = vpop.f32.mrf.mxu3  ;;  %v4076_v36 = vmax.f32 %v4074_v62, %v4075_v13  ;;  %v2257_v33 = vpack.c.b16 %v2085_v12, %v2083_v39  ;;  %v4698_v39 = vsel %vm1033_vm11, 1.0, %v6750_v43  ;;  %v4695_v12 = vsel %vm1030_vm2, 1.0, %v6750_v43 }
 0x31b   :  { %v6351_v58 = vadd.f32 %v3129_v47, %v6759_v14 }
 0x31c   :  { %v2697_v16 = vpop.f32.mrf.mxu0  ;;  %v4077_v10 = vrot.slane %v4076_v36, 1 }
 0x31d   :  { %v3026_v0 = vpop.f32.mrf.mxu1  ;;  %v3587_v26 = vpop.f32.mrf.mxu2 }
 0x31e   :  { %v3027_v9 = vadd.f32 %v3026_v0, %v2697_v16  ;;  %v3588_v23 = vadd.f32 %v6257_v19, %v3587_v26  ;;  %v6760_v16 = vld [vmem:[#allocation9_spill] sm:$0xff]  ;;  %v4064_v26 = vmax.f32 %v4062_v32, %v4063_v27  ;;  %v4078_v32 = vmax.f32 %v4076_v36, %v4077_v10 }
 0x320   :  { %v3216_v57 = vpack.c.bf16 %v3027_v9, %v3025_v18  ;;  %v3837_v22 = vmax.f32 %v3588_v23, 0.0  ;;  %v4697_v18 = vsel %vm1032_vm10, 1.0, %v6750_v43  ;;  %v4454_v4 = vsel %vm4436_vm13, %v4064_v26, %v6284_v21 }
 0x321   :  { %v1715_v27 = vpack.c.bf16 %v4698_v39, %v4697_v18 }
 0x322   :  { %v4079_v56 = vmax.f32 %v3836_v11, %v3837_v22  ;;  %4887 = vmatmul.msk.bf16.gmra.mxu2 %vm3268_vm12, %v3216_v57  ;;  %v3131_v51 = vpop.f32.mrf.mxu3  ;;  %v4071_v11 = vmax.f32 %v4069_v30, %v4070_v1 }
 0x323   :  { %v6354_v0 = vadd.f32 %v3131_v51, %v6760_v16  ;;  %v2088_v1 = vunpack.c.l.b16 %v1715_v27 }
 0x324   :  { %v4080_v17 = vrot.slane %v4079_v56, 4  ;;  %v2700_v23 = vpop.f32.mrf.mxu0  ;;  %v4455_v53 = vsel %vm4438_vm14, %v4071_v11, %v4454_v4  ;;  %v6762_v11 = vld [vmem:[#allocation12_spill] sm:$0xff] }
 0x325   :  { %v3029_v47 = vpop.f32.mrf.mxu1  ;;  %v3590_v62 = vpop.f32.mrf.mxu2  ;;  %v4456_v36 = vsel %vm4440_vm0, %v4078_v32, %v4455_v53 }
 0x326   :  { %v4081_v24 = vmax.f32 %v4079_v56, %v4080_v17  ;;  %v1714_v56 = vpack.c.bf16 %v4696_v63, %v4695_v12  ;;  %v3591_v51 = vadd.f32 %v6257_v19, %v3590_v62  ;;  %v3030_v13 = vadd.f32 %v3029_v47, %v2700_v23  ;;  %v592_v23 = vpop.permute.xlu0 %591  ;;  %v6761_v47 = vld [vmem:[#allocation10_spill] sm:$0xff]  ;;  %v598_v32 = vpop.permute.xlu1 %597 }
 0x327   :  { %2739 = vmatmul.bf16.gmra.mxu0 %v2256_v42  ;;  %3173 = vmatmul.bf16.gmra.mxu3 %v5987_v7  ;;  %v2089_v62 = vunpack.c.h.b16 %v1715_v27  ;;  %vm1036_vm5 = vcmp.eq.s32.totalorder %v598_v32, %v5190_v35  ;;  %vm1037_vm6 = vcmp.eq.s32.totalorder %v598_v32, %v5194_v37  ;;  %vm1034_vm8 = vcmp.eq.s32.totalorder %v592_v23, %v5190_v35 }
 0x328   :  { %v4082_v9 = vrot.slane %v4081_v24, 2  ;;  %3068 = vmatmul.bf16.gmra.mxu1 %v2257_v33  ;;  %v3838_v21 = vmax.f32 %v3591_v51, 0.0  ;;  %vm1035_vm9 = vcmp.eq.s32.totalorder %v592_v23, %v5194_v37  ;;  %v4701_v51 = vsel %vm1036_vm5, 1.0, %v6750_v43 }
 0x329   :  { %v4699_v53 = vsel %vm1034_vm8, 1.0, %v6750_v43 }
 0x32a   :  { %v4083_v57 = vmax.f32 %v4081_v24, %v4082_v9  ;;  %v3134_v22 = vpop.f32.mrf.mxu3  ;;  %v2086_v24 = vunpack.c.l.b16 %v1714_v56  ;;  %v2087_v9 = vunpack.c.h.b16 %v1714_v56 }
 0x32b   :  { %v6378_v63 = vadd.f32 %v3134_v22, %v6761_v47 }
 0x32c   :  { %v4084_v7 = vrot.slane %v4083_v57, 1  ;;  %v2702_v14 = vpop.f32.mrf.mxu0  ;;  %v2259_v22 = vpack.c.b16 %v2089_v62, %v2087_v9 }
 0x32d   :  { %v3031_v16 = vpop.f32.mrf.mxu1  ;;  %v3592_v42 = vpop.f32.mrf.mxu2 }
 0x32e   :  { %v4085_v17 = vmax.f32 %v4083_v57, %v4084_v7  ;;  %v3032_v33 = vadd.f32 %v3031_v16, %v2702_v14  ;;  %v3593_v30 = vadd.f32 %v6257_v19, %v3592_v42  ;;  %v4702_v14 = vsel %vm1037_vm6, 1.0, %v6750_v43 }
 0x32f   :  { %v4700_v16 = vsel %vm1035_vm9, 1.0, %v6750_v43 }
 0x330   :  { %v4457_v10 = vsel %vm4442_vm1, %v4085_v17, %v4456_v36  ;;  %v3217_v26 = vpack.c.bf16 %v3032_v33, %v3030_v13  ;;  %v3839_v18 = vmax.f32 %v3593_v30, 0.0  ;;  %v2258_v13 = vpack.c.b16 %v2088_v1, %v2086_v24 }
 0x331   :  { %4503 = vst [vmem:[#allocation2 + $0x10] sm:$0xff] %v4457_v10  ;;  %v1717_v33 = vpack.c.bf16 %v4702_v14, %v4701_v51  ;;  %v1716_v30 = vpack.c.bf16 %v4700_v16, %v4699_v53  ;;  %v611_v14 = vpop.permute.xlu1 %610 }
 0x332   :  { %v4086_v39 = vmax.f32 %v3838_v21, %v3839_v18  ;;  %4888 = vmatmul.msk.bf16.gmra.mxu2 %vm3268_vm12, %v3217_v26  ;;  %v3136_v12 = vpop.f32.mrf.mxu3  ;;  %vm1040_vm2 = vcmp.eq.s32.totalorder %v611_v14, %v5190_v35  ;;  %vm1041_vm4 = vcmp.eq.s32.totalorder %v611_v14, %v5194_v37 }
 0x333   :  { %v6381_v57 = vadd.f32 %v3136_v12, %v6762_v11  ;;  %v2092_v62 = vunpack.c.l.b16 %v1717_v33  ;;  %v2093_v9 = vunpack.c.h.b16 %v1717_v33  ;;  %v2090_v12 = vunpack.c.l.b16 %v1716_v30 }
 0x334   :  { %v2705_v4 = vpop.f32.mrf.mxu0  ;;  %v4087_v42 = vrot.slane %v4086_v39, 4  ;;  %v2091_v32 = vunpack.c.h.b16 %v1716_v30 }
 0x335   :  { %v3238_v27 = vpack.c.bf16 %v6381_v57, %v6378_v63  ;;  %v3034_v56 = vpop.f32.mrf.mxu1  ;;  %v3595_v7 = vpop.f32.mrf.mxu2 }
 0x336   :  { %v3596_v36 = vadd.f32 %v6257_v19, %v3595_v7  ;;  %v4088_v24 = vmax.f32 %v4086_v39, %v4087_v42  ;;  %v2261_v42 = vpack.c.b16 %v2093_v9, %v2091_v32 }
 0x337   :  { %2744 = vmatmul.bf16.gmra.mxu0 %v2258_v13  ;;  %3178 = vmatmul.bf16.gmra.mxu3 %v6044_v60  ;;  %v3035_v60 = vadd.f32 %v3034_v56, %v2705_v4  ;;  %v2260_v56 = vpack.c.b16 %v2092_v62, %v2090_v12 }
 0x338   :  { %3073 = vmatmul.bf16.gmra.mxu1 %v2259_v22  ;;  %v3840_v23 = vmax.f32 %v3596_v36, 0.0  ;;  %v4089_v13 = vrot.slane %v4088_v24, 2  ;;  %v605_v22 = vpop.permute.xlu2 %604 }
 0x339   :  { %vm1038_vm10 = vcmp.eq.s32.totalorder %v605_v22, %v5190_v35  ;;  %vm1039_vm11 = vcmp.eq.s32.totalorder %v605_v22, %v5194_v37 }
 0x33a   :  { %v3139_v17 = vpop.f32.mrf.mxu3  ;;  %v4090_v33 = vmax.f32 %v4088_v24, %v4089_v13  ;;  %v4703_v36 = vsel %vm1038_vm10, 1.0, %v6750_v43  ;;  %v4704_v24 = vsel %vm1039_vm11, 1.0, %v6750_v43 }
 0x33b   :  { %v6398_v7 = vadd.f32 %v3139_v17, %v5992_v38  ;;  %v1718_v62 = vpack.c.bf16 %v4704_v24, %v4703_v36  ;;  %v624_v24 = vpop.permute.xlu0 %623 }
 0x33c   :  { %v2707_v1 = vpop.f32.mrf.mxu0  ;;  %vm1044_vm8 = vcmp.eq.s32.totalorder %v624_v24, %v5190_v35  ;;  %vm1045_vm9 = vcmp.eq.s32.totalorder %v624_v24, %v5194_v37 }
 0x33d   :  { %v3036_v10 = vpop.f32.mrf.mxu1  ;;  %v3597_v21 = vpop.f32.mrf.mxu2  ;;  %v2095_v36 = vunpack.c.h.b16 %v1718_v62 }
 0x33e   :  { %v3037_v26 = vadd.f32 %v3036_v10, %v2707_v1  ;;  %v3598_v18 = vadd.f32 %v6257_v19, %v3597_v21  ;;  %v4705_v10 = vsel %vm1040_vm2, 1.0, %v6750_v43  ;;  %v4706_v21 = vsel %vm1041_vm4, 1.0, %v6750_v43 }
 0x33f   :  { %v1719_v9 = vpack.c.bf16 %v4706_v21, %v4705_v10 }
 0x340   :  { %v3218_v47 = vpack.c.bf16 %v3037_v26, %v3035_v60  ;;  %v3841_v11 = vmax.f32 %v3598_v18, 0.0  ;;  %v4091_v60 = vrot.slane %v4090_v33, 1 }
 0x341   :  { %v2096_v14 = vunpack.c.l.b16 %v1719_v9 }
 0x342   :  { %v4093_v51 = vmax.f32 %v3840_v23, %v3841_v11  ;;  %4889 = vmatmul.msk.bf16.gmra.mxu2 %vm3268_vm12, %v3218_v47  ;;  %v3141_v39 = vpop.f32.mrf.mxu3  ;;  %v4092_v44 = vmax.f32 %v4090_v33, %v4091_v60 }
 0x343   :  { %v6401_v4 = vadd.f32 %v3141_v39, %v6022_v48 }
 0x344   :  { %v4094_v53 = vrot.slane %v4093_v51, 4  ;;  %v2710_v16 = vpop.f32.mrf.mxu0 }
 0x345   :  { %v3239_v38 = vpack.c.bf16 %v6401_v4, %v6398_v7  ;;  %v3039_v17 = vpop.f32.mrf.mxu1  ;;  %v3600_v30 = vpop.f32.mrf.mxu2 }
 0x346   :  { %v4095_v48 = vmax.f32 %v4093_v51, %v4094_v53  ;;  %v3601_v23 = vadd.f32 %v6257_v19, %v3600_v30  ;;  %v3040_v32 = vadd.f32 %v3039_v17, %v2710_v16  ;;  %v2094_v51 = vunpack.c.l.b16 %v1718_v62 }
 0x347   :  { %2749 = vmatmul.bf16.gmra.mxu0 %v2260_v56  ;;  %4905 = vmatmul.msk.bf16.vlgmr.msra.gmra.mxu3 %vm3268_vm12, %v3234_v55 }
 0x348   :  { %v4096_v1 = vrot.slane %v4095_v48, 2  ;;  %3078 = vmatmul.bf16.gmra.mxu1 %v2261_v42  ;;  %v3842_v56 = vmax.f32 %v3601_v23, 0.0  ;;  %v2262_v60 = vpack.c.b16 %v2096_v14, %v2094_v51 }
 0x34a   :  { %v4097_v26 = vmax.f32 %v4095_v48, %v4096_v1  ;;  %v3144_v18 = vpop.f32.mrf.mxu3  ;;  %v618_v48 = vpop.permute.xlu2 %617  ;;  %v2097_v1 = vunpack.c.h.b16 %v1719_v9 }
 0x34b   :  { %v6422_v16 = vadd.f32 %v3144_v18, %v6038_v5  ;;  %vm1042_vm5 = vcmp.eq.s32.totalorder %v618_v48, %v5190_v35  ;;  %vm1043_vm6 = vcmp.eq.s32.totalorder %v618_v48, %v5194_v37 }
 0x34c   :  { %v4098_v12 = vrot.slane %v4097_v26, 1  ;;  %v2712_v47 = vpop.f32.mrf.mxu0  ;;  %v2263_v9 = vpack.c.b16 %v2097_v1, %v2095_v36 }
 0x34d   :  { %v3041_v20 = vpop.f32.mrf.mxu1  ;;  %v3602_v55 = vpop.f32.mrf.mxu2 }
 0x34e   :  { %v4099_v11 = vmax.f32 %v4097_v26, %v4098_v12  ;;  %v3042_v13 = vadd.f32 %v3041_v20, %v2712_v47  ;;  %v3603_v22 = vadd.f32 %v6257_v19, %v3602_v55  ;;  %v6763_v12 = vpack.c.bf16 %v6309_v6, %v6306_v3 }
 0x34f   :  { %v4708_v47 = vsel %vm1043_vm6, 1.0, %v6750_v43  ;;  %v4710_v20 = vsel %vm1045_vm9, 1.0, %v6750_v43 }
 0x350   :  { %v4458_v39 = vsel %vm4430_vm3, %v4099_v11, %v4092_v44  ;;  %v3219_v53 = vpack.c.bf16 %v3042_v13, %v3040_v32  ;;  %v3843_v42 = vmax.f32 %v3603_v22, 0.0  ;;  %v4709_v44 = vsel %vm1044_vm8, 1.0, %v6750_v43 }
 0x351   :  { %v1721_v13 = vpack.c.bf16 %v4710_v20, %v4709_v44 }
 0x352   :  { %v4100_v30 = vmax.f32 %v3842_v56, %v3843_v42  ;;  %4890 = vmatmul.msk.bf16.gmra.mxu2 %vm3268_vm12, %v3219_v53  ;;  %v3146_v33 = vpop.f32.mrf.mxu3 }
 0x353   :  { %v6425_v17 = vadd.f32 %v3146_v33, %v6057_v49  ;;  %v4707_v49 = vsel %vm1042_vm5, 1.0, %v6750_v43  ;;  %v2100_v1 = vunpack.c.l.b16 %v1721_v13 }
 0x354   :  { %v4101_v10 = vrot.slane %v4100_v30, 4  ;;  %v2715_v21 = vpop.f32.mrf.mxu0  ;;  %v1720_v32 = vpack.c.bf16 %v4708_v47, %v4707_v49 }
 0x355   :  { %v3240_v26 = vpack.c.bf16 %v6425_v17, %v6422_v16  ;;  %v3044_v62 = vpop.f32.mrf.mxu1  ;;  %v3605_v5 = vpop.f32.mrf.mxu2 }
 0x356   :  { %v4102_v18 = vmax.f32 %v4100_v30, %v4101_v10  ;;  %v3606_v51 = vadd.f32 %v6257_v19, %v3605_v5  ;;  %v3045_v53 = vadd.f32 %v3044_v62, %v2715_v21  ;;  %v2098_v36 = vunpack.c.l.b16 %v1720_v32  ;;  %v637_v62 = vpop.permute.xlu2 %636 }
 0x357   :  { %2754 = vmatmul.bf16.gmra.mxu0 %v2262_v60  ;;  %4906 = vmatmul.msk.bf16.gmra.mxu3 %vm3268_vm12, %v6763_v12  ;;  %v2099_v60 = vunpack.c.h.b16 %v1720_v32  ;;  %vm1048_vm10 = vcmp.eq.s32.totalorder %v637_v62, %v5190_v35  ;;  %vm1049_vm11 = vcmp.eq.s32.totalorder %v637_v62, %v5194_v37  ;;  %v6764_v32 = vpack.c.bf16 %v6334_v45, %v6331_v2 }
 0x358   :  { %v4103_v23 = vrot.slane %v4102_v18, 2  ;;  %3083 = vmatmul.bf16.gmra.mxu1 %v2263_v9  ;;  %v3844_v24 = vmax.f32 %v3606_v51, 0.0  ;;  %v2264_v47 = vpack.c.b16 %v2100_v1, %v2098_v36 }
 0x35a   :  { %v4104_v55 = vmax.f32 %v4102_v18, %v4103_v23  ;;  %v3149_v11 = vpop.f32.mrf.mxu3  ;;  %v2101_v18 = vunpack.c.h.b16 %v1721_v13 }
 0x35b   :  { %v6446_v49 = vadd.f32 %v3149_v11, %v6069_v29  ;;  %v4713_v11 = vsel %vm1048_vm10, 1.0, %v6750_v43 }
 0x35c   :  { %v4105_v22 = vrot.slane %v4104_v55, 1  ;;  %v2717_v14 = vpop.f32.mrf.mxu0 }
 0x35d   :  { %v3046_v56 = vpop.f32.mrf.mxu1  ;;  %v3607_v3 = vpop.f32.mrf.mxu2 }
 0x35e   :  { %v4106_v6 = vmax.f32 %v4104_v55, %v4105_v22  ;;  %v3047_v42 = vadd.f32 %v3046_v56, %v2717_v14  ;;  %v3608_v48 = vadd.f32 %v6257_v19, %v3607_v3  ;;  %v4714_v22 = vsel %vm1049_vm11, 1.0, %v6750_v43 }
 0x360   :  { %v4459_v30 = vsel %vm4432_vm15, %v4106_v6, %v4458_v39  ;;  %v3220_v33 = vpack.c.bf16 %v3047_v42, %v3045_v53  ;;  %v3845_v10 = vmax.f32 %v3608_v48, 0.0  ;;  %v631_v39 = vpop.permute.xlu1 %630  ;;  %v1723_v6 = vpack.c.bf16 %v4714_v22, %v4713_v11 }
 0x361   :  { %vm1046_vm2 = vcmp.eq.s32.totalorder %v631_v39, %v5190_v35  ;;  %vm1047_vm4 = vcmp.eq.s32.totalorder %v631_v39, %v5194_v37  ;;  %v650_v39 = vpop.permute.xlu2 %649 }
 0x362   :  { %v4107_v9 = vmax.f32 %v3844_v24, %v3845_v10  ;;  %4891 = vmatmul.msk.bf16.gmra.mxu2 %vm3268_vm12, %v3220_v33  ;;  %v3151_v5 = vpop.f32.mrf.mxu3  ;;  %v4711_v51 = vsel %vm1046_vm2, 1.0, %v6750_v43  ;;  %v4712_v14 = vsel %vm1047_vm4, 1.0, %v6750_v43  ;;  %v2104_v33 = vunpack.c.l.b16 %v1723_v6 }
 0x363   :  { %v6449_v21 = vadd.f32 %v3151_v5, %v6079_v28  ;;  %v2265_v28 = vpack.c.b16 %v2101_v18, %v2099_v60  ;;  %v1722_v53 = vpack.c.bf16 %v4712_v14, %v4711_v51  ;;  %v2105_v18 = vunpack.c.h.b16 %v1723_v6 }
 0x364   :  { %v4108_v12 = vrot.slane %v4107_v9, 4  ;;  %v2720_v23 = vpop.f32.mrf.mxu0  ;;  %vm1052_vm5 = vcmp.eq.s32.totalorder %v650_v39, %v5190_v35  ;;  %vm1053_vm6 = vcmp.eq.s32.totalorder %v650_v39, %v5194_v37 }
 0x365   :  { %v3241_v44 = vpack.c.bf16 %v6449_v21, %v6446_v49  ;;  %v3049_v20 = vpop.f32.mrf.mxu1  ;;  %v6454_v55 = vpop.f32.mrf.mxu2  ;;  %v2102_v10 = vunpack.c.l.b16 %v1722_v53 }
 0x366   :  { %v4109_v29 = vmax.f32 %v4107_v9, %v4108_v12  ;;  %v3050_v2 = vadd.f32 %v3049_v20, %v2720_v23  ;;  %v2103_v9 = vunpack.c.h.b16 %v1722_v53  ;;  %v3611_v39 = vadd.f32 %v6257_v19, %v6454_v55 }
 0x367   :  { %2759 = vmatmul.bf16.gmra.mxu0 %v2264_v47  ;;  %4907 = vmatmul.msk.bf16.gmra.mxu3 %vm3268_vm12, %v6764_v32  ;;  %v2266_v23 = vpack.c.b16 %v2104_v33, %v2102_v10 }
 0x368   :  { %v4110_v13 = vrot.slane %v4109_v29, 2  ;;  %3088 = vmatmul.bf16.gmra.mxu1 %v2265_v28  ;;  %v644_v20 = vpop.permute.xlu1 %643  ;;  %v2267_v28 = vpack.c.b16 %v2105_v18, %v2103_v9  ;;  %v3846_v57 = vmax.f32 %v3611_v39, 0.0 }
 0x369   :  { %vm1050_vm8 = vcmp.eq.s32.totalorder %v644_v20, %v5190_v35  ;;  %vm1051_vm9 = vcmp.eq.s32.totalorder %v644_v20, %v5194_v37 }
 0x36a   :  { %v4111_v56 = vmax.f32 %v4109_v29, %v4110_v13  ;;  %v3154_v3 = vpop.f32.mrf.mxu3  ;;  %v4718_v13 = vsel %vm1053_vm6, 1.0, %v6750_v43  ;;  %v4715_v22 = vsel %vm1050_vm8, 1.0, %v6750_v43  ;;  %v4716_v51 = vsel %vm1051_vm9, 1.0, %v6750_v43 }
 0x36b   :  { %v6472_v12 = vadd.f32 %v3154_v3, %v6091_v25  ;;  %v6765_v25 = vpack.c.bf16 %v6354_v0, %v6351_v58  ;;  %v1724_v3 = vpack.c.bf16 %v4716_v51, %v4715_v22 }
 0x36c   :  { %v4112_v42 = vrot.slane %v4111_v56, 1  ;;  %v2722_v48 = vpop.f32.mrf.mxu0 }
 0x36d   :  { %v3051_v36 = vpop.f32.mrf.mxu1  ;;  %v3612_v1 = vpop.f32.mrf.mxu2 }
 0x36e   :  { %v4113_v24 = vmax.f32 %v4111_v56, %v4112_v42  ;;  %v3052_v45 = vadd.f32 %v3051_v36, %v2722_v48  ;;  %v2106_v48 = vunpack.c.l.b16 %v1724_v3 }
 0x370   :  { %v6468_v60 = vsel %vm4434_vm7, %v4113_v24, %v4459_v30  ;;  %v3221_v5 = vpack.c.bf16 %v3052_v45, %v3050_v2  ;;  %v2107_v24 = vunpack.c.h.b16 %v1724_v3  ;;  %v6766_v3 = vld [vmem:[#allocation13_spill] sm:$0xff] }
 0x372   :  { %4892 = vmatmul.msk.bf16.gmra.mxu2 %vm3268_vm12, %v3221_v5  ;;  %v3156_v62 = vpop.f32.mrf.mxu3 }
 0x373   :  { %v6475_v47 = vadd.f32 %v3156_v62, %v6099_v8  ;;  %v4717_v8 = vsel %vm1052_vm5, 1.0, %v6750_v43 }
 0x374   :  { %v2725_v29 = vpop.f32.mrf.mxu0  ;;  %v1725_v35 = vpack.c.bf16 %v4718_v13, %v4717_v8 }
 0x375   :  { %v3242_v30 = vpack.c.bf16 %v6475_v47, %v6472_v12  ;;  %v3054_v11 = vpop.f32.mrf.mxu1  ;;  %v3615_v32 = vpop.f32.mrf.mxu2 }
 0x376   :  { %v3055_v53 = vadd.f32 %v3054_v11, %v2725_v29  ;;  %v2108_v0 = vunpack.c.l.b16 %v1725_v35  ;;  %v2109_v36 = vunpack.c.h.b16 %v1725_v35  ;;  %v3616_v20 = vadd.f32 %v6257_v19, %v3615_v32 }
 0x377   :  { %2764 = vmatmul.bf16.gmra.mxu0 %v2266_v23  ;;  %4908 = vmatmul.msk.bf16.gmra.mxu3 %vm3268_vm12, %v6765_v25 }
 0x378   :  { %3093 = vmatmul.bf16.gmra.mxu1 %v2267_v28  ;;  %v2268_v5 = vpack.c.b16 %v2108_v0, %v2106_v48  ;;  %v2269_v62 = vpack.c.b16 %v2109_v36, %v2107_v24  ;;  %v3848_v22 = vmax.f32 %v3616_v20, 0.0 }
 0x37a   :  { %v3159_v14 = vpop.f32.mrf.mxu3 }
 0x37b   :  { %v6493_v45 = vadd.f32 %v3159_v14, %v6118_v50  ;;  %v3613_v50 = vadd.f32 %v6257_v19, %v3612_v1 }
 0x37c   :  { %v2727_v56 = vpop.f32.mrf.mxu0 }
 0x37d   :  { %v3056_v37 = vpop.f32.mrf.mxu1  ;;  %v3617_v6 = vpop.f32.mrf.mxu2  ;;  %v3847_v29 = vmax.f32 %v3613_v50, 0.0  ;;  %v6527_v50 = vld [vmem:[%s6739_s3] ss:$0 sm:$0xff]  ;;  %s5069_s3 = smov [#allocation2]  }
 0x37e   :  { %v3057_v42 = vadd.f32 %v3056_v37, %v2727_v56  ;;  %s4513_s20 = sshll.u32 %s5069_s3, 4  ;;  %s4514_s20 = int_to_ptr.vmem [resolvable:$true] %s4513_s20 }
 0x37f   :  { %v4114_v51 = vmax.f32 %v3846_v57, %v3847_v29 }
 0x380   :  { %v3222_v58 = vpack.c.bf16 %v3057_v42, %v3055_v53  ;;  %v6767_v53 = vld [vmem:[#allocation14_spill] sm:$0xff] }
 0x382   :  { %4893 = vmatmul.msk.bf16.gmra.mxu2 %vm3268_vm12, %v3222_v58  ;;  %v3161_v2 = vpop.f32.mrf.mxu3  ;;  %v4115_v58 = vrot.slane %v4114_v51, 4 }
 0x383   :  { %v6496_v43 = vadd.f32 %v3161_v2, %v6125_v52  ;;  %v3618_v52 = vadd.f32 %v6257_v19, %v3617_v6 }
 0x384   :  { %v2730_v33 = vpop.f32.mrf.mxu0 }
 0x385   :  { %v3243_v10 = vpack.c.bf16 %v6496_v43, %v6493_v45  ;;  %v3059_v18 = vpop.f32.mrf.mxu1  ;;  %v3620_v9 = vpop.f32.mrf.mxu2  ;;  %v3849_v11 = vmax.f32 %v3618_v52, 0.0 }
 0x386   :  { %v3621_v25 = vadd.f32 %v6257_v19, %v3620_v9 }
 0x387   :  { %2769 = vmatmul.bf16.gmra.mxu0 %v2268_v5  ;;  %4909 = vmatmul.msk.bf16.gmra.mxu3 %vm3268_vm12, %v3238_v27  ;;  %v3060_v27 = vadd.f32 %v3059_v18, %v2730_v33  ;;  %v4121_v55 = vmax.f32 %v3848_v22, %v3849_v11  ;;  %v4116_v33 = vmax.f32 %v4114_v51, %v4115_v58  ;;  %v6768_v22 = vld [vmem:[#allocation15_spill] sm:$0xff] }
 0x388   :  { %3098 = vmatmul.bf16.gmra.mxu1 %v2269_v62  ;;  %v3850_v35 = vmax.f32 %v3621_v25, 0.0 }
 0x389   :  { %v4122_v48 = vrot.slane %v4121_v55, 4  ;;  %v4117_v62 = vrot.slane %v4116_v33, 2 }
 0x38a   :  { %v3164_v23 = vpop.f32.mrf.mxu3 }
 0x38b   :  { %v6513_v37 = vadd.f32 %v3164_v23, %v6766_v3  ;;  %v4123_v18 = vmax.f32 %v4121_v55, %v4122_v48  ;;  %v4118_v11 = vmax.f32 %v4116_v33, %v4117_v62 }
 0x38c   :  { %v2732_v28 = vpop.f32.mrf.mxu0 }
 0x38d   :  { %v3061_v8 = vpop.f32.mrf.mxu1  ;;  %v3622_v63 = vpop.f32.mrf.mxu2  ;;  %v4124_v23 = vrot.slane %v4123_v18, 2 }
 0x38e   :  { %v3062_v13 = vadd.f32 %v3061_v8, %v2732_v28  ;;  %v3623_v1 = vadd.f32 %v6257_v19, %v3622_v63 }
 0x38f   :  { %v4125_v57 = vmax.f32 %v4123_v18, %v4124_v23 }
 0x390   :  { %v3223_v14 = vpack.c.bf16 %v3062_v13, %v3060_v27  ;;  %v3851_v56 = vmax.f32 %v3623_v1, 0.0 }
 0x392   :  { %4894 = vmatmul.msk.bf16.gmra.mxu2 %vm3268_vm12, %v3223_v14  ;;  %v3166_v32 = vpop.f32.mrf.mxu3  ;;  %v4128_v6 = vmax.f32 %v3850_v35, %v3851_v56  ;;  %v4119_v56 = vrot.slane %v4118_v11, 1 }
 0x393   :  { %v6516_v42 = vadd.f32 %v3166_v32, %v6767_v53  ;;  %v4126_v32 = vrot.slane %v4125_v57, 1 }
 0x394   :  { %v2735_v0 = vpop.f32.mrf.mxu0  ;;  %v4129_v2 = vrot.slane %v4128_v6, 4  ;;  %v4120_v48 = vmax.f32 %v4118_v11, %v4119_v56 }
 0x395   :  { %v3244_v19 = vpack.c.bf16 %v6516_v42, %v6513_v37  ;;  %v3064_v36 = vpop.f32.mrf.mxu1  ;;  %v3625_v24 = vpop.f32.mrf.mxu2 }
 0x396   :  { %v4130_v5 = vmax.f32 %v4128_v6, %v4129_v2  ;;  %v3626_v52 = vadd.f32 %v6527_v50, %v3625_v24  ;;  %v3065_v28 = vadd.f32 %v3064_v36, %v2735_v0  ;;  %v4461_v18 = vsel %vm4436_vm13, %v4120_v48, %v6468_v60 }
 0x397   :  { %4910 = vmatmul.msk.bf16.gmra.mxu3 %vm3268_vm12, %v3239_v38 }
 0x398   :  { %v4131_v38 = vrot.slane %v4130_v5, 2  ;;  %v3852_v25 = vmax.f32 %v3626_v52, 0.0 }
 0x39a   :  { %v3169_v9 = vpop.f32.mrf.mxu3  ;;  %v4132_v1 = vmax.f32 %v4130_v5, %v4131_v38 }
 0x39b   :  { %v6533_v51 = vadd.f32 %v3169_v9, %v6768_v22 }
 0x39c   :  { %v2737_v39 = vpop.f32.mrf.mxu0  ;;  %v4133_v0 = vrot.slane %v4132_v1, 1 }
 0x39d   :  { %v3066_v20 = vpop.f32.mrf.mxu1  ;;  %v3627_v29 = vpop.f32.mrf.mxu2 }
 0x39e   :  { %v3067_v7 = vadd.f32 %v3066_v20, %v2737_v39  ;;  %v3628_v4 = vadd.f32 %v6527_v50, %v3627_v29  ;;  %v4134_v33 = vmax.f32 %v4132_v1, %v4133_v0 }
 0x3a0   :  { %v3224_v8 = vpack.c.bf16 %v3067_v7, %v3065_v28  ;;  %v3853_v63 = vmax.f32 %v3628_v4, 0.0 }
 0x3a2   :  { %v4135_v27 = vmax.f32 %v3852_v25, %v3853_v63  ;;  %4895 = vmatmul.msk.bf16.gmra.mxu2 %vm3268_vm12, %v3224_v8  ;;  %v3171_v13 = vpop.f32.mrf.mxu3 }
 0x3a3   :  { %v6536_v14 = vadd.f32 %v3171_v13, %v6175_v40  ;;  %v4127_v40 = vmax.f32 %v4125_v57, %v4126_v32 }
 0x3a4   :  { %v4136_v55 = vrot.slane %v4135_v27, 4  ;;  %v2740_v35 = vpop.f32.mrf.mxu0 }
 0x3a5   :  { %v3245_v3 = vpack.c.bf16 %v6536_v14, %v6533_v51  ;;  %v3069_v6 = vpop.f32.mrf.mxu1  ;;  %v3630_v53 = vpop.f32.mrf.mxu2  ;;  %v4462_v52 = vsel %vm4438_vm14, %v4127_v40, %v4461_v18 }
 0x3a6   :  { %v4137_v58 = vmax.f32 %v4135_v27, %v4136_v55  ;;  %v3631_v5 = vadd.f32 %v6527_v50, %v3630_v53  ;;  %v3070_v17 = vadd.f32 %v3069_v6, %v2740_v35  ;;  %v4463_v29 = vsel %vm4440_vm0, %v4134_v33, %v4462_v52 }
 0x3a7   :  { %4911 = vmatmul.msk.bf16.gmra.mxu3 %vm3268_vm12, %v3240_v26 }
 0x3a8   :  { %v4138_v36 = vrot.slane %v4137_v58, 2  ;;  %v3854_v7 = vmax.f32 %v3631_v5, 0.0 }
 0x3aa   :  { %v4139_v24 = vmax.f32 %v4137_v58, %v4138_v36  ;;  %v3174_v2 = vpop.f32.mrf.mxu3 }
 0x3ab   :  { %v6553_v25 = vadd.f32 %v3174_v2, %v6183_v61 }
 0x3ac   :  { %v4140_v9 = vrot.slane %v4139_v24, 1  ;;  %v2742_v62 = vpop.f32.mrf.mxu0 }
 0x3ad   :  { %v3071_v39 = vpop.f32.mrf.mxu1  ;;  %v3632_v23 = vpop.f32.mrf.mxu2 }
 0x3ae   :  { %v4141_v16 = vmax.f32 %v4139_v24, %v4140_v9  ;;  %v3072_v26 = vadd.f32 %v3071_v39, %v2742_v62  ;;  %v3633_v20 = vadd.f32 %v6527_v50, %v3632_v23 }
 0x3b0   :  { %v4464_v28 = vsel %vm4442_vm1, %v4141_v16, %v4463_v29  ;;  %v3225_v4 = vpack.c.bf16 %v3072_v26, %v3070_v17  ;;  %v3855_v60 = vmax.f32 %v3633_v20, 0.0 }
 0x3b1   :  { %4504 = vst [vmem:[#allocation2 + $0x18] sm:$0xff] %v4464_v28 }
 0x3b2   :  { %v4142_v38 = vmax.f32 %v3854_v7, %v3855_v60  ;;  %4896 = vmatmul.msk.bf16.gmra.mxu2 %vm3268_vm12, %v3225_v4  ;;  %v3176_v11 = vpop.f32.mrf.mxu3 }
 0x3b3   :  { %v6556_v8 = vadd.f32 %v3176_v11, %v6201_v54 }
 0x3b4   :  { %v2745_v63 = vpop.f32.mrf.mxu0  ;;  %v4143_v1 = vrot.slane %v4142_v38, 4 }
 0x3b5   :  { %v3246_v57 = vpack.c.bf16 %v6556_v8, %v6553_v25  ;;  %v3074_v27 = vpop.f32.mrf.mxu1  ;;  %v3635_v13 = vpop.f32.mrf.mxu2 }
 0x3b6   :  { %v3636_v56 = vadd.f32 %v6527_v50, %v3635_v13  ;;  %v4144_v55 = vmax.f32 %v4142_v38, %v4143_v1  ;;  %v3075_v32 = vadd.f32 %v3074_v27, %v2745_v63 }
 0x3b7   :  { %4912 = vmatmul.msk.bf16.gmra.mxu3 %vm3268_vm12, %v3241_v44 }
 0x3b8   :  { %v3856_v58 = vmax.f32 %v3636_v56, 0.0  ;;  %v4145_v36 = vrot.slane %v4144_v55, 2 }
 0x3ba   :  { %v3179_v22 = vpop.f32.mrf.mxu3  ;;  %v4146_v33 = vmax.f32 %v4144_v55, %v4145_v36 }
 0x3bb   :  { %v6568_v21 = vadd.f32 %v3179_v22, %v6214_v41 }
 0x3bc   :  { %v2747_v61 = vpop.f32.mrf.mxu0  ;;  %v4147_v41 = vrot.slane %v4146_v33, 1 }
 0x3bd   :  { %v3076_v35 = vpop.f32.mrf.mxu1  ;;  %v3637_v54 = vpop.f32.mrf.mxu2 }
 0x3be   :  { %v3077_v6 = vadd.f32 %v3076_v35, %v2747_v61  ;;  %v3638_v53 = vadd.f32 %v6527_v50, %v3637_v54  ;;  %v4148_v26 = vmax.f32 %v4146_v33, %v4147_v41 }
 0x3c0   :  { %v3226_v0 = vpack.c.bf16 %v3077_v6, %v3075_v32  ;;  %v3857_v48 = vmax.f32 %v3638_v53, 0.0 }
 0x3c2   :  { %v4149_v40 = vmax.f32 %v3856_v58, %v3857_v48  ;;  %4897 = vmatmul.msk.bf16.gmra.mxu2 %vm3268_vm12, %v3226_v0  ;;  %v3181_v49 = vpop.f32.mrf.mxu3 }
 0x3c3   :  { %v6571_v44 = vadd.f32 %v3181_v49, %v6220_v15 }
 0x3c4   :  { %v4150_v24 = vrot.slane %v4149_v40, 4  ;;  %v2750_v2 = vpop.f32.mrf.mxu0 }
 0x3c5   :  { %v3247_v18 = vpack.c.bf16 %v6571_v44, %v6568_v21  ;;  %v3079_v9 = vpop.f32.mrf.mxu1  ;;  %v3640_v5 = vpop.f32.mrf.mxu2 }
 0x3c6   :  { %v4151_v62 = vmax.f32 %v4149_v40, %v4150_v24  ;;  %v3641_v16 = vadd.f32 %v6527_v50, %v3640_v5  ;;  %v3080_v7 = vadd.f32 %v3079_v9, %v2750_v2 }
 0x3c7   :  { %4913 = vmatmul.msk.bf16.gmra.mxu3 %vm3268_vm12, %v3242_v30 }
 0x3c8   :  { %v4152_v52 = vrot.slane %v4151_v62, 2  ;;  %v3858_v47 = vmax.f32 %v3641_v16, 0.0 }
 0x3ca   :  { %v4153_v39 = vmax.f32 %v4151_v62, %v4152_v52  ;;  %v3720_v23 = vpop.f32.mrf.mxu3 }
 0x3cb   :  { %v3721_v11 = vadd.f32 %v6527_v50, %v3720_v23 }
 0x3cc   :  { %v4154_v15 = vrot.slane %v4153_v39, 1  ;;  %v2752_v17 = vpop.f32.mrf.mxu0 }
 0x3cd   :  { %v3081_v20 = vpop.f32.mrf.mxu1  ;;  %v3642_v29 = vpop.f32.mrf.mxu2  ;;  %v3890_v56 = vmax.f32 %v3721_v11, 0.0 }
 0x3ce   :  { %v4155_v28 = vmax.f32 %v4153_v39, %v4154_v15  ;;  %v3082_v4 = vadd.f32 %v3081_v20, %v2752_v17  ;;  %v3643_v60 = vadd.f32 %v6527_v50, %v3642_v29 }
 0x3d0   :  { %v4465_v12 = vsel %vm4430_vm3, %v4155_v28, %v4148_v26  ;;  %v3227_v30 = vpack.c.bf16 %v3082_v4, %v3080_v7  ;;  %v3859_v38 = vmax.f32 %v3643_v60, 0.0 }
 0x3d2   :  { %v4156_v63 = vmax.f32 %v3858_v47, %v3859_v38  ;;  %4898 = vmatmul.msk.bf16.gmra.mxu2 %vm3268_vm12, %v3227_v30  ;;  %v3722_v27 = vpop.f32.mrf.mxu3 }
 0x3d3   :  { %v3723_v13 = vadd.f32 %v6527_v50, %v3722_v27 }
 0x3d4   :  { %v4157_v1 = vrot.slane %v4156_v63, 4  ;;  %v2755_v22 = vpop.f32.mrf.mxu0 }
 0x3d5   :  { %v3891_v61 = vmax.f32 %v3723_v13, 0.0  ;;  %v3084_v55 = vpop.f32.mrf.mxu1  ;;  %v3645_v35 = vpop.f32.mrf.mxu2 }
 0x3d6   :  { %v4158_v54 = vmax.f32 %v4156_v63, %v4157_v1  ;;  %v3646_v48 = vadd.f32 %v6527_v50, %v3645_v35  ;;  %v3085_v2 = vadd.f32 %v3084_v55, %v2755_v22 }
 0x3d7   :  { %v6585_v32 = vmax.f32 %v3890_v56, %v3891_v61  ;;  %4914 = vmatmul.msk.bf16.gmra.mxu3 %vm3268_vm12, %v3243_v10 }
 0x3d8   :  { %v4159_v6 = vrot.slane %v4158_v54, 2  ;;  %v3860_v62 = vmax.f32 %v3646_v48, 0.0 }
 0x3da   :  { %v4160_v53 = vmax.f32 %v4158_v54, %v4159_v6  ;;  %v3725_v58 = vpop.f32.mrf.mxu3 }
 0x3db   :  { %v3726_v10 = vadd.f32 %v6527_v50, %v3725_v58 }
 0x3dc   :  { %v4161_v0 = vrot.slane %v4160_v53, 1  ;;  %v2757_v36 = vpop.f32.mrf.mxu0 }
 0x3dd   :  { %v3086_v40 = vpop.f32.mrf.mxu1  ;;  %v3647_v49 = vpop.f32.mrf.mxu2  ;;  %v3892_v16 = vmax.f32 %v3726_v10, 0.0 }
 0x3de   :  { %v4162_v24 = vmax.f32 %v4160_v53, %v4161_v0  ;;  %v3087_v33 = vadd.f32 %v3086_v40, %v2757_v36  ;;  %v3648_v9 = vadd.f32 %v6527_v50, %v3647_v49 }
 0x3e0   :  { %v4466_v5 = vsel %vm4432_vm15, %v4162_v24, %v4465_v12  ;;  %v3228_v45 = vpack.c.bf16 %v3087_v33, %v3085_v2  ;;  %v3861_v43 = vmax.f32 %v3648_v9, 0.0 }
 0x3e2   :  { %v4163_v52 = vmax.f32 %v3860_v62, %v3861_v43  ;;  %4899 = vmatmul.msk.bf16.gmra.mxu2 %vm3268_vm12, %v3228_v45  ;;  %v3727_v41 = vpop.f32.mrf.mxu3 }
 0x3e3   :  { %v3728_v39 = vadd.f32 %v6527_v50, %v3727_v41 }
 0x3e4   :  { %v4164_v23 = vrot.slane %v4163_v52, 4  ;;  %v2760_v15 = vpop.f32.mrf.mxu0 }
 0x3e5   :  { %v3893_v17 = vmax.f32 %v3728_v39, 0.0  ;;  %v3089_v26 = vpop.f32.mrf.mxu1  ;;  %v3650_v20 = vpop.f32.mrf.mxu2 }
 0x3e6   :  { %v4165_v29 = vmax.f32 %v4163_v52, %v4164_v23  ;;  %v3090_v63 = vadd.f32 %v3089_v26, %v2760_v15  ;;  %v3651_v10 = vadd.f32 %v6527_v50, %v3650_v20 }
 0x3e7   :  { %v6597_v28 = vmax.f32 %v3892_v16, %v3893_v17  ;;  %4915 = vmatmul.msk.bf16.gmra.mxu3 %vm3268_vm12, %v3244_v19 }
 0x3e8   :  { %v4166_v7 = vrot.slane %v4165_v29, 2 }
 0x3ea   :  { %v4167_v4 = vmax.f32 %v4165_v29, %v4166_v7  ;;  %v3730_v60 = vpop.f32.mrf.mxu3 }
 0x3eb   :  { %v3731_v22 = vadd.f32 %v6527_v50, %v3730_v60 }
 0x3ec   :  { %v4168_v12 = vrot.slane %v4167_v4, 1  ;;  %v2762_v47 = vpop.f32.mrf.mxu0 }
 0x3ed   :  { %v3091_v30 = vpop.f32.mrf.mxu1  ;;  %v3652_v38 = vpop.f32.mrf.mxu2  ;;  %v3894_v56 = vmax.f32 %v3731_v22, 0.0 }
 0x3ee   :  { %v4169_v11 = vmax.f32 %v4167_v4, %v4168_v12  ;;  %v3092_v27 = vadd.f32 %v3091_v30, %v2762_v47  ;;  %v3653_v62 = vadd.f32 %v6527_v50, %v3652_v38 }
 0x3f0   :  { %v6604_v13 = vsel %vm4434_vm7, %v4169_v11, %v4466_v5  ;;  %v3229_v1 = vpack.c.bf16 %v3092_v27, %v3090_v63  ;;  %v3863_v39 = vmax.f32 %v3653_v62, 0.0 }
 0x3f2   :  { %4900 = vmatmul.msk.bf16.gmra.mxu2 %vm3268_vm12, %v3229_v1  ;;  %v3732_v37 = vpop.f32.mrf.mxu3 }
 0x3f3   :  { %v3733_v42 = vadd.f32 %v6527_v50, %v3732_v37 }
 0x3f4   :  { %v2765_v19 = vpop.f32.mrf.mxu0 }
 0x3f5   :  { %v3895_v61 = vmax.f32 %v3733_v42, 0.0  ;;  %v3094_v55 = vpop.f32.mrf.mxu1  ;;  %v3655_v35 = vpop.f32.mrf.mxu2 }
 0x3f6   :  { %v3095_v48 = vadd.f32 %v3094_v55, %v2765_v19  ;;  %v3656_v52 = vadd.f32 %v6527_v50, %v3655_v35 }
 0x3f7   :  { %v6609_v54 = vmax.f32 %v3894_v56, %v3895_v61  ;;  %4916 = vmatmul.msk.bf16.gmra.mxu3 %vm3268_vm12, %v3245_v3 }
 0x3f8   :  { %v3864_v29 = vmax.f32 %v3656_v52, 0.0 }
 0x3fa   :  { %v3735_v6 = vpop.f32.mrf.mxu3 }
 0x3fb   :  { %v3736_v49 = vadd.f32 %v6527_v50, %v3735_v6 }
 0x3fc   :  { %v2767_v53 = vpop.f32.mrf.mxu0 }
 0x3fd   :  { %v3096_v58 = vpop.f32.mrf.mxu1  ;;  %v3657_v0 = vpop.f32.mrf.mxu2  ;;  %v3896_v9 = vmax.f32 %v3736_v49, 0.0 }
 0x3fe   :  { %v3097_v36 = vadd.f32 %v3096_v58, %v2767_v53  ;;  %v3658_v45 = vadd.f32 %v6527_v50, %v3657_v0 }
 0x400   :  { %v3230_v40 = vpack.c.bf16 %v3097_v36, %v3095_v48  ;;  %v3865_v17 = vmax.f32 %v3658_v45, 0.0 }
 0x402   :  { %4901 = vmatmul.msk.bf16.gmra.mxu2 %vm3268_vm12, %v3230_v40  ;;  %v3737_v24 = vpop.f32.mrf.mxu3  ;;  %v4177_v47 = vmax.f32 %v3864_v29, %v3865_v17 }
 0x403   :  { %v3738_v2 = vadd.f32 %v6527_v50, %v3737_v24 }
 0x404   :  { %v2770_v33 = vpop.f32.mrf.mxu0  ;;  %v4178_v37 = vrot.slane %v4177_v47, 4 }
 0x405   :  { %v3897_v5 = vmax.f32 %v3738_v2, 0.0  ;;  %v3099_v51 = vpop.f32.mrf.mxu1  ;;  %v3660_v14 = vpop.f32.mrf.mxu2 }
 0x406   :  { %v3661_v23 = vadd.f32 %v6527_v50, %v3660_v14  ;;  %v3100_v26 = vadd.f32 %v3099_v51, %v2770_v33  ;;  %v4179_v61 = vmax.f32 %v4177_v47, %v4178_v37 }
 0x407   :  { %v6618_v3 = vmax.f32 %v3896_v9, %v3897_v5  ;;  %4917 = vmatmul.msk.bf16.gmra.mxu3 %vm3268_vm12, %v3246_v57  ;;  %v3862_v57 = vmax.f32 %v3651_v10, 0.0 }
 0x408   :  { %v3866_v12 = vmax.f32 %v3661_v23, 0.0  ;;  %v4180_v0 = vrot.slane %v4179_v61, 2 }
 0x409   :  { %v4170_v60 = vmax.f32 %v3862_v57, %v3863_v39 }
 0x40a   :  { %v3740_v43 = vpop.f32.mrf.mxu3  ;;  %v4181_v21 = vmax.f32 %v4179_v61, %v4180_v0 }
 0x40b   :  { %v3741_v20 = vadd.f32 %v6527_v50, %v3740_v43  ;;  %v4171_v63 = vrot.slane %v4170_v60, 4 }
 0x40c   :  { %v2772_v41 = vpop.f32.mrf.mxu0  ;;  %v4182_v10 = vrot.slane %v4181_v21, 1 }
 0x40d   :  { %v3101_v15 = vpop.f32.mrf.mxu1  ;;  %v3662_v16 = vpop.f32.mrf.mxu2  ;;  %v3898_v27 = vmax.f32 %v3741_v20, 0.0  ;;  %v4172_v56 = vmax.f32 %v4170_v60, %v4171_v63 }
 0x40e   :  { %v3102_v25 = vadd.f32 %v3101_v15, %v2772_v41  ;;  %v3663_v8 = vadd.f32 %v6527_v50, %v3662_v16  ;;  %v4183_v16 = vmax.f32 %v4181_v21, %v4182_v10 }
 0x40f   :  { %v4173_v53 = vrot.slane %v4172_v56, 2 }
 0x410   :  { %v3231_v7 = vpack.c.bf16 %v3102_v25, %v3100_v26  ;;  %v3867_v4 = vmax.f32 %v3663_v8, 0.0 }
 0x411   :  { %v4174_v24 = vmax.f32 %v4172_v56, %v4173_v53 }
 0x412   :  { %4902 = vmatmul.msk.bf16.gmra.mxu2 %vm3268_vm12, %v3231_v7  ;;  %v3742_v30 = vpop.f32.mrf.mxu3  ;;  %v4184_v38 = vmax.f32 %v3866_v12, %v3867_v4 }
 0x413   :  { %v3743_v11 = vadd.f32 %v6527_v50, %v3742_v30  ;;  %v4175_v14 = vrot.slane %v4174_v24, 1 }
 0x414   :  { %v4185_v42 = vrot.slane %v4184_v38, 4 }
 0x415   :  { %v3899_v1 = vmax.f32 %v3743_v11, 0.0  ;;  %v3665_v22 = vpop.f32.mrf.mxu2  ;;  %v4176_v15 = vmax.f32 %v4174_v24, %v4175_v14  ;;  %v6770_v11 = vpack.c.bf16 %v6268_v59, %v6265_v46 }
 0x416   :  { %v4186_v35 = vmax.f32 %v4184_v38, %v4185_v42  ;;  %v3666_v6 = vadd.f32 %v6527_v50, %v3665_v22 }
 0x417   :  { %v6633_v19 = vmax.f32 %v3898_v27, %v3899_v1  ;;  %4918 = vmatmul.msk.bf16.gmra.mxu3 %vm3268_vm12, %v3247_v18  ;;  %v6769_v18 = vpack.c.bf16 %v6240_v34, %v6237_v31  ;;  %v4468_v8 = vsel %vm4436_vm13, %v4176_v15, %v6604_v13 }
 0x418   :  { %v4187_v36 = vrot.slane %v4186_v35, 2  ;;  %v3868_v40 = vmax.f32 %v3666_v6, 0.0  ;;  %v4469_v29 = vsel %vm4438_vm14, %v4183_v16, %v4468_v8 }
 0x41a   :  { %v3745_v55 = vpop.f32.mrf.mxu3  ;;  %v4188_v9 = vmax.f32 %v4186_v35, %v4187_v36 }
 0x41b   :  { %v3746_v2 = vadd.f32 %v6527_v50, %v3745_v55 }
 0x41c   :  { %v4189_v41 = vrot.slane %v4188_v9, 1 }
 0x41d   :  { %v3667_v58 = vpop.f32.mrf.mxu2  ;;  %v3900_v62 = vmax.f32 %v3746_v2, 0.0 }
 0x41e   :  { %v3668_v48 = vadd.f32 %v6527_v50, %v3667_v58  ;;  %v4190_v17 = vmax.f32 %v4188_v9, %v4189_v41 }
 0x420   :  { %v3869_v49 = vmax.f32 %v3668_v48, 0.0  ;;  %v4470_v60 = vsel %vm4440_vm0, %v4190_v17, %v4469_v29 }
 0x422   :  { %v4191_v44 = vmax.f32 %v3868_v40, %v3869_v49  ;;  %4903 = vmatmul.msk.bf16.gmra.mxu2 %vm3268_vm12, %v6769_v18  ;;  %v3747_v33 = vpop.f32.mrf.mxu3 }
 0x423   :  { %v3748_v5 = vadd.f32 %v6527_v50, %v3747_v33 }
 0x424   :  { %v4192_v51 = vrot.slane %v4191_v44, 4 }
 0x425   :  { %v3901_v45 = vmax.f32 %v3748_v5, 0.0  ;;  %v3670_v43 = vpop.f32.mrf.mxu2 }
 0x426   :  { %v4193_v52 = vmax.f32 %v4191_v44, %v4192_v51  ;;  %v3671_v25 = vadd.f32 %v6527_v50, %v3670_v43 }
 0x427   :  { %v6647_v39 = vmax.f32 %v3900_v62, %v3901_v45 }
 0x428   :  { %v4194_v23 = vrot.slane %v4193_v52, 2  ;;  %v3870_v20 = vmax.f32 %v3671_v25, 0.0 }
 0x42a   :  { %v4195_v31 = vmax.f32 %v4193_v52, %v4194_v23  ;;  %v3750_v34 = vpop.f32.mrf.mxu3 }
 0x42b   :  { %v3751_v30 = vadd.f32 %v6527_v50, %v3750_v34 }
 0x42c   :  { %v4196_v26 = vrot.slane %v4195_v31, 1 }
 0x42d   :  { %v3672_v57 = vpop.f32.mrf.mxu2  ;;  %v3902_v27 = vmax.f32 %v3751_v30, 0.0 }
 0x42e   :  { %v4197_v7 = vmax.f32 %v4195_v31, %v4196_v26  ;;  %v3673_v4 = vadd.f32 %v6527_v50, %v3672_v57 }
 0x430   :  { %v4471_v12 = vsel %vm4442_vm1, %v4197_v7, %v4470_v60  ;;  %v3871_v47 = vmax.f32 %v3673_v4, 0.0 }
 0x431   :  { %4505 = vst [vmem:[#allocation2 + $0x20] sm:$0xff] %v4471_v12 }
 0x432   :  { %v4198_v38 = vmax.f32 %v3870_v20, %v3871_v47  ;;  %4904 = vmatmul.msk.bf16.gmra.mxu2 %vm3268_vm12, %v6770_v11  ;;  %v3752_v13 = vpop.f32.mrf.mxu3 }
 0x433   :  { %v3753_v63 = vadd.f32 %v6527_v50, %v3752_v13 }
 0x434   :  { %v4199_v42 = vrot.slane %v4198_v38, 4 }
 0x435   :  { %v3903_v1 = vmax.f32 %v3753_v63, 0.0  ;;  %v3675_v22 = vpop.f32.mrf.mxu2 }
 0x436   :  { %v3676_v61 = vadd.f32 %v6527_v50, %v3675_v22  ;;  %v4200_v35 = vmax.f32 %v4198_v38, %v4199_v42 }
 0x437   :  { %v4310_v37 = vmax.f32 %v3902_v27, %v3903_v1 }
 0x438   :  { %v3872_v58 = vmax.f32 %v3676_v61, 0.0  ;;  %v4201_v0 = vrot.slane %v4200_v35, 2 }
 0x439   :  { %v4311_v53 = vrot.slane %v4310_v37, 4 }
 0x43a   :  { %v3755_v56 = vpop.f32.mrf.mxu3  ;;  %v4202_v18 = vmax.f32 %v4200_v35, %v4201_v0 }
 0x43b   :  { %v3756_v59 = vadd.f32 %v6527_v50, %v3755_v56  ;;  %v4312_v40 = vmax.f32 %v4310_v37, %v4311_v53 }
 0x43c   :  { %v4203_v62 = vrot.slane %v4202_v18, 1 }
 0x43d   :  { %v3677_v55 = vpop.f32.mrf.mxu2  ;;  %v3904_v2 = vmax.f32 %v3756_v59, 0.0  ;;  %v4313_v9 = vrot.slane %v4312_v40, 2 }
 0x43e   :  { %v3678_v6 = vadd.f32 %v6527_v50, %v3677_v55  ;;  %v4204_v31 = vmax.f32 %v4202_v18, %v4203_v62 }
 0x43f   :  { %v4314_v10 = vmax.f32 %v4312_v40, %v4313_v9 }
 0x440   :  { %v3873_v46 = vmax.f32 %v3678_v6, 0.0 }
 0x441   :  { %v4315_v26 = vrot.slane %v4314_v10, 1 }
 0x442   :  { %v4205_v48 = vmax.f32 %v3872_v58, %v3873_v46  ;;  %v3757_v36 = vpop.f32.mrf.mxu3 }
 0x443   :  { %v3758_v49 = vadd.f32 %v6527_v50, %v3757_v36  ;;  %v4316_v20 = vmax.f32 %v4314_v10, %v4315_v26 }
 0x444   :  { %v4206_v24 = vrot.slane %v4205_v48, 4 }
 0x445   :  { %v3905_v21 = vmax.f32 %v3758_v49, 0.0  ;;  %v3680_v44 = vpop.f32.mrf.mxu2 }
 0x446   :  { %v4207_v33 = vmax.f32 %v4205_v48, %v4206_v24  ;;  %v3681_v23 = vadd.f32 %v6527_v50, %v3680_v44 }
 0x447   :  { %v4317_v5 = vmax.f32 %v3904_v2, %v3905_v21 }
 0x448   :  { %v4208_v51 = vrot.slane %v4207_v33, 2  ;;  %v3874_v57 = vmax.f32 %v3681_v23, 0.0 }
 0x449   :  { %v4318_v14 = vrot.slane %v4317_v5, 4 }
 0x44a   :  { %v4209_v45 = vmax.f32 %v4207_v33, %v4208_v51  ;;  %v3760_v43 = vpop.f32.mrf.mxu3 }
 0x44b   :  { %v4319_v52 = vmax.f32 %v4317_v5, %v4318_v14  ;;  %v3761_v4 = vadd.f32 %v6527_v50, %v3760_v43 }
 0x44c   :  { %v4210_v41 = vrot.slane %v4209_v45, 1 }
 0x44d   :  { %v4320_v15 = vrot.slane %v4319_v52, 2  ;;  %v3682_v16 = vpop.f32.mrf.mxu2  ;;  %v3906_v13 = vmax.f32 %v3761_v4, 0.0 }
 0x44e   :  { %v4211_v34 = vmax.f32 %v4209_v45, %v4210_v41  ;;  %v3683_v17 = vadd.f32 %v6527_v50, %v3682_v16 }
 0x44f   :  { %v4321_v25 = vmax.f32 %v4319_v52, %v4320_v15 }
 0x450   :  { %v4472_v8 = vsel %vm4430_vm3, %v4211_v34, %v4204_v31  ;;  %v3875_v29 = vmax.f32 %v3683_v17, 0.0 }
 0x451   :  { %v4322_v7 = vrot.slane %v4321_v25, 1 }
 0x452   :  { %v4212_v60 = vmax.f32 %v3874_v57, %v3875_v29  ;;  %v3762_v12 = vpop.f32.mrf.mxu3 }
 0x453   :  { %v4323_v47 = vmax.f32 %v4321_v25, %v4322_v7  ;;  %v3763_v30 = vadd.f32 %v6527_v50, %v3762_v12 }
 0x454   :  { %v4213_v38 = vrot.slane %v4212_v60, 4 }
 0x455   :  { %v4486_v11 = vsel %vm4430_vm3, %v4323_v47, %v4316_v20  ;;  %v3907_v63 = vmax.f32 %v3763_v30, 0.0  ;;  %v3685_v27 = vpop.f32.mrf.mxu2 }
 0x456   :  { %v4214_v1 = vmax.f32 %v4212_v60, %v4213_v38  ;;  %v3686_v6 = vadd.f32 %v6527_v50, %v3685_v27 }
 0x457   :  { %v4324_v22 = vmax.f32 %v3906_v13, %v3907_v63 }
 0x458   :  { %v4215_v37 = vrot.slane %v4214_v1, 2  ;;  %v3876_v36 = vmax.f32 %v3686_v6, 0.0 }
 0x459   :  { %v4325_v42 = vrot.slane %v4324_v22, 4 }
 0x45a   :  { %v4216_v56 = vmax.f32 %v4214_v1, %v4215_v37  ;;  %v3765_v61 = vpop.f32.mrf.mxu3 }
 0x45b   :  { %v4326_v55 = vmax.f32 %v4324_v22, %v4325_v42  ;;  %v3766_v24 = vadd.f32 %v6527_v50, %v3765_v61 }
 0x45c   :  { %v4217_v35 = vrot.slane %v4216_v56, 1 }
 0x45d   :  { %v4327_v53 = vrot.slane %v4326_v55, 2  ;;  %v3687_v58 = vpop.f32.mrf.mxu2  ;;  %v3908_v5 = vmax.f32 %v3766_v24, 0.0 }
 0x45e   :  { %v4218_v46 = vmax.f32 %v4216_v56, %v4217_v35  ;;  %v3688_v59 = vadd.f32 %v6527_v50, %v3687_v58 }
 0x45f   :  { %v4328_v0 = vmax.f32 %v4326_v55, %v4327_v53 }
 0x460   :  { %v4473_v48 = vsel %vm4432_vm15, %v4218_v46, %v4472_v8  ;;  %v3877_v40 = vmax.f32 %v3688_v59, 0.0 }
 0x461   :  { %v4329_v49 = vrot.slane %v4328_v0, 1 }
 0x462   :  { %v4219_v2 = vmax.f32 %v3876_v36, %v3877_v40  ;;  %v3767_v21 = vpop.f32.mrf.mxu3 }
 0x463   :  { %v4330_v44 = vmax.f32 %v4328_v0, %v4329_v49  ;;  %v3768_v18 = vadd.f32 %v6527_v50, %v3767_v21 }
 0x464   :  { %v4220_v33 = vrot.slane %v4219_v2, 4 }
 0x465   :  { %v4487_v9 = vsel %vm4432_vm15, %v4330_v44, %v4486_v11  ;;  %v3909_v51 = vmax.f32 %v3768_v18, 0.0  ;;  %v3690_v14 = vpop.f32.mrf.mxu2 }
 0x466   :  { %v4221_v62 = vmax.f32 %v4219_v2, %v4220_v33  ;;  %v3691_v11 = vadd.f32 %v6527_v50, %v3690_v14 }
 0x467   :  { %v4331_v45 = vmax.f32 %v3908_v5, %v3909_v51 }
 0x468   :  { %v4222_v43 = vrot.slane %v4221_v62, 2  ;;  %v3878_v56 = vmax.f32 %v3691_v11, 0.0 }
 0x469   :  { %v4332_v10 = vrot.slane %v4331_v45, 4 }
 0x46a   :  { %v4223_v52 = vmax.f32 %v4221_v62, %v4222_v43  ;;  %v3770_v41 = vpop.f32.mrf.mxu3 }
 0x46b   :  { %v4333_v23 = vmax.f32 %v4331_v45, %v4332_v10  ;;  %v3771_v55 = vadd.f32 %v6527_v50, %v3770_v41 }
 0x46c   :  { %v4224_v15 = vrot.slane %v4223_v52, 1 }
 0x46d   :  { %v4334_v16 = vrot.slane %v4333_v23, 2  ;;  %v3692_v31 = vpop.f32.mrf.mxu2  ;;  %v3910_v2 = vmax.f32 %v3771_v55, 0.0 }
 0x46e   :  { %v4225_v34 = vmax.f32 %v4223_v52, %v4224_v15  ;;  %v3693_v47 = vadd.f32 %v6527_v50, %v3692_v31 }
 0x46f   :  { %v4335_v17 = vmax.f32 %v4333_v23, %v4334_v16 }
 0x470   :  { %v6679_v26 = vsel %vm4434_vm7, %v4225_v34, %v4473_v48  ;;  %v3879_v63 = vmax.f32 %v3693_v47, 0.0 }
 0x471   :  { %v4336_v25 = vrot.slane %v4335_v17, 1 }
 0x472   :  { %v3772_v8 = vpop.f32.mrf.mxu3  ;;  %v4226_v53 = vmax.f32 %v3878_v56, %v3879_v63 }
 0x473   :  { %v4337_v57 = vmax.f32 %v4335_v17, %v4336_v25  ;;  %v3773_v22 = vadd.f32 %v6527_v50, %v3772_v8 }
 0x474   :  { %v4227_v21 = vrot.slane %v4226_v53, 4 }
 0x475   :  { %v6682_v29 = vsel %vm4434_vm7, %v4337_v57, %v4487_v9  ;;  %v3695_v7 = vpop.f32.mrf.mxu2  ;;  %v3911_v59 = vmax.f32 %v3773_v22, 0.0 }
 0x476   :  { %v3696_v13 = vadd.f32 %v6527_v50, %v3695_v7  ;;  %v4228_v43 = vmax.f32 %v4226_v53, %v4227_v21 }
 0x477   :  { %v4338_v9 = vmax.f32 %v3910_v2, %v3911_v59 }
 0x478   :  { %v3880_v35 = vmax.f32 %v3696_v13, 0.0  ;;  %v4229_v34 = vrot.slane %v4228_v43, 2 }
 0x479   :  { %v4339_v10 = vrot.slane %v4338_v9, 4 }
 0x47a   :  { %v3775_v4 = vpop.f32.mrf.mxu3  ;;  %v4230_v47 = vmax.f32 %v4228_v43, %v4229_v34 }
 0x47b   :  { %v3776_v58 = vadd.f32 %v6527_v50, %v3775_v4  ;;  %v4340_v25 = vmax.f32 %v4338_v9, %v4339_v10 }
 0x47c   :  { %v4231_v56 = vrot.slane %v4230_v47, 1 }
 0x47d   :  { %v3697_v60 = vpop.f32.mrf.mxu2  ;;  %v3912_v44 = vmax.f32 %v3776_v58, 0.0 }
 0x47e   :  { %v3698_v30 = vadd.f32 %v6527_v50, %v3697_v60 }
 0x480   :  { %v3881_v37 = vmax.f32 %v3698_v30, 0.0 }
 0x482   :  { %v3777_v12 = vpop.f32.mrf.mxu3  ;;  %v4233_v0 = vmax.f32 %v3880_v35, %v3881_v37 }
 0x483   :  { %v3778_v61 = vadd.f32 %v6527_v50, %v3777_v12 }
 0x484   :  { %v4234_v5 = vrot.slane %v4233_v0, 4 }
 0x485   :  { %v3700_v20 = vpop.f32.mrf.mxu2  ;;  %v3913_v40 = vmax.f32 %v3778_v61, 0.0 }
 0x486   :  { %v3701_v27 = vadd.f32 %v6527_v50, %v3700_v20  ;;  %v4235_v52 = vmax.f32 %v4233_v0, %v4234_v5 }
 0x487   :  { %v4345_v14 = vmax.f32 %v3912_v44, %v3913_v40  ;;  %v4232_v40 = vmax.f32 %v4230_v47, %v4231_v56  ;;  %v4304_v56 = vrot.slane %v6647_v39, 4 }
 0x488   :  { %v3882_v46 = vmax.f32 %v3701_v27, 0.0  ;;  %v4236_v8 = vrot.slane %v4235_v52, 2 }
 0x489   :  { %v4346_v23 = vrot.slane %v4345_v14, 4 }
 0x48a   :  { %v3780_v38 = vpop.f32.mrf.mxu3  ;;  %v4237_v11 = vmax.f32 %v4235_v52, %v4236_v8 }
 0x48b   :  { %v3781_v48 = vadd.f32 %v6527_v50, %v3780_v38  ;;  %v4347_v7 = vmax.f32 %v4345_v14, %v4346_v23  ;;  %v4341_v38 = vrot.slane %v4340_v25, 2 }
 0x48c   :  { %v4238_v53 = vrot.slane %v4237_v11, 1 }
 0x48d   :  { %v3702_v1 = vpop.f32.mrf.mxu2  ;;  %v3914_v51 = vmax.f32 %v3781_v48, 0.0  ;;  %v4348_v27 = vrot.slane %v4347_v7, 2 }
 0x48e   :  { %v3703_v42 = vadd.f32 %v6527_v50, %v3702_v1  ;;  %v4239_v2 = vmax.f32 %v4237_v11, %v4238_v53 }
 0x490   :  { %v3883_v6 = vmax.f32 %v3703_v42, 0.0 }
 0x492   :  { %v3782_v36 = vpop.f32.mrf.mxu3  ;;  %v4240_v49 = vmax.f32 %v3882_v46, %v3883_v6  ;;  %v4342_v6 = vmax.f32 %v4340_v25, %v4341_v38  ;;  %v4349_v46 = vmax.f32 %v4347_v7, %v4348_v27  ;;  %v4276_v38 = vrot.slane %v6597_v28, 4 }
 0x493   :  { %v3783_v24 = vadd.f32 %v6527_v50, %v3782_v36 }
 0x494   :  { %v4241_v62 = vrot.slane %v4240_v49, 4  ;;  %v4350_v44 = vrot.slane %v4349_v46, 1 }
 0x495   :  { %v3915_v18 = vmax.f32 %v3783_v24, 0.0  ;;  %v3705_v33 = vpop.f32.mrf.mxu2  ;;  %v4343_v24 = vrot.slane %v4342_v6, 1 }
 0x496   :  { %v4242_v15 = vmax.f32 %v4240_v49, %v4241_v62  ;;  %v3706_v31 = vadd.f32 %v6527_v50, %v3705_v33 }
 0x497   :  { %v4352_v45 = vmax.f32 %v3914_v51, %v3915_v18  ;;  %v4475_v51 = vsel %vm4436_vm13, %v4232_v40, %v6679_v26 }
 0x498   :  { %v4243_v4 = vrot.slane %v4242_v15, 2  ;;  %v3884_v12 = vmax.f32 %v3706_v31, 0.0  ;;  %v4476_v43 = vsel %vm4438_vm14, %v4239_v2, %v4475_v51 }
 0x499   :  { %v4353_v16 = vrot.slane %v4352_v45, 4 }
 0x49a   :  { %v3785_v41 = vpop.f32.mrf.mxu3  ;;  %v4244_v1 = vmax.f32 %v4242_v15, %v4243_v4 }
 0x49b   :  { %v4354_v60 = vmax.f32 %v4352_v45, %v4353_v16  ;;  %v3786_v30 = vadd.f32 %v6527_v50, %v3785_v41  ;;  %v4344_v45 = vmax.f32 %v4342_v6, %v4343_v24  ;;  %v4351_v41 = vmax.f32 %v4349_v46, %v4350_v44 }
 0x49c   :  { %v4245_v59 = vrot.slane %v4244_v1, 1 }
 0x49d   :  { %v3707_v17 = vpop.f32.mrf.mxu2  ;;  %v4355_v37 = vrot.slane %v4354_v60, 2  ;;  %v3916_v61 = vmax.f32 %v3786_v30, 0.0  ;;  %v4489_v26 = vsel %vm4436_vm13, %v4344_v45, %v6682_v29  ;;  %v4269_v30 = vrot.slane %v6585_v32, 4 }
 0x49e   :  { %v3708_v57 = vadd.f32 %v6527_v50, %v3707_v17  ;;  %v4246_v18 = vmax.f32 %v4244_v1, %v4245_v59  ;;  %v4490_v8 = vsel %vm4438_vm14, %v4351_v41, %v4489_v26  ;;  %v4283_v29 = vrot.slane %v6609_v54, 4 }
 0x49f   :  { %v4356_v48 = vmax.f32 %v4354_v60, %v4355_v37  ;;  %v4297_v37 = vrot.slane %v6633_v19, 4 }
 0x4a0   :  { %v3885_v20 = vmax.f32 %v3708_v57, 0.0  ;;  %v4477_v23 = vsel %vm4440_vm0, %v4246_v18, %v4476_v43 }
 0x4a1   :  { %v4357_v9 = vrot.slane %v4356_v48, 1  ;;  %v4298_v59 = vmax.f32 %v6633_v19, %v4297_v37 }
 0x4a2   :  { %v4247_v13 = vmax.f32 %v3884_v12, %v3885_v20  ;;  %v3787_v63 = vpop.f32.mrf.mxu3 }
 0x4a3   :  { %v3788_v22 = vadd.f32 %v6527_v50, %v3787_v63  ;;  %v4358_v16 = vmax.f32 %v4356_v48, %v4357_v9  ;;  %v4290_v63 = vrot.slane %v6618_v3, 4  ;;  %v4299_v24 = vrot.slane %v4298_v59, 2 }
 0x4a4   :  { %v4248_v42 = vrot.slane %v4247_v13, 4 }
 0x4a5   :  { %v3917_v55 = vmax.f32 %v3788_v22, 0.0  ;;  %v3710_v35 = vpop.f32.mrf.mxu2  ;;  %v4491_v7 = vsel %vm4440_vm0, %v4358_v16, %v4490_v8  ;;  %v4270_v22 = vmax.f32 %v6585_v32, %v4269_v30  ;;  %v4291_v6 = vmax.f32 %v6618_v3, %v4290_v63 }
 0x4a6   :  { %v4249_v58 = vmax.f32 %v4247_v13, %v4248_v42  ;;  %v3711_v34 = vadd.f32 %v6527_v50, %v3710_v35  ;;  %v4277_v42 = vmax.f32 %v6597_v28, %v4276_v38  ;;  %v4284_v35 = vmax.f32 %v6609_v54, %v4283_v29 }
 0x4a7   :  { %v4359_v0 = vmax.f32 %v3916_v61, %v3917_v55  ;;  %v4271_v46 = vrot.slane %v4270_v22, 2  ;;  %v4305_v32 = vmax.f32 %v6647_v39, %v4304_v56 }
 0x4a8   :  { %v4250_v36 = vrot.slane %v4249_v58, 2  ;;  %v3886_v4 = vmax.f32 %v3711_v34, 0.0  ;;  %v4285_v48 = vrot.slane %v4284_v35, 2 }
 0x4a9   :  { %v4360_v49 = vrot.slane %v4359_v0, 4 }
 0x4aa   :  { %v4251_v21 = vmax.f32 %v4249_v58, %v4250_v36  ;;  %v4292_v36 = vrot.slane %v4291_v6, 2  ;;  %v4286_v44 = vmax.f32 %v4284_v35, %v4285_v48 }
 0x4ab   :  { %v4361_v33 = vmax.f32 %v4359_v0, %v4360_v49  ;;  %v4272_v49 = vmax.f32 %v4270_v22, %v4271_v46 }
 0x4ac   :  { %v4252_v5 = vrot.slane %v4251_v21, 1  ;;  %v4293_v3 = vmax.f32 %v4291_v6, %v4292_v36  ;;  %v4287_v39 = vrot.slane %v4286_v44, 1 }
 0x4ad   :  { %v4362_v14 = vrot.slane %v4361_v33, 2  ;;  %v3712_v62 = vpop.f32.mrf.mxu2  ;;  %v4273_v9 = vrot.slane %v4272_v49, 1 }
 0x4ae   :  { %v4253_v10 = vmax.f32 %v4251_v21, %v4252_v5  ;;  %v3713_v52 = vadd.f32 %v6527_v50, %v3712_v62  ;;  %v4306_v21 = vrot.slane %v4305_v32, 2  ;;  %v4300_v5 = vmax.f32 %v4298_v59, %v4299_v24 }
 0x4af   :  { %v4363_v15 = vmax.f32 %v4361_v33, %v4362_v14  ;;  %v4294_v62 = vrot.slane %v4293_v3, 1  ;;  %v4288_v16 = vmax.f32 %v4286_v44, %v4287_v39 }
 0x4b0   :  { %v4478_v31 = vsel %vm4442_vm1, %v4253_v10, %v4477_v23  ;;  %v3887_v25 = vmax.f32 %v3713_v52, 0.0  ;;  %v4307_v51 = vmax.f32 %v4305_v32, %v4306_v21  ;;  %v4274_v10 = vmax.f32 %v4272_v49, %v4273_v9 }
 0x4b1   :  { %4506 = vst [vmem:[#allocation2 + $0x28] sm:$0xff] %v4478_v31  ;;  %v4364_v17 = vrot.slane %v4363_v15, 1  ;;  %v4301_v52 = vrot.slane %v4300_v5, 1  ;;  %v4295_v34 = vmax.f32 %v4293_v3, %v4294_v62 }
 0x4b2   :  { %v4254_v20 = vmax.f32 %v3886_v4, %v3887_v25  ;;  %v4308_v23 = vrot.slane %v4307_v51, 1 }
 0x4b3   :  { %v4365_v57 = vmax.f32 %v4363_v15, %v4364_v17  ;;  %v4302_v26 = vmax.f32 %v4300_v5, %v4301_v52 }
 0x4b4   :  { %v4255_v47 = vrot.slane %v4254_v20, 4  ;;  %v4309_v8 = vmax.f32 %v4307_v51, %v4308_v23 }
 0x4b5   :  { %v4492_v60 = vsel %vm4442_vm1, %v4365_v57, %v4491_v7  ;;  %v3715_v12 = vpop.f32.mrf.mxu2 }
 0x4b6   :  { %4508 = vst [vmem:[#allocation2 + $0x38] sm:$0xff] %v4492_v60  ;;  %v3716_v11 = vadd.f32 %v6527_v50, %v3715_v12  ;;  %v4256_v27 = vmax.f32 %v4254_v20, %v4255_v47 }
 0x4b8   :  { %v3888_v61 = vmax.f32 %v3716_v11, 0.0  ;;  %v4257_v53 = vrot.slane %v4256_v27, 2 }
 0x4ba   :  { %v4258_v28 = vmax.f32 %v4256_v27, %v4257_v53 }
 0x4bc   :  { %v4259_v18 = vrot.slane %v4258_v28, 1 }
 0x4bd   :  { %v3717_v13 = vpop.f32.mrf.mxu2 }
 0x4be   :  { %v3718_v1 = vadd.f32 %v6527_v50, %v3717_v13  ;;  %v4278_v50 = vrot.slane %v4277_v42, 2  ;;  %v4260_v45 = vmax.f32 %v4258_v28, %v4259_v18 }
 0x4c0   :  { %v3889_v55 = vmax.f32 %v3718_v1, 0.0  ;;  %v4279_v2 = vmax.f32 %v4277_v42, %v4278_v50 }
 0x4c2   :  { %v4261_v58 = vmax.f32 %v3888_v61, %v3889_v55  ;;  %v4280_v19 = vrot.slane %v4279_v2, 1 }
 0x4c4   :  { %v4262_v0 = vrot.slane %v4261_v58, 4  ;;  %v4281_v41 = vmax.f32 %v4279_v2, %v4280_v19 }
 0x4c6   :  { %v4263_v40 = vmax.f32 %v4261_v58, %v4262_v0 }
 0x4c8   :  { %v4264_v54 = vrot.slane %v4263_v40, 2 }
 0x4ca   :  { %v4265_v33 = vmax.f32 %v4263_v40, %v4264_v54 }
 0x4cc   :  { %v4266_v14 = vrot.slane %v4265_v33, 1 }
 0x4ce   :  { %v4267_v43 = vmax.f32 %v4265_v33, %v4266_v14 }
 0x4d0   :  { %v4479_v15 = vsel %vm4430_vm3, %v4267_v43, %v4260_v45 }
 0x4d1   :  { %v4480_v31 = vsel %vm4432_vm15, %v4274_v10, %v4479_v15 }
 0x4d2   :  { %v4481_v17 = vsel %vm4434_vm7, %v4281_v41, %v4480_v31 }
 0x4d3   :  { %v4482_v25 = vsel %vm4436_vm13, %v4288_v16, %v4481_v17 }
 0x4d4   :  { %v4483_v57 = vsel %vm4438_vm14, %v4295_v34, %v4482_v25 }
 0x4d5   :  { %v4484_v7 = vsel %vm4440_vm0, %v4302_v26, %v4483_v57 }
 0x4d6   :  { %v4485_v4 = vsel %vm4442_vm1, %v4309_v8, %v4484_v7 }
 0x4d7   :  { %4507 = vst [vmem:[#allocation2 + $0x30] sm:$0xff] %v4485_v4 }
 0x4d8   :  { %4521 = dma.vmem_to_hbm [thread:$0]  %s4514_s20, 1024, %s4516_s23, [#allocation3], %s5070_s24, %s5070_s24, %s5071_s25  }
 0x4d9   :  { %5066 = dma.done.wait [#allocation3], 1024  }
 0x4da   :  { %5067 = vsyncadd [#allocation3], 4294966272 }
 0x4db   :  { %4526 = vsyncpa [#allocation3], 1 }

</bundles_post_ra>
